<compile_context>
chip_gen: v7x
topology: tpu7x:2x2x1
jax: 0.10.0
libtpu: 0.0.40
codegen_flags: <defaults>
</compile_context>

<pallas_src>
import math
import jax
import jax.numpy as jnp
from jax.experimental import pallas as pl
from jax.experimental.pallas import tpu as pltpu  # noqa: F401  (kept for real-shape scaling notes)

# ---- small, lane-aligned BERT config ----
VOCAB = 96
TYPE_VOCAB = 2
MAX_POS = 32
B = 2            # batch
S = 8            # sequence length
H = 128          # hidden size
NUM_HEADS = 4
HEAD_DIM = H // NUM_HEADS
INTER = 256      # intermediate size
NUM_LAYERS = 2
LN_EPS = 1e-12
BS = B * S
NB = NUM_HEADS * B   # flattened (head, batch) einsum batch axis


# ----------------- in-kernel math helpers -----------------
def _erf(x):
    # Abramowitz & Stegun 7.1.26 polynomial (|err| < 1.5e-7), Mosaic-friendly ops only.
    # TODO(synk): jax.lax.erf would be cheaper and closer to torch.erf if Mosaic accepts
    # the lowering; the polynomial is kept because it is known to lower cleanly.
    a1, a2, a3, a4, a5 = 0.254829592, -0.284496736, 1.421413741, -1.453152027, 1.061405429
    p = 0.3275911
    sgn = jnp.where(x >= 0.0, 1.0, -1.0)
    ax = jnp.abs(x)
    t = 1.0 / (1.0 + p * ax)
    poly = ((((a5 * t + a4) * t + a3) * t + a2) * t + a1) * t
    return sgn * (1.0 - poly * jnp.exp(-ax * ax))


def _gelu(x):
    return x * 0.5 * (1.0 + _erf(x * (1.0 / math.sqrt(2.0))))


# ----------------- fused Pallas kernel -----------------
def bert_fused_kernel(emb_ref, mask_ref, eg_ref, eb_ref,
                      wqkv_ref, bqkv_ref, wo_ref, bo_ref, g1_ref, be1_ref,
                      wi_ref, bi_ref, w2_ref, b2_ref, g2_ref, be2_ref,
                      pw_ref, pb_ref,
                      layers_ref, pooled_ref):
    # Hoisted constants (created once at trace time).
    ones_h = jnp.ones((H, 1), jnp.float32)       # MXU reduction vector
    inv_h = 1.0 / H
    scale = 1.0 / math.sqrt(HEAD_DIM)

    def layer_norm(x, gamma, beta):
        # Row mean / variance via MXU dots: frees the XLU lane-reduce slot
        # (the slot closest to saturation at these shapes).
        u = jnp.dot(x, ones_h, preferred_element_type=jnp.float32) * inv_h
        c = x - u
        s = jnp.dot(c * c, ones_h, preferred_element_type=jnp.float32) * inv_h
        return gamma * (c * jax.lax.rsqrt(s + LN_EPS)) + beta

    # Additive attention-mask bias, expanded in-kernel (one VPU broadcast of a tiny tile).
    # Flattened (head, batch) index = h*B + b, matching split_heads below.
    bias = (1.0 - mask_ref[...]) * -10000.0                                   # (B, S)
    bias_hb = jnp.broadcast_to(bias[None, :, None, :],
                               (NUM_HEADS, B, S, S)).reshape(NB, S, S)        # (NB, S, S)

    def split_heads(t):
        # (BS, H) -> (NB, S, D): NH lane slices + one stack + one tile-granular reshape.
        hs = jnp.stack([t[:, h * HEAD_DIM:(h + 1) * HEAD_DIM]
                        for h in range(NUM_HEADS)], axis=0)                   # (NH, BS, D)
        return hs.reshape(NB, S, HEAD_DIM)                                    # index = h*B + b

    # --- embeddings LayerNorm ---
    x = layer_norm(emb_ref[...], eg_ref[...], eb_ref[...])                    # (BS, H)

    # --- encoder layers (static unroll, NUM_LAYERS=2) ---
    for l in range(NUM_LAYERS):
        # fused QKV projection: (16,128) @ (128,384)
        qkv = jnp.dot(x, wqkv_ref[l], preferred_element_type=jnp.float32) + bqkv_ref[l]
        q = split_heads(qkv[:, 0:H])
        k = split_heads(qkv[:, H:2 * H])
        v = split_heads(qkv[:, 2 * H:3 * H])

        # scores + softmax, fully batched over all B*NH heads
        sc = jnp.einsum('hqd,hkd->hqk', q, k,
                        preferred_element_type=jnp.float32) * scale + bias_hb  # (NB, S, S)
        m = jnp.max(sc, axis=-1, keepdims=True)
        e = jnp.exp(sc - m)
        probs = e / jnp.sum(e, axis=-1, keepdims=True)        # exact divide (PyTorch parity)
        ctx = jnp.einsum('hqk,hkd->hqd', probs, v,
                         preferred_element_type=jnp.float32)                  # (NB, S, D)
        # merge heads back: per-head major slice + one lane concat + tile-granular reshape
        ctx = jnp.concatenate([ctx[h * B:(h + 1) * B] for h in range(NUM_HEADS)],
                              axis=-1).reshape(BS, H)                         # (BS, H)

        # attention output projection + residual + LN
        attn = jnp.dot(ctx, wo_ref[l], preferred_element_type=jnp.float32) + bo_ref[l]
        h1 = layer_norm(attn + x, g1_ref[l], be1_ref[l])

        # FFN: GELU(h1 @ Wi + bi) @ W2 + b2, residual + LN
        inter = _gelu(jnp.dot(h1, wi_ref[l], preferred_element_type=jnp.float32) + bi_ref[l])
        ffn = jnp.dot(inter, w2_ref[l], preferred_element_type=jnp.float32) + b2_ref[l]
        x = layer_norm(ffn + h1, g2_ref[l], be2_ref[l])

        layers_ref[l] = x                                                     # per-layer output

    # --- pooler on the first token of the last layer ---
    first = x.reshape(B, S, H)[:, 0, :]                                       # (B, H)
    pooled_ref[...] = jnp.tanh(
        jnp.dot(first, pw_ref[...], preferred_element_type=jnp.float32) + pb_ref[...])


# ----------------- wrapper (pallas_call plumbing) -----------------
def _pack_layer_params(layers):
    cat = lambda a, b, c: jnp.concatenate([a, b, c], axis=1)
    return {
        "wqkv": jnp.stack([cat(lp["wq"], lp["wk"], lp["wv"]) for lp in layers]),   # (L, H, 3H)
        "bqkv": jnp.stack([cat(lp["bq"], lp["bk"], lp["bv"]) for lp in layers]),   # (L, 1, 3H)
        "wo": jnp.stack([lp["wo"] for lp in layers]),
        "bo": jnp.stack([lp["bo"] for lp in layers]),
        "ln1_g": jnp.stack([lp["ln1_g"] for lp in layers]),
        "ln1_b": jnp.stack([lp["ln1_b"] for lp in layers]),
        "wi": jnp.stack([lp["wi"] for lp in layers]),
        "bi": jnp.stack([lp["bi"] for lp in layers]),
        "w2": jnp.stack([lp["w2"] for lp in layers]),
        "b2": jnp.stack([lp["b2"] for lp in layers]),
        "ln2_g": jnp.stack([lp["ln2_g"] for lp in layers]),
        "ln2_b": jnp.stack([lp["ln2_b"] for lp in layers]),
    }


def bert_model(input_ids, token_type_ids, attention_mask, params):
    ep = params["embeddings"]
    # embedding gathers + sum in plain JAX glue (table gather has no clean blocked form here)
    we = jnp.take(ep["word_emb"], input_ids, axis=0)                          # (B, S, H)
    pe = jnp.take(ep["pos_emb"], jnp.arange(S, dtype=jnp.int32), axis=0)      # (S, H)
    te = jnp.take(ep["type_emb"], token_type_ids, axis=0)                     # (B, S, H)
    emb = (we + pe[None] + te).reshape(BS, H)

    mask_f = attention_mask.astype(jnp.float32)                               # (B, S)

    pp = _pack_layer_params(params["layers"])

    # Single invocation, no grid: every operand is a whole-array VMEM block
    # (total ~1 MiB f32 at these shapes).  See NOTE at top for real-shape scaling
    # (parallel batch/seq grid axis, per-layer double-buffered BlockSpecs,
    #  bf16 weights, FFN tiling, vmem_limit_bytes).
    layers_out, pooled = pl.pallas_call(
        bert_fused_kernel,
        out_shape=(jax.ShapeDtypeStruct((NUM_LAYERS, BS, H), jnp.float32),
                   jax.ShapeDtypeStruct((B, H), jnp.float32)),
    )(emb, mask_f, ep["ln_gamma"], ep["ln_beta"],
      pp["wqkv"], pp["bqkv"], pp["wo"], pp["bo"], pp["ln1_g"], pp["ln1_b"],
      pp["wi"], pp["bi"], pp["w2"], pp["b2"], pp["ln2_g"], pp["ln2_b"],
      params["pool_w"], params["pool_b"])

    all_encoder_layers = [layers_out[i].reshape(B, S, H) for i in range(NUM_LAYERS)]
    return all_encoder_layers, pooled


# ----------------- deterministic parameter init -----------------
def init_params(key):
    def normal(k, shape):
        return 0.02 * jax.random.normal(k, shape, dtype=jnp.float32)

    keys = jax.random.split(key, 4 + NUM_LAYERS)
    emb = {
        "word_emb": normal(keys[0], (VOCAB, H)),
        "pos_emb": normal(keys[1], (MAX_POS, H)),
        "type_emb": normal(keys[2], (TYPE_VOCAB, H)),
        "ln_gamma": jnp.ones((1, H), jnp.float32),
        "ln_beta": jnp.zeros((1, H), jnp.float32),
    }
    layers = []
    for i in range(NUM_LAYERS):
        lk = jax.random.split(keys[4 + i], 6)
        layers.append({
            "wq": normal(lk[0], (H, H)), "bq": jnp.zeros((1, H), jnp.float32),
            "wk": normal(lk[1], (H, H)), "bk": jnp.zeros((1, H), jnp.float32),
            "wv": normal(lk[2], (H, H)), "bv": jnp.zeros((1, H), jnp.float32),
            "wo": normal(lk[3], (H, H)), "bo": jnp.zeros((1, H), jnp.float32),
            "ln1_g": jnp.ones((1, H), jnp.float32), "ln1_b": jnp.zeros((1, H), jnp.float32),
            "wi": normal(lk[4], (H, INTER)), "bi": jnp.zeros((1, INTER), jnp.float32),
            "w2": normal(lk[5], (INTER, H)), "b2": jnp.zeros((1, H), jnp.float32),
            "ln2_g": jnp.ones((1, H), jnp.float32), "ln2_b": jnp.zeros((1, H), jnp.float32),
        })
    return {"embeddings": emb, "layers": layers,
            "pool_w": normal(keys[3], (H, H)),
            "pool_b": jnp.zeros((1, H), jnp.float32)}


if __name__ == "__main__":
    root = jax.random.PRNGKey(0)
    pkey, ikey = jax.random.split(root)
    params = init_params(pkey)

    input_ids = jax.random.randint(ikey, (B, S), 0, VOCAB, dtype=jnp.int32)
    token_type_ids = jnp.zeros((B, S), jnp.int32)
    attention_mask = jnp.ones((B, S), jnp.int32).at[1, 6:].set(0)   # pad last 2 tokens of batch 1

    bert_fn = jax.jit(bert_model)
    all_layers, pooled = bert_fn(input_ids, token_type_ids, attention_mask, params)
    for layer_out in all_layers:
        jax.block_until_ready(layer_out)
    jax.block_until_ready(pooled)
    print("KERNEL_OK")
</pallas_src>

<mosaic_0001>
module attributes {stable_mosaic.version = 11 : i64} {
  func.func @bert_fused_kernel(%arg0: memref<16x128xf32, #tpu.memory_space<vmem>>, %arg1: memref<2x8xf32, #tpu.memory_space<vmem>>, %arg2: memref<1x128xf32, #tpu.memory_space<vmem>>, %arg3: memref<1x128xf32, #tpu.memory_space<vmem>>, %arg4: memref<2x128x384xf32, #tpu.memory_space<vmem>>, %arg5: memref<2x1x384xf32, #tpu.memory_space<vmem>>, %arg6: memref<2x128x128xf32, #tpu.memory_space<vmem>>, %arg7: memref<2x1x128xf32, #tpu.memory_space<vmem>>, %arg8: memref<2x1x128xf32, #tpu.memory_space<vmem>>, %arg9: memref<2x1x128xf32, #tpu.memory_space<vmem>>, %arg10: memref<2x128x256xf32, #tpu.memory_space<vmem>>, %arg11: memref<2x1x256xf32, #tpu.memory_space<vmem>>, %arg12: memref<2x256x128xf32, #tpu.memory_space<vmem>>, %arg13: memref<2x1x128xf32, #tpu.memory_space<vmem>>, %arg14: memref<2x1x128xf32, #tpu.memory_space<vmem>>, %arg15: memref<2x1x128xf32, #tpu.memory_space<vmem>>, %arg16: memref<128x128xf32, #tpu.memory_space<vmem>>, %arg17: memref<1x128xf32, #tpu.memory_space<vmem>>, %arg18: memref<2x16x128xf32, #tpu.memory_space<vmem>>, %arg19: memref<2x128xf32, #tpu.memory_space<vmem>>) attributes {dimension_semantics = [], scalar_prefetch = 0 : i64, scratch_operands = 0 : i64, tpu.core_type = #tpu.core_type<tc>} {
    %cst = arith.constant 1.000000e+00 : f32
    %0 = vector.broadcast %cst : f32 to vector<128x1xf32>
    %c0 = arith.constant 0 : index
    %c0_0 = arith.constant 0 : index
    %1 = vector.load %arg1[%c0, %c0_0] : memref<2x8xf32, #tpu.memory_space<vmem>>, vector<2x8xf32>
    %cst_1 = arith.constant 1.000000e+00 : f32
    %2 = vector.broadcast %cst_1 : f32 to vector<2x8xf32>
    %3 = arith.subf %2, %1 : vector<2x8xf32>
    %cst_2 = arith.constant -1.000000e+04 : f32
    %4 = vector.broadcast %cst_2 : f32 to vector<2x8xf32>
    %5 = arith.mulf %3, %4 : vector<2x8xf32>
    %6 = vector.shape_cast %5 : vector<2x8xf32> to vector<1x2x1x8xf32>
    %7 = vector.shape_cast %6 : vector<1x2x1x8xf32> to vector<1x2x1x8xf32>
    %8 = vector.broadcast %7 : vector<1x2x1x8xf32> to vector<4x2x8x8xf32>
    %9 = vector.shape_cast %8 : vector<4x2x8x8xf32> to vector<8x8x8xf32>
    %c0_3 = arith.constant 0 : index
    %c0_4 = arith.constant 0 : index
    %10 = vector.load %arg0[%c0_3, %c0_4] : memref<16x128xf32, #tpu.memory_space<vmem>>, vector<16x128xf32>
    %c0_5 = arith.constant 0 : index
    %c0_6 = arith.constant 0 : index
    %11 = vector.load %arg2[%c0_5, %c0_6] : memref<1x128xf32, #tpu.memory_space<vmem>>, vector<1x128xf32>
    %c0_7 = arith.constant 0 : index
    %c0_8 = arith.constant 0 : index
    %12 = vector.load %arg3[%c0_7, %c0_8] : memref<1x128xf32, #tpu.memory_space<vmem>>, vector<1x128xf32>
    %cst_9 = arith.constant dense<0.000000e+00> : vector<16x1xf32>
    %13 = tpu.matmul %10, %0, %cst_9 {dimension_numbers = #tpu.dot_dimension_numbers<[1], [0], [0], [1], [0, 0, 1, 1], [], []>} : vector<16x128xf32>, vector<128x1xf32>, vector<16x1xf32> -> vector<16x1xf32>
    %cst_10 = arith.constant 7.812500e-03 : f32
    %14 = vector.broadcast %cst_10 : f32 to vector<16x1xf32>
    %15 = arith.mulf %13, %14 : vector<16x1xf32>
    %16 = vector.broadcast %15 : vector<16x1xf32> to vector<16x128xf32>
    %17 = arith.subf %10, %16 : vector<16x128xf32>
    %18 = arith.mulf %17, %17 : vector<16x128xf32>
    %cst_11 = arith.constant dense<0.000000e+00> : vector<16x1xf32>
    %19 = tpu.matmul %18, %0, %cst_11 {dimension_numbers = #tpu.dot_dimension_numbers<[1], [0], [0], [1], [0, 0, 1, 1], [], []>} : vector<16x128xf32>, vector<128x1xf32>, vector<16x1xf32> -> vector<16x1xf32>
    %cst_12 = arith.constant 7.812500e-03 : f32
    %20 = vector.broadcast %cst_12 : f32 to vector<16x1xf32>
    %21 = arith.mulf %19, %20 : vector<16x1xf32>
    %cst_13 = arith.constant 9.99999996E-13 : f32
    %22 = vector.broadcast %cst_13 : f32 to vector<16x1xf32>
    %23 = arith.addf %21, %22 : vector<16x1xf32>
    %24 = math.rsqrt %23 : vector<16x1xf32>
    %25 = vector.broadcast %24 : vector<16x1xf32> to vector<16x128xf32>
    %26 = arith.mulf %17, %25 : vector<16x128xf32>
    %27 = vector.broadcast %11 : vector<1x128xf32> to vector<16x128xf32>
    %28 = arith.mulf %27, %26 : vector<16x128xf32>
    %29 = vector.broadcast %12 : vector<1x128xf32> to vector<16x128xf32>
    %30 = arith.addf %28, %29 : vector<16x128xf32>
    %c0_14 = arith.constant 0 : index
    %c0_15 = arith.constant 0 : index
    %c0_16 = arith.constant 0 : index
    %31 = vector.load %arg4[%c0_14, %c0_15, %c0_16] : memref<2x128x384xf32, #tpu.memory_space<vmem>>, vector<1x128x384xf32>
    %32 = vector.shape_cast %31 : vector<1x128x384xf32> to vector<128x384xf32>
    %cst_17 = arith.constant dense<0.000000e+00> : vector<16x384xf32>
    %33 = tpu.matmul %30, %32, %cst_17 {dimension_numbers = #tpu.dot_dimension_numbers<[1], [0], [0], [1], [0, 0, 1, 1], [], []>} : vector<16x128xf32>, vector<128x384xf32>, vector<16x384xf32> -> vector<16x384xf32>
    %c0_18 = arith.constant 0 : index
    %c0_19 = arith.constant 0 : index
    %c0_20 = arith.constant 0 : index
    %34 = vector.load %arg5[%c0_18, %c0_19, %c0_20] : memref<2x1x384xf32, #tpu.memory_space<vmem>>, vector<1x1x384xf32>
    %35 = vector.shape_cast %34 : vector<1x1x384xf32> to vector<1x384xf32>
    %36 = vector.broadcast %35 : vector<1x384xf32> to vector<16x384xf32>
    %37 = arith.addf %33, %36 : vector<16x384xf32>
    %38 = vector.extract_strided_slice %37 {offsets = [0, 0], sizes = [16, 128], strides = [1, 1]} : vector<16x384xf32> to vector<16x128xf32>
    %39 = vector.extract_strided_slice %38 {offsets = [0, 0], sizes = [16, 32], strides = [1, 1]} : vector<16x128xf32> to vector<16x32xf32>
    %40 = vector.extract_strided_slice %38 {offsets = [0, 32], sizes = [16, 32], strides = [1, 1]} : vector<16x128xf32> to vector<16x32xf32>
    %41 = vector.extract_strided_slice %38 {offsets = [0, 64], sizes = [16, 32], strides = [1, 1]} : vector<16x128xf32> to vector<16x32xf32>
    %42 = vector.extract_strided_slice %38 {offsets = [0, 96], sizes = [16, 32], strides = [1, 1]} : vector<16x128xf32> to vector<16x32xf32>
    %43 = vector.shape_cast %39 : vector<16x32xf32> to vector<1x16x32xf32>
    %44 = vector.shape_cast %40 : vector<16x32xf32> to vector<1x16x32xf32>
    %45 = vector.shape_cast %41 : vector<16x32xf32> to vector<1x16x32xf32>
    %46 = vector.shape_cast %42 : vector<16x32xf32> to vector<1x16x32xf32>
    %47 = tpu.concatenate %43, %44, %45, %46 in 0 : vector<1x16x32xf32>, vector<1x16x32xf32>, vector<1x16x32xf32>, vector<1x16x32xf32> -> vector<4x16x32xf32>
    %48 = vector.shape_cast %47 : vector<4x16x32xf32> to vector<8x8x32xf32>
    %49 = vector.extract_strided_slice %37 {offsets = [0, 128], sizes = [16, 128], strides = [1, 1]} : vector<16x384xf32> to vector<16x128xf32>
    %50 = vector.extract_strided_slice %49 {offsets = [0, 0], sizes = [16, 32], strides = [1, 1]} : vector<16x128xf32> to vector<16x32xf32>
    %51 = vector.extract_strided_slice %49 {offsets = [0, 32], sizes = [16, 32], strides = [1, 1]} : vector<16x128xf32> to vector<16x32xf32>
    %52 = vector.extract_strided_slice %49 {offsets = [0, 64], sizes = [16, 32], strides = [1, 1]} : vector<16x128xf32> to vector<16x32xf32>
    %53 = vector.extract_strided_slice %49 {offsets = [0, 96], sizes = [16, 32], strides = [1, 1]} : vector<16x128xf32> to vector<16x32xf32>
    %54 = vector.shape_cast %50 : vector<16x32xf32> to vector<1x16x32xf32>
    %55 = vector.shape_cast %51 : vector<16x32xf32> to vector<1x16x32xf32>
    %56 = vector.shape_cast %52 : vector<16x32xf32> to vector<1x16x32xf32>
    %57 = vector.shape_cast %53 : vector<16x32xf32> to vector<1x16x32xf32>
    %58 = tpu.concatenate %54, %55, %56, %57 in 0 : vector<1x16x32xf32>, vector<1x16x32xf32>, vector<1x16x32xf32>, vector<1x16x32xf32> -> vector<4x16x32xf32>
    %59 = vector.shape_cast %58 : vector<4x16x32xf32> to vector<8x8x32xf32>
    %60 = vector.extract_strided_slice %37 {offsets = [0, 256], sizes = [16, 128], strides = [1, 1]} : vector<16x384xf32> to vector<16x128xf32>
    %61 = vector.extract_strided_slice %60 {offsets = [0, 0], sizes = [16, 32], strides = [1, 1]} : vector<16x128xf32> to vector<16x32xf32>
    %62 = vector.extract_strided_slice %60 {offsets = [0, 32], sizes = [16, 32], strides = [1, 1]} : vector<16x128xf32> to vector<16x32xf32>
    %63 = vector.extract_strided_slice %60 {offsets = [0, 64], sizes = [16, 32], strides = [1, 1]} : vector<16x128xf32> to vector<16x32xf32>
    %64 = vector.extract_strided_slice %60 {offsets = [0, 96], sizes = [16, 32], strides = [1, 1]} : vector<16x128xf32> to vector<16x32xf32>
    %65 = vector.shape_cast %61 : vector<16x32xf32> to vector<1x16x32xf32>
    %66 = vector.shape_cast %62 : vector<16x32xf32> to vector<1x16x32xf32>
    %67 = vector.shape_cast %63 : vector<16x32xf32> to vector<1x16x32xf32>
    %68 = vector.shape_cast %64 : vector<16x32xf32> to vector<1x16x32xf32>
    %69 = tpu.concatenate %65, %66, %67, %68 in 0 : vector<1x16x32xf32>, vector<1x16x32xf32>, vector<1x16x32xf32>, vector<1x16x32xf32> -> vector<4x16x32xf32>
    %70 = vector.shape_cast %69 : vector<4x16x32xf32> to vector<8x8x32xf32>
    "tpu.trace_start"() <{level = 10 : i32, message = "hqd,hkd->hqk"}> : () -> ()
    %cst_21 = arith.constant dense<0.000000e+00> : vector<8x8x8xf32>
    %71 = tpu.matmul %48, %59, %cst_21 {dimension_numbers = #tpu.dot_dimension_numbers<[2], [2], [1], [1], [0, 0, 0, 1, 1, 1], [0], [0]>} : vector<8x8x32xf32>, vector<8x8x32xf32>, vector<8x8x8xf32> -> vector<8x8x8xf32>
    "tpu.trace_stop"() : () -> ()
    %cst_22 = arith.constant 0.176776692 : f32
    %72 = vector.broadcast %cst_22 : f32 to vector<8x8x8xf32>
    %73 = arith.mulf %71, %72 : vector<8x8x8xf32>
    %74 = arith.addf %73, %9 : vector<8x8x8xf32>
    %cst_23 = arith.constant dense<0xFF800000> : vector<8x8xf32>
    %75 = vector.multi_reduction <maximumf>, %74, %cst_23 [2] : vector<8x8x8xf32> to vector<8x8xf32>
    %76 = vector.shape_cast %75 : vector<8x8xf32> to vector<8x8x1xf32>
    %77 = vector.broadcast %76 : vector<8x8x1xf32> to vector<8x8x8xf32>
    %78 = arith.subf %74, %77 : vector<8x8x8xf32>
    %79 = math.exp %78 : vector<8x8x8xf32>
    %cst_24 = arith.constant dense<0.000000e+00> : vector<8x8xf32>
    %80 = vector.multi_reduction <add>, %79, %cst_24 [2] : vector<8x8x8xf32> to vector<8x8xf32>
    %81 = vector.shape_cast %80 : vector<8x8xf32> to vector<8x8x1xf32>
    %82 = vector.broadcast %81 : vector<8x8x1xf32> to vector<8x8x8xf32>
    %83 = arith.divf %79, %82 : vector<8x8x8xf32>
    "tpu.trace_start"() <{level = 10 : i32, message = "hqk,hkd->hqd"}> : () -> ()
    %cst_25 = arith.constant dense<0.000000e+00> : vector<8x8x32xf32>
    %84 = tpu.matmul %83, %70, %cst_25 {dimension_numbers = #tpu.dot_dimension_numbers<[2], [1], [1], [2], [0, 0, 0, 1, 1, 2], [0], [0]>} : vector<8x8x8xf32>, vector<8x8x32xf32>, vector<8x8x32xf32> -> vector<8x8x32xf32>
    "tpu.trace_stop"() : () -> ()
    %85 = vector.extract_strided_slice %84 {offsets = [0, 0, 0], sizes = [2, 8, 32], strides = [1, 1, 1]} : vector<8x8x32xf32> to vector<2x8x32xf32>
    %86 = vector.extract_strided_slice %84 {offsets = [2, 0, 0], sizes = [2, 8, 32], strides = [1, 1, 1]} : vector<8x8x32xf32> to vector<2x8x32xf32>
    %87 = vector.extract_strided_slice %84 {offsets = [4, 0, 0], sizes = [2, 8, 32], strides = [1, 1, 1]} : vector<8x8x32xf32> to vector<2x8x32xf32>
    %88 = vector.extract_strided_slice %84 {offsets = [6, 0, 0], sizes = [2, 8, 32], strides = [1, 1, 1]} : vector<8x8x32xf32> to vector<2x8x32xf32>
    %89 = tpu.concatenate %85, %86, %87, %88 in 2 : vector<2x8x32xf32>, vector<2x8x32xf32>, vector<2x8x32xf32>, vector<2x8x32xf32> -> vector<2x8x128xf32>
    %90 = vector.shape_cast %89 : vector<2x8x128xf32> to vector<16x128xf32>
    %c0_26 = arith.constant 0 : index
    %c0_27 = arith.constant 0 : index
    %c0_28 = arith.constant 0 : index
    %91 = vector.load %arg6[%c0_26, %c0_27, %c0_28] : memref<2x128x128xf32, #tpu.memory_space<vmem>>, vector<1x128x128xf32>
    %92 = vector.shape_cast %91 : vector<1x128x128xf32> to vector<128x128xf32>
    %cst_29 = arith.constant dense<0.000000e+00> : vector<16x128xf32>
    %93 = tpu.matmul %90, %92, %cst_29 {dimension_numbers = #tpu.dot_dimension_numbers<[1], [0], [0], [1], [0, 0, 1, 1], [], []>} : vector<16x128xf32>, vector<128x128xf32>, vector<16x128xf32> -> vector<16x128xf32>
    %c0_30 = arith.constant 0 : index
    %c0_31 = arith.constant 0 : index
    %c0_32 = arith.constant 0 : index
    %94 = vector.load %arg7[%c0_30, %c0_31, %c0_32] : memref<2x1x128xf32, #tpu.memory_space<vmem>>, vector<1x1x128xf32>
    %95 = vector.shape_cast %94 : vector<1x1x128xf32> to vector<1x128xf32>
    %96 = vector.broadcast %95 : vector<1x128xf32> to vector<16x128xf32>
    %97 = arith.addf %93, %96 : vector<16x128xf32>
    %98 = arith.addf %97, %30 : vector<16x128xf32>
    %c0_33 = arith.constant 0 : index
    %c0_34 = arith.constant 0 : index
    %c0_35 = arith.constant 0 : index
    %99 = vector.load %arg8[%c0_33, %c0_34, %c0_35] : memref<2x1x128xf32, #tpu.memory_space<vmem>>, vector<1x1x128xf32>
    %100 = vector.shape_cast %99 : vector<1x1x128xf32> to vector<1x128xf32>
    %c0_36 = arith.constant 0 : index
    %c0_37 = arith.constant 0 : index
    %c0_38 = arith.constant 0 : index
    %101 = vector.load %arg9[%c0_36, %c0_37, %c0_38] : memref<2x1x128xf32, #tpu.memory_space<vmem>>, vector<1x1x128xf32>
    %102 = vector.shape_cast %101 : vector<1x1x128xf32> to vector<1x128xf32>
    %cst_39 = arith.constant dense<0.000000e+00> : vector<16x1xf32>
    %103 = tpu.matmul %98, %0, %cst_39 {dimension_numbers = #tpu.dot_dimension_numbers<[1], [0], [0], [1], [0, 0, 1, 1], [], []>} : vector<16x128xf32>, vector<128x1xf32>, vector<16x1xf32> -> vector<16x1xf32>
    %cst_40 = arith.constant 7.812500e-03 : f32
    %104 = vector.broadcast %cst_40 : f32 to vector<16x1xf32>
    %105 = arith.mulf %103, %104 : vector<16x1xf32>
    %106 = vector.broadcast %105 : vector<16x1xf32> to vector<16x128xf32>
    %107 = arith.subf %98, %106 : vector<16x128xf32>
    %108 = arith.mulf %107, %107 : vector<16x128xf32>
    %cst_41 = arith.constant dense<0.000000e+00> : vector<16x1xf32>
    %109 = tpu.matmul %108, %0, %cst_41 {dimension_numbers = #tpu.dot_dimension_numbers<[1], [0], [0], [1], [0, 0, 1, 1], [], []>} : vector<16x128xf32>, vector<128x1xf32>, vector<16x1xf32> -> vector<16x1xf32>
    %cst_42 = arith.constant 7.812500e-03 : f32
    %110 = vector.broadcast %cst_42 : f32 to vector<16x1xf32>
    %111 = arith.mulf %109, %110 : vector<16x1xf32>
    %cst_43 = arith.constant 9.99999996E-13 : f32
    %112 = vector.broadcast %cst_43 : f32 to vector<16x1xf32>
    %113 = arith.addf %111, %112 : vector<16x1xf32>
    %114 = math.rsqrt %113 : vector<16x1xf32>
    %115 = vector.broadcast %114 : vector<16x1xf32> to vector<16x128xf32>
    %116 = arith.mulf %107, %115 : vector<16x128xf32>
    %117 = vector.broadcast %100 : vector<1x128xf32> to vector<16x128xf32>
    %118 = arith.mulf %117, %116 : vector<16x128xf32>
    %119 = vector.broadcast %102 : vector<1x128xf32> to vector<16x128xf32>
    %120 = arith.addf %118, %119 : vector<16x128xf32>
    %c0_44 = arith.constant 0 : index
    %c0_45 = arith.constant 0 : index
    %c0_46 = arith.constant 0 : index
    %121 = vector.load %arg10[%c0_44, %c0_45, %c0_46] : memref<2x128x256xf32, #tpu.memory_space<vmem>>, vector<1x128x256xf32>
    %122 = vector.shape_cast %121 : vector<1x128x256xf32> to vector<128x256xf32>
    %cst_47 = arith.constant dense<0.000000e+00> : vector<16x256xf32>
    %123 = tpu.matmul %120, %122, %cst_47 {dimension_numbers = #tpu.dot_dimension_numbers<[1], [0], [0], [1], [0, 0, 1, 1], [], []>} : vector<16x128xf32>, vector<128x256xf32>, vector<16x256xf32> -> vector<16x256xf32>
    %c0_48 = arith.constant 0 : index
    %c0_49 = arith.constant 0 : index
    %c0_50 = arith.constant 0 : index
    %124 = vector.load %arg11[%c0_48, %c0_49, %c0_50] : memref<2x1x256xf32, #tpu.memory_space<vmem>>, vector<1x1x256xf32>
    %125 = vector.shape_cast %124 : vector<1x1x256xf32> to vector<1x256xf32>
    %126 = vector.broadcast %125 : vector<1x256xf32> to vector<16x256xf32>
    %127 = arith.addf %123, %126 : vector<16x256xf32>
    %cst_51 = arith.constant 5.000000e-01 : f32
    %128 = vector.broadcast %cst_51 : f32 to vector<16x256xf32>
    %129 = arith.mulf %127, %128 : vector<16x256xf32>
    %cst_52 = arith.constant 0.707106769 : f32
    %130 = vector.broadcast %cst_52 : f32 to vector<16x256xf32>
    %131 = arith.mulf %127, %130 : vector<16x256xf32>
    %cst_53 = arith.constant 0.000000e+00 : f32
    %132 = vector.broadcast %cst_53 : f32 to vector<16x256xf32>
    %133 = arith.cmpf oge, %131, %132 : vector<16x256xf32>
    %cst_54 = arith.constant 1.000000e+00 : f32
    %cst_55 = arith.constant -1.000000e+00 : f32
    %134 = vector.broadcast %cst_54 : f32 to vector<16x256xf32>
    %135 = vector.broadcast %cst_55 : f32 to vector<16x256xf32>
    %136 = arith.select %133, %134, %135 : vector<16x256xi1>, vector<16x256xf32>
    %137 = math.absf %131 : vector<16x256xf32>
    %cst_56 = arith.constant 0.327591091 : f32
    %138 = vector.broadcast %cst_56 : f32 to vector<16x256xf32>
    %139 = arith.mulf %138, %137 : vector<16x256xf32>
    %cst_57 = arith.constant 1.000000e+00 : f32
    %140 = vector.broadcast %cst_57 : f32 to vector<16x256xf32>
    %141 = arith.addf %140, %139 : vector<16x256xf32>
    %cst_58 = arith.constant 1.000000e+00 : f32
    %142 = vector.broadcast %cst_58 : f32 to vector<16x256xf32>
    %143 = arith.divf %142, %141 : vector<16x256xf32>
    %cst_59 = arith.constant 1.06140542 : f32
    %144 = vector.broadcast %cst_59 : f32 to vector<16x256xf32>
    %145 = arith.mulf %144, %143 : vector<16x256xf32>
    %cst_60 = arith.constant -1.45315206 : f32
    %146 = vector.broadcast %cst_60 : f32 to vector<16x256xf32>
    %147 = arith.addf %145, %146 : vector<16x256xf32>
    %148 = arith.mulf %147, %143 : vector<16x256xf32>
    %cst_61 = arith.constant 1.42141378 : f32
    %149 = vector.broadcast %cst_61 : f32 to vector<16x256xf32>
    %150 = arith.addf %148, %149 : vector<16x256xf32>
    %151 = arith.mulf %150, %143 : vector<16x256xf32>
    %cst_62 = arith.constant -0.284496725 : f32
    %152 = vector.broadcast %cst_62 : f32 to vector<16x256xf32>
    %153 = arith.addf %151, %152 : vector<16x256xf32>
    %154 = arith.mulf %153, %143 : vector<16x256xf32>
    %cst_63 = arith.constant 0.254829586 : f32
    %155 = vector.broadcast %cst_63 : f32 to vector<16x256xf32>
    %156 = arith.addf %154, %155 : vector<16x256xf32>
    %157 = arith.mulf %156, %143 : vector<16x256xf32>
    %cst_64 = arith.constant 0.000000e+00 : f32
    %158 = vector.broadcast %cst_64 : f32 to vector<16x256xf32>
    %159 = arith.subf %158, %137 : vector<16x256xf32>
    %160 = arith.mulf %159, %137 : vector<16x256xf32>
    %161 = math.exp %160 : vector<16x256xf32>
    %162 = arith.mulf %157, %161 : vector<16x256xf32>
    %cst_65 = arith.constant 1.000000e+00 : f32
    %163 = vector.broadcast %cst_65 : f32 to vector<16x256xf32>
    %164 = arith.subf %163, %162 : vector<16x256xf32>
    %165 = arith.mulf %136, %164 : vector<16x256xf32>
    %cst_66 = arith.constant 1.000000e+00 : f32
    %166 = vector.broadcast %cst_66 : f32 to vector<16x256xf32>
    %167 = arith.addf %166, %165 : vector<16x256xf32>
    %168 = arith.mulf %129, %167 : vector<16x256xf32>
    %c0_67 = arith.constant 0 : index
    %c0_68 = arith.constant 0 : index
    %c0_69 = arith.constant 0 : index
    %169 = vector.load %arg12[%c0_67, %c0_68, %c0_69] : memref<2x256x128xf32, #tpu.memory_space<vmem>>, vector<1x256x128xf32>
    %170 = vector.shape_cast %169 : vector<1x256x128xf32> to vector<256x128xf32>
    %cst_70 = arith.constant dense<0.000000e+00> : vector<16x128xf32>
    %171 = tpu.matmul %168, %170, %cst_70 {dimension_numbers = #tpu.dot_dimension_numbers<[1], [0], [0], [1], [0, 0, 1, 1], [], []>} : vector<16x256xf32>, vector<256x128xf32>, vector<16x128xf32> -> vector<16x128xf32>
    %c0_71 = arith.constant 0 : index
    %c0_72 = arith.constant 0 : index
    %c0_73 = arith.constant 0 : index
    %172 = vector.load %arg13[%c0_71, %c0_72, %c0_73] : memref<2x1x128xf32, #tpu.memory_space<vmem>>, vector<1x1x128xf32>
    %173 = vector.shape_cast %172 : vector<1x1x128xf32> to vector<1x128xf32>
    %174 = vector.broadcast %173 : vector<1x128xf32> to vector<16x128xf32>
    %175 = arith.addf %171, %174 : vector<16x128xf32>
    %176 = arith.addf %175, %120 : vector<16x128xf32>
    %c0_74 = arith.constant 0 : index
    %c0_75 = arith.constant 0 : index
    %c0_76 = arith.constant 0 : index
    %177 = vector.load %arg14[%c0_74, %c0_75, %c0_76] : memref<2x1x128xf32, #tpu.memory_space<vmem>>, vector<1x1x128xf32>
    %178 = vector.shape_cast %177 : vector<1x1x128xf32> to vector<1x128xf32>
    %c0_77 = arith.constant 0 : index
    %c0_78 = arith.constant 0 : index
    %c0_79 = arith.constant 0 : index
    %179 = vector.load %arg15[%c0_77, %c0_78, %c0_79] : memref<2x1x128xf32, #tpu.memory_space<vmem>>, vector<1x1x128xf32>
    %180 = vector.shape_cast %179 : vector<1x1x128xf32> to vector<1x128xf32>
    %cst_80 = arith.constant dense<0.000000e+00> : vector<16x1xf32>
    %181 = tpu.matmul %176, %0, %cst_80 {dimension_numbers = #tpu.dot_dimension_numbers<[1], [0], [0], [1], [0, 0, 1, 1], [], []>} : vector<16x128xf32>, vector<128x1xf32>, vector<16x1xf32> -> vector<16x1xf32>
    %cst_81 = arith.constant 7.812500e-03 : f32
    %182 = vector.broadcast %cst_81 : f32 to vector<16x1xf32>
    %183 = arith.mulf %181, %182 : vector<16x1xf32>
    %184 = vector.broadcast %183 : vector<16x1xf32> to vector<16x128xf32>
    %185 = arith.subf %176, %184 : vector<16x128xf32>
    %186 = arith.mulf %185, %185 : vector<16x128xf32>
    %cst_82 = arith.constant dense<0.000000e+00> : vector<16x1xf32>
    %187 = tpu.matmul %186, %0, %cst_82 {dimension_numbers = #tpu.dot_dimension_numbers<[1], [0], [0], [1], [0, 0, 1, 1], [], []>} : vector<16x128xf32>, vector<128x1xf32>, vector<16x1xf32> -> vector<16x1xf32>
    %cst_83 = arith.constant 7.812500e-03 : f32
    %188 = vector.broadcast %cst_83 : f32 to vector<16x1xf32>
    %189 = arith.mulf %187, %188 : vector<16x1xf32>
    %cst_84 = arith.constant 9.99999996E-13 : f32
    %190 = vector.broadcast %cst_84 : f32 to vector<16x1xf32>
    %191 = arith.addf %189, %190 : vector<16x1xf32>
    %192 = math.rsqrt %191 : vector<16x1xf32>
    %193 = vector.broadcast %192 : vector<16x1xf32> to vector<16x128xf32>
    %194 = arith.mulf %185, %193 : vector<16x128xf32>
    %195 = vector.broadcast %178 : vector<1x128xf32> to vector<16x128xf32>
    %196 = arith.mulf %195, %194 : vector<16x128xf32>
    %197 = vector.broadcast %180 : vector<1x128xf32> to vector<16x128xf32>
    %198 = arith.addf %196, %197 : vector<16x128xf32>
    %c0_85 = arith.constant 0 : index
    %c0_86 = arith.constant 0 : index
    %c0_87 = arith.constant 0 : index
    %199 = vector.load %arg18[%c0_85, %c0_86, %c0_87] : memref<2x16x128xf32, #tpu.memory_space<vmem>>, vector<1x16x128xf32>
    %200 = vector.shape_cast %199 : vector<1x16x128xf32> to vector<16x128xf32>
    %201 = vector.shape_cast %198 : vector<16x128xf32> to vector<1x16x128xf32>
    tpu.vector_store %arg18[%c0_85, %c0_86, %c0_87], %201 {strides = array<i32>} : memref<2x16x128xf32, #tpu.memory_space<vmem>>, vector<1x16x128xf32>,
    %c1 = arith.constant 1 : index
    %c0_88 = arith.constant 0 : index
    %c0_89 = arith.constant 0 : index
    %202 = vector.load %arg4[%c1, %c0_88, %c0_89] : memref<2x128x384xf32, #tpu.memory_space<vmem>>, vector<1x128x384xf32>
    %203 = vector.shape_cast %202 : vector<1x128x384xf32> to vector<128x384xf32>
    %cst_90 = arith.constant dense<0.000000e+00> : vector<16x384xf32>
    %204 = tpu.matmul %198, %203, %cst_90 {dimension_numbers = #tpu.dot_dimension_numbers<[1], [0], [0], [1], [0, 0, 1, 1], [], []>} : vector<16x128xf32>, vector<128x384xf32>, vector<16x384xf32> -> vector<16x384xf32>
    %c1_91 = arith.constant 1 : index
    %c0_92 = arith.constant 0 : index
    %c0_93 = arith.constant 0 : index
    %205 = vector.load %arg5[%c1_91, %c0_92, %c0_93] : memref<2x1x384xf32, #tpu.memory_space<vmem>>, vector<1x1x384xf32>
    %206 = vector.shape_cast %205 : vector<1x1x384xf32> to vector<1x384xf32>
    %207 = vector.broadcast %206 : vector<1x384xf32> to vector<16x384xf32>
    %208 = arith.addf %204, %207 : vector<16x384xf32>
    %209 = vector.extract_strided_slice %208 {offsets = [0, 0], sizes = [16, 128], strides = [1, 1]} : vector<16x384xf32> to vector<16x128xf32>
    %210 = vector.extract_strided_slice %209 {offsets = [0, 0], sizes = [16, 32], strides = [1, 1]} : vector<16x128xf32> to vector<16x32xf32>
    %211 = vector.extract_strided_slice %209 {offsets = [0, 32], sizes = [16, 32], strides = [1, 1]} : vector<16x128xf32> to vector<16x32xf32>
    %212 = vector.extract_strided_slice %209 {offsets = [0, 64], sizes = [16, 32], strides = [1, 1]} : vector<16x128xf32> to vector<16x32xf32>
    %213 = vector.extract_strided_slice %209 {offsets = [0, 96], sizes = [16, 32], strides = [1, 1]} : vector<16x128xf32> to vector<16x32xf32>
    %214 = vector.shape_cast %210 : vector<16x32xf32> to vector<1x16x32xf32>
    %215 = vector.shape_cast %211 : vector<16x32xf32> to vector<1x16x32xf32>
    %216 = vector.shape_cast %212 : vector<16x32xf32> to vector<1x16x32xf32>
    %217 = vector.shape_cast %213 : vector<16x32xf32> to vector<1x16x32xf32>
    %218 = tpu.concatenate %214, %215, %216, %217 in 0 : vector<1x16x32xf32>, vector<1x16x32xf32>, vector<1x16x32xf32>, vector<1x16x32xf32> -> vector<4x16x32xf32>
    %219 = vector.shape_cast %218 : vector<4x16x32xf32> to vector<8x8x32xf32>
    %220 = vector.extract_strided_slice %208 {offsets = [0, 128], sizes = [16, 128], strides = [1, 1]} : vector<16x384xf32> to vector<16x128xf32>
    %221 = vector.extract_strided_slice %220 {offsets = [0, 0], sizes = [16, 32], strides = [1, 1]} : vector<16x128xf32> to vector<16x32xf32>
    %222 = vector.extract_strided_slice %220 {offsets = [0, 32], sizes = [16, 32], strides = [1, 1]} : vector<16x128xf32> to vector<16x32xf32>
    %223 = vector.extract_strided_slice %220 {offsets = [0, 64], sizes = [16, 32], strides = [1, 1]} : vector<16x128xf32> to vector<16x32xf32>
    %224 = vector.extract_strided_slice %220 {offsets = [0, 96], sizes = [16, 32], strides = [1, 1]} : vector<16x128xf32> to vector<16x32xf32>
    %225 = vector.shape_cast %221 : vector<16x32xf32> to vector<1x16x32xf32>
    %226 = vector.shape_cast %222 : vector<16x32xf32> to vector<1x16x32xf32>
    %227 = vector.shape_cast %223 : vector<16x32xf32> to vector<1x16x32xf32>
    %228 = vector.shape_cast %224 : vector<16x32xf32> to vector<1x16x32xf32>
    %229 = tpu.concatenate %225, %226, %227, %228 in 0 : vector<1x16x32xf32>, vector<1x16x32xf32>, vector<1x16x32xf32>, vector<1x16x32xf32> -> vector<4x16x32xf32>
    %230 = vector.shape_cast %229 : vector<4x16x32xf32> to vector<8x8x32xf32>
    %231 = vector.extract_strided_slice %208 {offsets = [0, 256], sizes = [16, 128], strides = [1, 1]} : vector<16x384xf32> to vector<16x128xf32>
    %232 = vector.extract_strided_slice %231 {offsets = [0, 0], sizes = [16, 32], strides = [1, 1]} : vector<16x128xf32> to vector<16x32xf32>
    %233 = vector.extract_strided_slice %231 {offsets = [0, 32], sizes = [16, 32], strides = [1, 1]} : vector<16x128xf32> to vector<16x32xf32>
    %234 = vector.extract_strided_slice %231 {offsets = [0, 64], sizes = [16, 32], strides = [1, 1]} : vector<16x128xf32> to vector<16x32xf32>
    %235 = vector.extract_strided_slice %231 {offsets = [0, 96], sizes = [16, 32], strides = [1, 1]} : vector<16x128xf32> to vector<16x32xf32>
    %236 = vector.shape_cast %232 : vector<16x32xf32> to vector<1x16x32xf32>
    %237 = vector.shape_cast %233 : vector<16x32xf32> to vector<1x16x32xf32>
    %238 = vector.shape_cast %234 : vector<16x32xf32> to vector<1x16x32xf32>
    %239 = vector.shape_cast %235 : vector<16x32xf32> to vector<1x16x32xf32>
    %240 = tpu.concatenate %236, %237, %238, %239 in 0 : vector<1x16x32xf32>, vector<1x16x32xf32>, vector<1x16x32xf32>, vector<1x16x32xf32> -> vector<4x16x32xf32>
    %241 = vector.shape_cast %240 : vector<4x16x32xf32> to vector<8x8x32xf32>
    "tpu.trace_start"() <{level = 10 : i32, message = "hqd,hkd->hqk"}> : () -> ()
    %cst_94 = arith.constant dense<0.000000e+00> : vector<8x8x8xf32>
    %242 = tpu.matmul %219, %230, %cst_94 {dimension_numbers = #tpu.dot_dimension_numbers<[2], [2], [1], [1], [0, 0, 0, 1, 1, 1], [0], [0]>} : vector<8x8x32xf32>, vector<8x8x32xf32>, vector<8x8x8xf32> -> vector<8x8x8xf32>
    "tpu.trace_stop"() : () -> ()
    %cst_95 = arith.constant 0.176776692 : f32
    %243 = vector.broadcast %cst_95 : f32 to vector<8x8x8xf32>
    %244 = arith.mulf %242, %243 : vector<8x8x8xf32>
    %245 = arith.addf %244, %9 : vector<8x8x8xf32>
    %cst_96 = arith.constant dense<0xFF800000> : vector<8x8xf32>
    %246 = vector.multi_reduction <maximumf>, %245, %cst_96 [2] : vector<8x8x8xf32> to vector<8x8xf32>
    %247 = vector.shape_cast %246 : vector<8x8xf32> to vector<8x8x1xf32>
    %248 = vector.broadcast %247 : vector<8x8x1xf32> to vector<8x8x8xf32>
    %249 = arith.subf %245, %248 : vector<8x8x8xf32>
    %250 = math.exp %249 : vector<8x8x8xf32>
    %cst_97 = arith.constant dense<0.000000e+00> : vector<8x8xf32>
    %251 = vector.multi_reduction <add>, %250, %cst_97 [2] : vector<8x8x8xf32> to vector<8x8xf32>
    %252 = vector.shape_cast %251 : vector<8x8xf32> to vector<8x8x1xf32>
    %253 = vector.broadcast %252 : vector<8x8x1xf32> to vector<8x8x8xf32>
    %254 = arith.divf %250, %253 : vector<8x8x8xf32>
    "tpu.trace_start"() <{level = 10 : i32, message = "hqk,hkd->hqd"}> : () -> ()
    %cst_98 = arith.constant dense<0.000000e+00> : vector<8x8x32xf32>
    %255 = tpu.matmul %254, %241, %cst_98 {dimension_numbers = #tpu.dot_dimension_numbers<[2], [1], [1], [2], [0, 0, 0, 1, 1, 2], [0], [0]>} : vector<8x8x8xf32>, vector<8x8x32xf32>, vector<8x8x32xf32> -> vector<8x8x32xf32>
    "tpu.trace_stop"() : () -> ()
    %256 = vector.extract_strided_slice %255 {offsets = [0, 0, 0], sizes = [2, 8, 32], strides = [1, 1, 1]} : vector<8x8x32xf32> to vector<2x8x32xf32>
    %257 = vector.extract_strided_slice %255 {offsets = [2, 0, 0], sizes = [2, 8, 32], strides = [1, 1, 1]} : vector<8x8x32xf32> to vector<2x8x32xf32>
    %258 = vector.extract_strided_slice %255 {offsets = [4, 0, 0], sizes = [2, 8, 32], strides = [1, 1, 1]} : vector<8x8x32xf32> to vector<2x8x32xf32>
    %259 = vector.extract_strided_slice %255 {offsets = [6, 0, 0], sizes = [2, 8, 32], strides = [1, 1, 1]} : vector<8x8x32xf32> to vector<2x8x32xf32>
    %260 = tpu.concatenate %256, %257, %258, %259 in 2 : vector<2x8x32xf32>, vector<2x8x32xf32>, vector<2x8x32xf32>, vector<2x8x32xf32> -> vector<2x8x128xf32>
    %261 = vector.shape_cast %260 : vector<2x8x128xf32> to vector<16x128xf32>
    %c1_99 = arith.constant 1 : index
    %c0_100 = arith.constant 0 : index
    %c0_101 = arith.constant 0 : index
    %262 = vector.load %arg6[%c1_99, %c0_100, %c0_101] : memref<2x128x128xf32, #tpu.memory_space<vmem>>, vector<1x128x128xf32>
    %263 = vector.shape_cast %262 : vector<1x128x128xf32> to vector<128x128xf32>
    %cst_102 = arith.constant dense<0.000000e+00> : vector<16x128xf32>
    %264 = tpu.matmul %261, %263, %cst_102 {dimension_numbers = #tpu.dot_dimension_numbers<[1], [0], [0], [1], [0, 0, 1, 1], [], []>} : vector<16x128xf32>, vector<128x128xf32>, vector<16x128xf32> -> vector<16x128xf32>
    %c1_103 = arith.constant 1 : index
    %c0_104 = arith.constant 0 : index
    %c0_105 = arith.constant 0 : index
    %265 = vector.load %arg7[%c1_103, %c0_104, %c0_105] : memref<2x1x128xf32, #tpu.memory_space<vmem>>, vector<1x1x128xf32>
    %266 = vector.shape_cast %265 : vector<1x1x128xf32> to vector<1x128xf32>
    %267 = vector.broadcast %266 : vector<1x128xf32> to vector<16x128xf32>
    %268 = arith.addf %264, %267 : vector<16x128xf32>
    %269 = arith.addf %268, %198 : vector<16x128xf32>
    %c1_106 = arith.constant 1 : index
    %c0_107 = arith.constant 0 : index
    %c0_108 = arith.constant 0 : index
    %270 = vector.load %arg8[%c1_106, %c0_107, %c0_108] : memref<2x1x128xf32, #tpu.memory_space<vmem>>, vector<1x1x128xf32>
    %271 = vector.shape_cast %270 : vector<1x1x128xf32> to vector<1x128xf32>
    %c1_109 = arith.constant 1 : index
    %c0_110 = arith.constant 0 : index
    %c0_111 = arith.constant 0 : index
    %272 = vector.load %arg9[%c1_109, %c0_110, %c0_111] : memref<2x1x128xf32, #tpu.memory_space<vmem>>, vector<1x1x128xf32>
    %273 = vector.shape_cast %272 : vector<1x1x128xf32> to vector<1x128xf32>
    %cst_112 = arith.constant dense<0.000000e+00> : vector<16x1xf32>
    %274 = tpu.matmul %269, %0, %cst_112 {dimension_numbers = #tpu.dot_dimension_numbers<[1], [0], [0], [1], [0, 0, 1, 1], [], []>} : vector<16x128xf32>, vector<128x1xf32>, vector<16x1xf32> -> vector<16x1xf32>
    %cst_113 = arith.constant 7.812500e-03 : f32
    %275 = vector.broadcast %cst_113 : f32 to vector<16x1xf32>
    %276 = arith.mulf %274, %275 : vector<16x1xf32>
    %277 = vector.broadcast %276 : vector<16x1xf32> to vector<16x128xf32>
    %278 = arith.subf %269, %277 : vector<16x128xf32>
    %279 = arith.mulf %278, %278 : vector<16x128xf32>
    %cst_114 = arith.constant dense<0.000000e+00> : vector<16x1xf32>
    %280 = tpu.matmul %279, %0, %cst_114 {dimension_numbers = #tpu.dot_dimension_numbers<[1], [0], [0], [1], [0, 0, 1, 1], [], []>} : vector<16x128xf32>, vector<128x1xf32>, vector<16x1xf32> -> vector<16x1xf32>
    %cst_115 = arith.constant 7.812500e-03 : f32
    %281 = vector.broadcast %cst_115 : f32 to vector<16x1xf32>
    %282 = arith.mulf %280, %281 : vector<16x1xf32>
    %cst_116 = arith.constant 9.99999996E-13 : f32
    %283 = vector.broadcast %cst_116 : f32 to vector<16x1xf32>
    %284 = arith.addf %282, %283 : vector<16x1xf32>
    %285 = math.rsqrt %284 : vector<16x1xf32>
    %286 = vector.broadcast %285 : vector<16x1xf32> to vector<16x128xf32>
    %287 = arith.mulf %278, %286 : vector<16x128xf32>
    %288 = vector.broadcast %271 : vector<1x128xf32> to vector<16x128xf32>
    %289 = arith.mulf %288, %287 : vector<16x128xf32>
    %290 = vector.broadcast %273 : vector<1x128xf32> to vector<16x128xf32>
    %291 = arith.addf %289, %290 : vector<16x128xf32>
    %c1_117 = arith.constant 1 : index
    %c0_118 = arith.constant 0 : index
    %c0_119 = arith.constant 0 : index
    %292 = vector.load %arg10[%c1_117, %c0_118, %c0_119] : memref<2x128x256xf32, #tpu.memory_space<vmem>>, vector<1x128x256xf32>
    %293 = vector.shape_cast %292 : vector<1x128x256xf32> to vector<128x256xf32>
    %cst_120 = arith.constant dense<0.000000e+00> : vector<16x256xf32>
    %294 = tpu.matmul %291, %293, %cst_120 {dimension_numbers = #tpu.dot_dimension_numbers<[1], [0], [0], [1], [0, 0, 1, 1], [], []>} : vector<16x128xf32>, vector<128x256xf32>, vector<16x256xf32> -> vector<16x256xf32>
    %c1_121 = arith.constant 1 : index
    %c0_122 = arith.constant 0 : index
    %c0_123 = arith.constant 0 : index
    %295 = vector.load %arg11[%c1_121, %c0_122, %c0_123] : memref<2x1x256xf32, #tpu.memory_space<vmem>>, vector<1x1x256xf32>
    %296 = vector.shape_cast %295 : vector<1x1x256xf32> to vector<1x256xf32>
    %297 = vector.broadcast %296 : vector<1x256xf32> to vector<16x256xf32>
    %298 = arith.addf %294, %297 : vector<16x256xf32>
    %cst_124 = arith.constant 5.000000e-01 : f32
    %299 = vector.broadcast %cst_124 : f32 to vector<16x256xf32>
    %300 = arith.mulf %298, %299 : vector<16x256xf32>
    %cst_125 = arith.constant 0.707106769 : f32
    %301 = vector.broadcast %cst_125 : f32 to vector<16x256xf32>
    %302 = arith.mulf %298, %301 : vector<16x256xf32>
    %cst_126 = arith.constant 0.000000e+00 : f32
    %303 = vector.broadcast %cst_126 : f32 to vector<16x256xf32>
    %304 = arith.cmpf oge, %302, %303 : vector<16x256xf32>
    %cst_127 = arith.constant 1.000000e+00 : f32
    %cst_128 = arith.constant -1.000000e+00 : f32
    %305 = vector.broadcast %cst_127 : f32 to vector<16x256xf32>
    %306 = vector.broadcast %cst_128 : f32 to vector<16x256xf32>
    %307 = arith.select %304, %305, %306 : vector<16x256xi1>, vector<16x256xf32>
    %308 = math.absf %302 : vector<16x256xf32>
    %cst_129 = arith.constant 0.327591091 : f32
    %309 = vector.broadcast %cst_129 : f32 to vector<16x256xf32>
    %310 = arith.mulf %309, %308 : vector<16x256xf32>
    %cst_130 = arith.constant 1.000000e+00 : f32
    %311 = vector.broadcast %cst_130 : f32 to vector<16x256xf32>
    %312 = arith.addf %311, %310 : vector<16x256xf32>
    %cst_131 = arith.constant 1.000000e+00 : f32
    %313 = vector.broadcast %cst_131 : f32 to vector<16x256xf32>
    %314 = arith.divf %313, %312 : vector<16x256xf32>
    %cst_132 = arith.constant 1.06140542 : f32
    %315 = vector.broadcast %cst_132 : f32 to vector<16x256xf32>
    %316 = arith.mulf %315, %314 : vector<16x256xf32>
    %cst_133 = arith.constant -1.45315206 : f32
    %317 = vector.broadcast %cst_133 : f32 to vector<16x256xf32>
    %318 = arith.addf %316, %317 : vector<16x256xf32>
    %319 = arith.mulf %318, %314 : vector<16x256xf32>
    %cst_134 = arith.constant 1.42141378 : f32
    %320 = vector.broadcast %cst_134 : f32 to vector<16x256xf32>
    %321 = arith.addf %319, %320 : vector<16x256xf32>
    %322 = arith.mulf %321, %314 : vector<16x256xf32>
    %cst_135 = arith.constant -0.284496725 : f32
    %323 = vector.broadcast %cst_135 : f32 to vector<16x256xf32>
    %324 = arith.addf %322, %323 : vector<16x256xf32>
    %325 = arith.mulf %324, %314 : vector<16x256xf32>
    %cst_136 = arith.constant 0.254829586 : f32
    %326 = vector.broadcast %cst_136 : f32 to vector<16x256xf32>
    %327 = arith.addf %325, %326 : vector<16x256xf32>
    %328 = arith.mulf %327, %314 : vector<16x256xf32>
    %cst_137 = arith.constant 0.000000e+00 : f32
    %329 = vector.broadcast %cst_137 : f32 to vector<16x256xf32>
    %330 = arith.subf %329, %308 : vector<16x256xf32>
    %331 = arith.mulf %330, %308 : vector<16x256xf32>
    %332 = math.exp %331 : vector<16x256xf32>
    %333 = arith.mulf %328, %332 : vector<16x256xf32>
    %cst_138 = arith.constant 1.000000e+00 : f32
    %334 = vector.broadcast %cst_138 : f32 to vector<16x256xf32>
    %335 = arith.subf %334, %333 : vector<16x256xf32>
    %336 = arith.mulf %307, %335 : vector<16x256xf32>
    %cst_139 = arith.constant 1.000000e+00 : f32
    %337 = vector.broadcast %cst_139 : f32 to vector<16x256xf32>
    %338 = arith.addf %337, %336 : vector<16x256xf32>
    %339 = arith.mulf %300, %338 : vector<16x256xf32>
    %c1_140 = arith.constant 1 : index
    %c0_141 = arith.constant 0 : index
    %c0_142 = arith.constant 0 : index
    %340 = vector.load %arg12[%c1_140, %c0_141, %c0_142] : memref<2x256x128xf32, #tpu.memory_space<vmem>>, vector<1x256x128xf32>
    %341 = vector.shape_cast %340 : vector<1x256x128xf32> to vector<256x128xf32>
    %cst_143 = arith.constant dense<0.000000e+00> : vector<16x128xf32>
    %342 = tpu.matmul %339, %341, %cst_143 {dimension_numbers = #tpu.dot_dimension_numbers<[1], [0], [0], [1], [0, 0, 1, 1], [], []>} : vector<16x256xf32>, vector<256x128xf32>, vector<16x128xf32> -> vector<16x128xf32>
    %c1_144 = arith.constant 1 : index
    %c0_145 = arith.constant 0 : index
    %c0_146 = arith.constant 0 : index
    %343 = vector.load %arg13[%c1_144, %c0_145, %c0_146] : memref<2x1x128xf32, #tpu.memory_space<vmem>>, vector<1x1x128xf32>
    %344 = vector.shape_cast %343 : vector<1x1x128xf32> to vector<1x128xf32>
    %345 = vector.broadcast %344 : vector<1x128xf32> to vector<16x128xf32>
    %346 = arith.addf %342, %345 : vector<16x128xf32>
    %347 = arith.addf %346, %291 : vector<16x128xf32>
    %c1_147 = arith.constant 1 : index
    %c0_148 = arith.constant 0 : index
    %c0_149 = arith.constant 0 : index
    %348 = vector.load %arg14[%c1_147, %c0_148, %c0_149] : memref<2x1x128xf32, #tpu.memory_space<vmem>>, vector<1x1x128xf32>
    %349 = vector.shape_cast %348 : vector<1x1x128xf32> to vector<1x128xf32>
    %c1_150 = arith.constant 1 : index
    %c0_151 = arith.constant 0 : index
    %c0_152 = arith.constant 0 : index
    %350 = vector.load %arg15[%c1_150, %c0_151, %c0_152] : memref<2x1x128xf32, #tpu.memory_space<vmem>>, vector<1x1x128xf32>
    %351 = vector.shape_cast %350 : vector<1x1x128xf32> to vector<1x128xf32>
    %cst_153 = arith.constant dense<0.000000e+00> : vector<16x1xf32>
    %352 = tpu.matmul %347, %0, %cst_153 {dimension_numbers = #tpu.dot_dimension_numbers<[1], [0], [0], [1], [0, 0, 1, 1], [], []>} : vector<16x128xf32>, vector<128x1xf32>, vector<16x1xf32> -> vector<16x1xf32>
    %cst_154 = arith.constant 7.812500e-03 : f32
    %353 = vector.broadcast %cst_154 : f32 to vector<16x1xf32>
    %354 = arith.mulf %352, %353 : vector<16x1xf32>
    %355 = vector.broadcast %354 : vector<16x1xf32> to vector<16x128xf32>
    %356 = arith.subf %347, %355 : vector<16x128xf32>
    %357 = arith.mulf %356, %356 : vector<16x128xf32>
    %cst_155 = arith.constant dense<0.000000e+00> : vector<16x1xf32>
    %358 = tpu.matmul %357, %0, %cst_155 {dimension_numbers = #tpu.dot_dimension_numbers<[1], [0], [0], [1], [0, 0, 1, 1], [], []>} : vector<16x128xf32>, vector<128x1xf32>, vector<16x1xf32> -> vector<16x1xf32>
    %cst_156 = arith.constant 7.812500e-03 : f32
    %359 = vector.broadcast %cst_156 : f32 to vector<16x1xf32>
    %360 = arith.mulf %358, %359 : vector<16x1xf32>
    %cst_157 = arith.constant 9.99999996E-13 : f32
    %361 = vector.broadcast %cst_157 : f32 to vector<16x1xf32>
    %362 = arith.addf %360, %361 : vector<16x1xf32>
    %363 = math.rsqrt %362 : vector<16x1xf32>
    %364 = vector.broadcast %363 : vector<16x1xf32> to vector<16x128xf32>
    %365 = arith.mulf %356, %364 : vector<16x128xf32>
    %366 = vector.broadcast %349 : vector<1x128xf32> to vector<16x128xf32>
    %367 = arith.mulf %366, %365 : vector<16x128xf32>
    %368 = vector.broadcast %351 : vector<1x128xf32> to vector<16x128xf32>
    %369 = arith.addf %367, %368 : vector<16x128xf32>
    %c1_158 = arith.constant 1 : index
    %c0_159 = arith.constant 0 : index
    %c0_160 = arith.constant 0 : index
    %370 = vector.load %arg18[%c1_158, %c0_159, %c0_160] : memref<2x16x128xf32, #tpu.memory_space<vmem>>, vector<1x16x128xf32>
    %371 = vector.shape_cast %370 : vector<1x16x128xf32> to vector<16x128xf32>
    %372 = vector.shape_cast %369 : vector<16x128xf32> to vector<1x16x128xf32>
    tpu.vector_store %arg18[%c1_158, %c0_159, %c0_160], %372 {strides = array<i32>} : memref<2x16x128xf32, #tpu.memory_space<vmem>>, vector<1x16x128xf32>,
    %373 = vector.shape_cast %369 : vector<16x128xf32> to vector<2x8x128xf32>
    %374 = vector.extract_strided_slice %373 {offsets = [0, 0, 0], sizes = [2, 1, 128], strides = [1, 1, 1]} : vector<2x8x128xf32> to vector<2x1x128xf32>
    %375 = vector.shape_cast %374 : vector<2x1x128xf32> to vector<2x128xf32>
    %c0_161 = arith.constant 0 : index
    %c0_162 = arith.constant 0 : index
    %376 = vector.load %arg16[%c0_161, %c0_162] : memref<128x128xf32, #tpu.memory_space<vmem>>, vector<128x128xf32>
    %cst_163 = arith.constant dense<0.000000e+00> : vector<2x128xf32>
    %377 = tpu.matmul %375, %376, %cst_163 {dimension_numbers = #tpu.dot_dimension_numbers<[1], [0], [0], [1], [0, 0, 1, 1], [], []>} : vector<2x128xf32>, vector<128x128xf32>, vector<2x128xf32> -> vector<2x128xf32>
    %c0_164 = arith.constant 0 : index
    %c0_165 = arith.constant 0 : index
    %378 = vector.load %arg17[%c0_164, %c0_165] : memref<1x128xf32, #tpu.memory_space<vmem>>, vector<1x128xf32>
    %379 = vector.broadcast %378 : vector<1x128xf32> to vector<2x128xf32>
    %380 = arith.addf %377, %379 : vector<2x128xf32>
    %381 = math.tanh %380 : vector<2x128xf32>
    %c0_166 = arith.constant 0 : index
    %c0_167 = arith.constant 0 : index
    %382 = vector.load %arg19[%c0_166, %c0_167] : memref<2x128xf32, #tpu.memory_space<vmem>>, vector<2x128xf32>
    tpu.vector_store %arg19[%c0_166, %c0_167], %381 {strides = array<i32>} : memref<2x128xf32, #tpu.memory_space<vmem>>, vector<2x128xf32>,
    return
  }
}

</mosaic_0001>

<bundles_post_ra>
// kernel: bert_model.1
= control target key start
LH: loop header
LB: loop body
LE: loop exit
PB: predicated region body
PF: predicated region fallthrough
CT: control target
= control target key end

     0   :  { %s8928_s0 = inlined_call_operand.vmem [shape: f32[16,128], index: 0, kind: input, shape index: {}]   ;;  %s8929_s1 = inlined_call_operand.vmem [shape: f32[2,8], index: 1, kind: input, shape index: {}]   ;;  %s8930_s2 = inlined_call_operand.vmem [shape: f32[1,128], index: 2, kind: input, shape index: {}]   ;;  %s8931_s3 = inlined_call_operand.vmem [shape: f32[1,128], index: 3, kind: input, shape index: {}]   ;;  %s8932_s4 = inlined_call_operand.vmem [shape: f32[2,128,384], index: 4, kind: input, shape index: {}]   ;;  %s8933_s5 = inlined_call_operand.vmem [shape: f32[2,1,384], index: 5, kind: input, shape index: {}]   ;;  %s8934_s6 = inlined_call_operand.vmem [shape: f32[2,128,128], index: 6, kind: input, shape index: {}]   ;;  %s8935_s7 = inlined_call_operand.vmem [shape: f32[2,1,128], index: 7, kind: input, shape index: {}]   ;;  %s8936_s8 = inlined_call_operand.vmem [shape: f32[2,1,128], index: 8, kind: input, shape index: {}]   ;;  %s8937_s9 = inlined_call_operand.vmem [shape: f32[2,1,128], index: 9, kind: input, shape index: {}]   ;;  %s8938_s10 = inlined_call_operand.vmem [shape: f32[2,128,256], index: 10, kind: input, shape index: {}]   ;;  %s8939_s11 = inlined_call_operand.vmem [shape: f32[2,1,256], index: 11, kind: input, shape index: {}]   ;;  %s8940_s12 = inlined_call_operand.vmem [shape: f32[2,256,128], index: 12, kind: input, shape index: {}]   ;;  %s8941_s13 = inlined_call_operand.vmem [shape: f32[2,1,128], index: 13, kind: input, shape index: {}]   ;;  %s8942_s14 = inlined_call_operand.vmem [shape: f32[2,1,128], index: 14, kind: input, shape index: {}]   ;;  %s8943_s15 = inlined_call_operand.vmem [shape: f32[2,1,128], index: 15, kind: input, shape index: {}]   ;;  %s8944_s16 = inlined_call_operand.vmem [shape: f32[128,128], index: 16, kind: input, shape index: {}]   ;;  %s8945_s17 = inlined_call_operand.vmem [shape: f32[1,128], index: 17, kind: input, shape index: {}]   ;;  %s8946_s18 = inlined_call_operand.vmem [shape: f32[2,16,128], index: 18, kind: output, shape index: {0}]   ;;  %s8947_s19 = inlined_call_operand.hbm [shape: f32[2,128], index: 19, kind: output, shape index: {1}]  }
   0x1   :  { %8949 = sst [smem:[#allocation5_spill]] %s8928_s0 }
   0x2   :  { %8950 = sst [smem:[#allocation6_spill]] %s8929_s1 }
   0x3   :  { %8951 = sst [smem:[#allocation7_spill]] %s8930_s2 }
   0x4   :  { %8952 = sst [smem:[#allocation8_spill]] %s8931_s3 }
   0x5   :  { %s8953_s20 = sld [smem:[#allocation5_spill]] }
   0xb   :  { %v98_v0 = vld [vmem:[%s8953_s20] sm:$0xff] }
   0xc   :  { %25 = vsyncpa [#allocation3], 0  ;;  %v7274_v1 = vmov 1.0|1.0   ;;  %5932 = vmatprep.mubr.f32.mxu0 %v98_v0  ;;  %v99_v2 = vld [vmem:[%s8953_s20 + $0x8] sm:$0xff]  ;;  %v7275_v3 = vmov 0  }
   0xd   :  { %6585 = vmatprep.subr.bf16.mxu0 %v7274_v1  ;;  %6601 = vmatprep.subr.bf16.mxu1 %v7274_v1  ;;  %v303_v14 = vld [vmem:[%s8932_s4 + $0x8] sm:$0xff]  ;;  %v306_v15 = vld [vmem:[%s8932_s4 + $0x20] sm:$0xff]  ;;  %v305_v18 = vld [vmem:[%s8932_s4 + $0x18] sm:$0xff]  ;;  %s8954_s28 = sld [smem:[#allocation7_spill]]  ;;  %s8955_s30 = sld [smem:[#allocation8_spill]]  ;;  %vm7277_vm0 = vmmov 0  }
   0xe   :  { %6586 = vmatpush3.bf16.msra.mxu0 %v7274_v1  ;;  %6602 = vmatpush3.bf16.msra.mxu1 %v7274_v1  ;;  %v302_v16 = vld [vmem:[%s8932_s4] sm:$0xff]  ;;  %v6617_v17 = vpack.c.bf16 %v306_v15, %v303_v14  ;;  %v309_v19 = vld [vmem:[%s8932_s4 + $0x38] sm:$0xff]  ;;  %v312_v20 = vld [vmem:[%s8932_s4 + $0x50] sm:$0xff]  ;;  %vm567_vm1 = vcmask 261120   ;;  %s7278_s1 = smov 96   ;;  %s7279_s22 = smov 64  }
   0xf   :  { %6587 = vmatprep.subr.bf16.mxu0 %v7274_v1  ;;  %6603 = vmatprep.subr.bf16.mxu1 %v7274_v1  ;;  %v6619_v21 = vpack.c.bf16 %v305_v18, %v302_v16  ;;  %v6621_v22 = vpack.c.bf16 %v312_v20, %v309_v19  ;;  %v304_v23 = vld [vmem:[%s8932_s4 + $0x10] sm:$0xff]  ;;  %v307_v24 = vld [vmem:[%s8932_s4 + $0x28] sm:$0xff]  ;;  %v318_v29 = vld [vmem:[%s8932_s4 + $0x80] sm:$0xff]  ;;  %s7280_s2 = smov 32   ;;  %s8956_s25 = sld [smem:[#allocation6_spill]]  ;;  %vm1176_vm2 = vcmask 64512  }
  0x10   :  { %7100 = vset.pattern.permute.xlu0 %v7275_v3  ;;  %7101 = vset.pattern.permute.xlu1 %v7275_v3  ;;  %v308_v25 = vld [vmem:[%s8932_s4 + $0x30] sm:$0xff]  ;;  %v6649_v26 = vpack.c.bf16 %v307_v24, %v304_v23  ;;  %v311_v27 = vld [vmem:[%s8932_s4 + $0x48] sm:$0xff]  ;;  %v310_v31 = vld [vmem:[%s8932_s4 + $0x40] sm:$0xff]  ;;  %vm1875_vm3 = vcmask 523264   ;;  %vm1878_vm4 = vcmask 785408   ;;  %vm5197_vm13 = vcmask 1041409  }
  0x11   :  { %v315_v28 = vld [vmem:[%s8932_s4 + $0x68] sm:$0xff]  ;;  %v6623_v30 = vpack.c.bf16 %v311_v27, %v308_v25  ;;  %v313_v32 = vld [vmem:[%s8932_s4 + $0x58] sm:$0xff]  ;;  %v314_v35 = vld [vmem:[%s8932_s4 + $0x60] sm:$0xff]  ;;  %s7284_s26 = smov [#allocation2]  }
  0x12   :  { %6588 = vmatpush3.bf16.msra.mxu0 %v7274_v1  ;;  %6604 = vmatpush3.bf16.msra.mxu1 %v7274_v1  ;;  %v6625_v33 = vpack.c.bf16 %v318_v29, %v315_v28  ;;  %v6653_v34 = vpack.c.bf16 %v313_v32, %v310_v31  ;;  %v317_v36 = vld [vmem:[%s8932_s4 + $0x78] sm:$0xff]  ;;  %v324_v38 = vld [vmem:[%s8932_s4 + $0xb0] sm:$0xff]  ;;  %v319_v40 = vld [vmem:[%s8932_s4 + $0x88] sm:$0xff]  ;;  %s5280_s27 = sshll.u32 %s7284_s26, 4  ;;  %s5281_s27 = int_to_ptr.vmem [resolvable:$true] %s5280_s27 }
  0x13   :  { %6589 = vmatprep.subr.bf16.mxu0 %v7274_v1  ;;  %6605 = vmatprep.subr.bf16.mxu1 %v7274_v1  ;;  %v321_v37 = vld [vmem:[%s8932_s4 + $0x98] sm:$0xff]  ;;  %v316_v39 = vld [vmem:[%s8932_s4 + $0x70] sm:$0xff]  ;;  %v6627_v42 = vpack.c.bf16 %v317_v36, %v314_v35  ;;  %v322_v43 = vld [vmem:[%s8932_s4 + $0xa0] sm:$0xff]  ;;  %p7255_p1 = scmp.lt.s32.totalorder %s5281_s27, %s5281_s27 }
  0x14   :  { %v6657_v41 = vpack.c.bf16 %v319_v40, %v316_v39  ;;  %v325_v44 = vld [vmem:[%s8932_s4 + $0xb8] sm:$0xff]  ;;  %v6629_v45 = vpack.c.bf16 %v324_v38, %v321_v37  ;;  %v320_v46 = vld [vmem:[%s8932_s4 + $0x90] sm:$0xff]  ;;  %v323_v47 = vld [vmem:[%s8932_s4 + $0xa8] sm:$0xff] }
  0x15   :  { %v327_v48 = vld [vmem:[%s8932_s4 + $0xc8] sm:$0xff]  ;;  %v330_v49 = vld [vmem:[%s8932_s4 + $0xe0] sm:$0xff]  ;;  %v6661_v50 = vpack.c.bf16 %v325_v44, %v322_v43  ;;  %v6631_v51 = vpack.c.bf16 %v323_v47, %v320_v46  ;;  %v328_v52 = vld [vmem:[%s8932_s4 + $0xd0] sm:$0xff] }
  0x16   :  { %6590 = vmatpush3.bf16.msra.mxu0 %v7274_v1  ;;  %6606 = vmatpush3.bf16.msra.mxu1 %v7274_v1  ;;  %v331_v53 = vld [vmem:[%s8932_s4 + $0xe8] sm:$0xff]  ;;  %v6633_v54 = vpack.c.bf16 %v330_v49, %v327_v48  ;;  %v326_v55 = vld [vmem:[%s8932_s4 + $0xc0] sm:$0xff]  ;;  %v329_v56 = vld [vmem:[%s8932_s4 + $0xd8] sm:$0xff] }
  0x17   :  { %6591 = vmatprep.subr.bf16.mxu0 %v7274_v1  ;;  %6607 = vmatprep.subr.bf16.mxu1 %v7274_v1  ;;  %v333_v57 = vld [vmem:[%s8932_s4 + $0xf8] sm:$0xff]  ;;  %v336_v58 = vld [vmem:[%s8932_s4 + $0x110] sm:$0xff]  ;;  %v6665_v59 = vpack.c.bf16 %v331_v53, %v328_v52  ;;  %v6635_v60 = vpack.c.bf16 %v329_v56, %v326_v55  ;;  %v334_v61 = vld [vmem:[%s8932_s4 + $0x100] sm:$0xff] }
  0x18   :  { %v337_v62 = vld [vmem:[%s8932_s4 + $0x118] sm:$0xff]  ;;  %v6637_v63 = vpack.c.bf16 %v336_v58, %v333_v57  ;;  %v339_v3 = vld [vmem:[%s8932_s4 + $0x128] sm:$0xff]  ;;  %v344_v25 = vld [vmem:[%s8932_s4 + $0x150] sm:$0xff] }
  0x19   :  { %v345_v20 = vld [vmem:[%s8932_s4 + $0x158] sm:$0xff]  ;;  %v343_v24 = vld [vmem:[%s8932_s4 + $0x148] sm:$0xff]  ;;  %v5291_v37 = vld [vmem:[%s8955_s30] ss:$0 sm:$0xff] }
  0x1a   :  { %6592 = vmatpush3.bf16.msra.mxu0 %v7274_v1  ;;  %6608 = vmatpush3.bf16.msra.mxu1 %v7274_v1  ;;  %v349_v31 = vld [vmem:[%s8932_s4 + $0x178] sm:$0xff] }
  0x1b   :  { %6593 = vmatprep.subr.bf16.mxu0 %v7274_v1  ;;  %6609 = vmatprep.subr.bf16.mxu1 %v7274_v1 }
  0x1e   :  { %6594 = vmatpush3.bf16.msra.mxu0 %v7274_v1  ;;  %6610 = vmatpush3.bf16.msra.mxu1 %v7274_v1 }
  0x1f   :  { %6595 = vmatprep.subr.bf16.mxu0 %v7274_v1  ;;  %6611 = vmatprep.subr.bf16.mxu1 %v7274_v1 }
  0x22   :  { %6596 = vmatpush3.bf16.msra.mxu0 %v7274_v1  ;;  %6612 = vmatpush3.bf16.msra.mxu1 %v7274_v1 }
  0x23   :  { %6597 = vmatprep.subr.bf16.mxu0 %v7274_v1  ;;  %6613 = vmatprep.subr.bf16.mxu1 %v7274_v1 }
  0x26   :  { %6598 = vmatpush3.bf16.msra.mxu0 %v7274_v1  ;;  %6614 = vmatpush3.bf16.msra.mxu1 %v7274_v1 }
  0x27   :  { %6599 = vmatprep.subr.bf16.mxu0 %v7274_v1  ;;  %6615 = vmatprep.subr.bf16.mxu1 %v7274_v1 }
  0x2a   :  { %6600 = vmatpush3.bf16.msra.mxu0 %v7274_v1  ;;  %6616 = vmatpush3.bf16.msra.mxu1 %v7274_v1 }
  0x2b   :  { %6618 = vmatprep.subr.bf16.mxu0 %v6617_v17  ;;  %6650 = vmatprep.subr.bf16.mxu1 %v6649_v26 }
  0x2d   :  { %5933 = vmatmul.mubr.f32.vlgmr.msra.gmra.mrb[0].mxu0 %v99_v2 }
  0x2e   :  { %6620 = vmatpush1.bf16.msra.mxu0 %v6619_v21  ;;  %v348_v21 = vld [vmem:[%s8932_s4 + $0x170] sm:$0xff] }
  0x2f   :  { %6622 = vmatprep.subr.bf16.mxu0 %v6621_v22  ;;  %v340_v22 = vld [vmem:[%s8932_s4 + $0x130] sm:$0xff]  ;;  %v6645_v23 = vpack.c.bf16 %v348_v21, %v345_v20 }
  0x30   :  { %v6673_v27 = vpack.c.bf16 %v343_v24, %v340_v22 }
  0x32   :  { %6624 = vmatpush1.bf16.msra.mxu0 %v6623_v30  ;;  %v346_v30 = vld [vmem:[%s8932_s4 + $0x160] sm:$0xff] }
  0x33   :  { %6626 = vmatprep.subr.bf16.mxu0 %v6625_v33  ;;  %v6677_v32 = vpack.c.bf16 %v349_v31, %v346_v30  ;;  %v7276_v33 = vmov 0.0  }
  0x34   :  { %431 = vmatprep.mubr.f32.mxu0 %v7276_v33 }
  0x36   :  { %6628 = vmatpush1.bf16.msra.mxu0 %v6627_v42 }
  0x37   :  { %6630 = vmatprep.subr.bf16.mxu0 %v6629_v45  ;;  %v350_v45 = vld [vmem:[%s8933_s5] sm:$0x7] }
  0x3a   :  { %6632 = vmatpush1.bf16.msra.mxu0 %v6631_v51 }
  0x3b   :  { %6634 = vmatprep.subr.bf16.mxu0 %v6633_v54 }
  0x3e   :  { %6636 = vmatpush1.bf16.msra.mxu0 %v6635_v60 }
  0x3f   :  { %6638 = vmatprep.subr.bf16.mxu0 %v6637_v63 }
 0x100   :  { %v5934_v4 = vpop.f32.mrb[0].mxu0 }
 0x101   :  { %v168_v5 = vpop.f32.mrb[1].mxu0  ;;  %v178_v7 = vmul.f32 0.0078125, %v5934_v4  ;;  %v342_v4 = vld [vmem:[%s8932_s4 + $0x140] sm:$0xff] }
 0x102   :  { %v177_v6 = vmul.f32 0.0078125, %v168_v5  ;;  %v6669_v5 = vpack.c.bf16 %v337_v62, %v334_v61 }
 0x104   :  { %181 = vperm.xlu0 %7100, %v177_v6  }
 0x108   :  { %186 = vperm.xlu0 %7100, %v178_v7   ;;  %v6641_v7 = vpack.c.bf16 %v342_v4, %v339_v3 }
 0x183   :  { %v182_v8 = vpop.permute.xlu0 %181 }
 0x184   :  { %v7423_v9 = vsub.f32 %v98_v0, %v182_v8  ;;  %v332_v0 = vld [vmem:[%s8932_s4 + $0xf0] sm:$0xff]  ;;  %v338_v8 = vld [vmem:[%s8932_s4 + $0x120] sm:$0xff] }
 0x186   :  { %v191_v10 = vmul.f32 %v7423_v9, %v7423_v9 }
 0x187   :  { %v187_v11 = vpop.permute.xlu0 %186 }
 0x188   :  { %v7427_v12 = vsub.f32 %v99_v2, %v187_v11  ;;  %5967 = vmatprep.mubr.f32.mxu1 %v191_v10  ;;  %v335_v2 = vld [vmem:[%s8932_s4 + $0x108] sm:$0xff]  ;;  %v341_v10 = vld [vmem:[%s8932_s4 + $0x138] sm:$0xff] }
 0x189   :  { %v6639_v6 = vpack.c.bf16 %v335_v2, %v332_v0  ;;  %v6643_v11 = vpack.c.bf16 %v341_v10, %v338_v8 }
 0x18a   :  { %v192_v13 = vmul.f32 %v7427_v12, %v7427_v12 }
 0x18b   :  { %6640 = vmatpush1.bf16.msra.mxu0 %v6639_v6 }
 0x18c   :  { %5968 = vmatmul.mubr.f32.vlgmr.msra.gmra.mrb[0].mxu1 %v192_v13  ;;  %6642 = vmatprep.subr.bf16.mxu0 %v6641_v7 }
 0x18d   :  { %6652 = vmatpush3.bf16.msra.mxu1 %v6649_v26  ;;  %v347_v26 = vld [vmem:[%s8932_s4 + $0x168] sm:$0xff] }
 0x18e   :  { %6654 = vmatprep.subr.bf16.mxu1 %v6653_v34  ;;  %v6647_v28 = vpack.c.bf16 %v347_v26, %v344_v25 }
 0x18f   :  { %6644 = vmatpush1.bf16.msra.mxu0 %v6643_v11 }
 0x190   :  { %6646 = vmatprep.subr.bf16.mxu0 %v6645_v23 }
 0x191   :  { %6656 = vmatpush3.bf16.msra.mxu1 %v6653_v34  ;;  %v5290_v34 = vld [vmem:[%s8954_s28] ss:$0 sm:$0xff]  ;;  %s7250_s28 = scalar_lea.vmem %s5281_s27, 32 }
 0x192   :  { %6658 = vmatprep.subr.bf16.mxu1 %v6657_v41  ;;  %p7251_p0 = scmp.ne.s32.totalorder %s5281_s27, %s7250_s28  ;;  %p7256_p2 = scmp.lt.s32.totalorder %s7250_s28, %s7250_s28 }
 0x193   :  { %6648 = vmatpush1.bf16.msra.mxu0 %v6647_v28 }
 0x194   :  { %6010 = vmatprep.subr.mxu0 %v7276_v33  ;;  %p7257_p3 = por %p7256_p2, %p7255_p1 }
 0x195   :  { %6660 = vmatpush3.bf16.msra.mxu1 %v6657_v41 }
 0x196   :  { %6662 = vmatprep.subr.bf16.mxu1 %v6661_v50  ;;  %p7258_p4 = pnand %p7257_p3, %p7251_p0 }
 0x199   :  { %6664 = vmatpush3.bf16.msra.mxu1 %v6661_v50 }
 0x19a   :  { %6666 = vmatprep.subr.bf16.mxu1 %v6665_v59 }
 0x19d   :  { %6668 = vmatpush3.bf16.msra.mxu1 %v6665_v59 }
 0x19e   :  { %6670 = vmatprep.subr.bf16.mxu1 %v6669_v5 }
 0x1a1   :  { %6672 = vmatpush3.bf16.msra.mxu1 %v6669_v5 }
 0x1a2   :  { %6674 = vmatprep.subr.bf16.mxu1 %v6673_v27 }
 0x1a5   :  { %6676 = vmatpush3.bf16.msra.mxu1 %v6673_v27 }
 0x1a6   :  { %6678 = vmatprep.subr.bf16.mxu1 %v6677_v32 }
 0x1a9   :  { %6680 = vmatpush3.bf16.msra.mxu1 %v6677_v32 }
 0x1aa   :  { %6005 = vmatprep.subr.mxu1 %v7276_v33 }
 0x25f   :  { %v5969_v13 = vpop.f32.mrb[0].mxu1 }
 0x260   :  { %v259_v14 = vpop.f32.mrb[1].mxu1  ;;  %v269_v15 = vmul.f32 0.0078125, %v5969_v13 }
 0x261   :  { %v268_v16 = vmul.f32 0.0078125, %v259_v14  ;;  %v7281_v14 = vmov 1966171168  }
 0x262   :  { %v271_v18 = vadd.f32 1e-12, %v269_v15  ;;  %v67_v15 = vunpack.c.l.s4 %v7281_v14 }
 0x263   :  { %v270_v17 = vadd.f32 1e-12, %v268_v16  ;;  %v62_v16 = vld [vmem:[%s8956_s25] sm:$0x3] }
 0x265   :  { %7132 = vrsqrt.f32 %v270_v17  ;;  %v68_v17 = vunpack.c.0.s8 %v67_v15 }
 0x266   :  { %7134 = vrsqrt.f32 %v271_v18  ;;  %v63_v18 = vsub.f32 1.0, %v62_v16 }
 0x268   :  { %v64_v20 = vmul.f32 -10000.0, %v63_v18 }
 0x26f   :  { %v7133_v19 = vpop.eup %7132 }
 0x270   :  { %276 = vperm.xlu1 %7101, %v7133_v19   ;;  %v7135_v29 = vpop.eup %7134 }
 0x274   :  { %281 = vperm.xlu1 %7101, %v7135_v29  }
 0x2ef   :  { %v277_v35 = vpop.permute.xlu1 %276 }
 0x2f0   :  { %v284_v36 = vmul.f32 %v277_v35, %v7423_v9  ;;  %v69_v9 = vlaneseq }
 0x2f2   :  { %v292_v38 = vmul.f32 %v5290_v34, %v284_v36 }
 0x2f3   :  { %v282_v39 = vpop.permute.xlu1 %281 }
 0x2f4   :  { %v7585_v40 = vadd.f32 %v5291_v37, %v292_v38  ;;  %v285_v41 = vmul.f32 %v282_v39, %v7427_v12  ;;  %v7599_v12 = vshrl.u32 %v69_v9, 7 }
 0x2f6   :  { %v293_v42 = vmul.f32 %v5290_v34, %v285_v41  ;;  %432 = vmatmul.mubr.f32.vlgmr.msra.gmra.mrb[2].mxu0 %v7585_v40  ;;  %6002 = vmatprep.mubr.f32.mxu1 %v7585_v40  ;;  %v7602_v44 = vsub.s32 0, %v7599_v12  ;;  %v7608_v46 = vsub.s32 1, %v7599_v12  ;;  %v362_v2 = vsub.s32 2, %v7599_v12 }
 0x2f7   :  { %437 = vmatprep.mubr.f32.mxu0 %v7276_v33  ;;  %v71_v19 = vsub.s32 %v68_v17, %v7599_v12 }
 0x2f8   :  { %v7591_v43 = vadd.f32 %v5291_v37, %v293_v42  ;;  %v355_v47 = vrot.slane %v350_v45, %v7602_v44  ;;  %v359_v48 = vrot.slane %v350_v45, %v7608_v46  ;;  %v363_v5 = vrot.slane %v350_v45, %v362_v2 }
 0x2f9   :  { %v72_v21 = vrot.slane %v64_v20, %v71_v19 }
 0x2fa   :  { %438 = vmatmul.mubr.f32.gmra.mrb[4].mxu0 %v7591_v43  ;;  %6003 = vmatmul.mubr.f32.vlgmr.msra.gmra.mrb[2].mxu1 %v7591_v43 }
 0x2fb   :  { %6007 = vmatprep.mubr.msk.f32.mxu1 %vm7277_vm0, %v7276_v33  ;;  %6012 = vmatprep.mubr.msk.f32.mxu0 %vm7277_vm0, %v7276_v33  ;;  %v73_v22 = vcombine.high %v72_v21, %v72_v21  ;;  %v80_v23 = vrot.slane %v72_v21, %v71_v19 }
 0x2fd   :  { %v87_v24 = vrot.slane %v73_v22, %v71_v19  ;;  %v7683_v25 = vrot.slane %v80_v23, %v7602_v44 }
 0x2ff   :  { %v7686_v29 = vrot.slane %v87_v24, %v7602_v44 }
 0x3c9   :  { %v433_v49 = vpop.f32.mrb[2].mxu0 }
 0x3ca   :  { %v434_v50 = vadd.f32 %v433_v49, %v355_v47  ;;  %v435_v51 = vpop.f32.mrb[3].mxu0 }
 0x3cb   :  { %v436_v52 = vadd.f32 %v435_v51, %v359_v48 }
 0x3cc   :  { %521 = vrot.lane.b32.xlu0 %v434_v50, %s7278_s1 }
 0x3cd   :  { %v439_v53 = vpop.f32.mrb[4].mxu0  ;;  %v7613_v54 = vpop.f32.mrb[2].mxu1  ;;  %6006 = vmatpush3.xpose.msk.msra.mxu1 %vm567_vm1, %v436_v52 }
 0x3ce   :  { %v440_v55 = vadd.f32 %v439_v53, %v355_v47  ;;  %v441_v56 = vpop.f32.mrb[5].mxu0  ;;  %v510_v57 = vpop.f32.mrb[3].mxu1  ;;  %6015 = vmatprep.subr.mxu1 %v7276_v33  ;;  %v7670_v11 = vadd.f32 %v7613_v54, %v363_v5 }
 0x3cf   :  { %v442_v58 = vadd.f32 %v441_v56, %v359_v48  ;;  %v7659_v8 = vadd.f32 %v510_v57, %v363_v5 }
 0x3d0   :  { %523 = vrot.lane.b32.xlu1 %v440_v55, %s7278_s1  ;;  %525 = vrot.lane.b32.xlu0 %v434_v50, %s7279_s22 }
 0x3d1   :  { %6008 = vmatmul.mubr.msk.f32.vlgmr.msra.gmra.mrb[4].mxu1 %vm567_vm1, %v434_v50  ;;  %6011 = vmatpush3.xpose.msk.msra.mxu0 %vm567_vm1, %v442_v58 }
 0x3d2   :  { %6017 = vmatprep.mubr.msk.f32.mxu1 %vm7277_vm0, %v7276_v33  ;;  %6020 = vmatprep.subr.mxu0 %v7276_v33 }
 0x3d4   :  { %527 = vrot.lane.b32.xlu1 %v440_v55, %s7279_s22  ;;  %6013 = vmatmul.mubr.msk.f32.vlgmr.msra.gmra.mrb[6].mxu0 %vm567_vm1, %v440_v55 }
 0x3d5   :  { %535 = vrot.lane.b32.xlu0 %v436_v52, %s7278_s1  ;;  %6022 = vmatprep.mubr.msk.f32.mxu0 %vm7277_vm0, %v7276_v33 }
 0x3d8   :  { %537 = vrot.lane.b32.xlu1 %v442_v58, %s7278_s1 }
 0x3d9   :  { %539 = vrot.lane.b32.xlu0 %v436_v52, %s7279_s22 }
 0x3dc   :  { %541 = vrot.lane.b32.xlu1 %v442_v58, %s7279_s22 }
 0x3dd   :  { %543 = vrot.lane.b32.xlu0 %v436_v52, %s7280_s2 }
 0x3e0   :  { %545 = vrot.lane.b32.xlu1 %v442_v58, %s7280_s2 }
 0x3e1   :  { %529 = vrot.lane.b32.xlu0 %v434_v50, %s7280_s2 }
 0x3e4   :  { %531 = vrot.lane.b32.xlu1 %v440_v55, %s7280_s2 }
 0x43e   :  { %v522_v59 = vpop.permute.xlu0 %521 }
 0x442   :  { %v524_v60 = vpop.permute.xlu1 %523  ;;  %v526_v61 = vpop.permute.xlu0 %525 }
 0x446   :  { %v528_v62 = vpop.permute.xlu1 %527 }
 0x447   :  { %v536_v63 = vpop.permute.xlu0 %535 }
 0x448   :  { %6016 = vmatpush3.xpose.msk.msra.mxu1 %vm567_vm1, %v536_v63 }
 0x449   :  { %6025 = vmatprep.subr.mxu1 %v7276_v33 }
 0x44a   :  { %v538_v0 = vpop.permute.xlu1 %537 }
 0x44b   :  { %v540_v3 = vpop.permute.xlu0 %539  ;;  %6018 = vmatmul.mubr.msk.f32.vlgmr.msra.gmra.mrb[6].mxu1 %vm567_vm1, %v522_v59  ;;  %6021 = vmatpush3.xpose.msk.msra.mxu0 %vm567_vm1, %v538_v0 }
 0x44c   :  { %6026 = vmatpush3.xpose.msk.msra.mxu1 %vm567_vm1, %v540_v3  ;;  %6027 = vmatprep.mubr.msk.f32.mxu1 %vm7277_vm0, %v7276_v33 }
 0x44d   :  { %6030 = vmatprep.subr.mxu0 %v7276_v33  ;;  %6035 = vmatprep.subr.mxu1 %v7276_v33 }
 0x44e   :  { %v542_v4 = vpop.permute.xlu1 %541  ;;  %6023 = vmatmul.mubr.msk.f32.vlgmr.msra.gmra.mrb[8].mxu0 %vm567_vm1, %v524_v60 }
 0x44f   :  { %v544_v6 = vpop.permute.xlu0 %543  ;;  %6028 = vmatmul.mubr.msk.f32.vlgmr.msra.gmra.mrb[8].mxu1 %vm567_vm1, %v526_v61  ;;  %6031 = vmatpush3.xpose.msk.msra.mxu0 %vm567_vm1, %v542_v4 }
 0x450   :  { %6036 = vmatpush3.xpose.msk.msra.mxu1 %vm567_vm1, %v544_v6  ;;  %6032 = vmatprep.mubr.msk.f32.mxu0 %vm7277_vm0, %v7276_v33 }
 0x451   :  { %6040 = vmatprep.subr.mxu0 %v7276_v33  ;;  %6037 = vmatprep.mubr.msk.f32.mxu1 %vm7277_vm0, %v7276_v33 }
 0x452   :  { %v546_v7 = vpop.permute.xlu1 %545  ;;  %6033 = vmatmul.mubr.msk.f32.vlgmr.msra.gmra.mrb[10].mxu0 %vm567_vm1, %v528_v62  ;;  %6045 = vmatprep.subr.mxu1 %v7276_v33 }
 0x453   :  { %v530_v10 = vpop.permute.xlu0 %529  ;;  %6041 = vmatpush3.xpose.msk.msra.mxu0 %vm567_vm1, %v546_v7  ;;  %6042 = vmatprep.mubr.msk.f32.mxu0 %vm7277_vm0, %v7276_v33 }
 0x454   :  { %6038 = vmatmul.mubr.msk.f32.vlgmr.msra.gmra.mrb[10].mxu1 %vm567_vm1, %v530_v10  ;;  %6050 = vmatprep.subr.mxu0 %v7276_v33 }
 0x455   :  { %6046 = vmatpush3.msra.mxu1 %v7659_v8  ;;  %6047 = vmatprep.mubr.msk.f32.mxu1 %vm7277_vm0, %v7276_v33 }
 0x456   :  { %v532_v13 = vpop.permute.xlu1 %531  ;;  %6055 = vmatprep.subr.mxu1 %v7276_v33 }
 0x457   :  { %6043 = vmatmul.mubr.msk.f32.vlgmr.msra.gmra.mrb[12].mxu0 %vm567_vm1, %v532_v13 }
 0x458   :  { %6051 = vmatpush3.msra.mxu0 %v7670_v11  ;;  %6052 = vmatprep.mubr.msk.f32.mxu0 %vm7277_vm0, %v7276_v33 }
 0x459   :  { %6060 = vmatprep.subr.mxu0 %v7276_v33 }
 0x4a4   :  { %v638_v26 = vpop.f32.mrb[4].mxu1 }
 0x4a5   :  { %v1160_v27 = vmul.f32 0.17677669, %v638_v26  ;;  %v6009_v28 = vpop.f32.mrb[5].mxu1 }
 0x4a7   :  { %v712_v30 = vpop.f32.mrb[6].mxu0  ;;  %v1168_v31 = vadd.f32 %v1160_v27, %v7683_v25 }
 0x4a8   :  { %v1161_v32 = vmul.f32 0.17677669, %v712_v30  ;;  %v6014_v34 = vpop.f32.mrb[7].mxu0 }
 0x4a9   :  { %v1177_v35 = vsel %vm1176_vm2, %v1168_v31, -inf }
 0x4aa   :  { %1178 = vmax.xlane.f32.xlu0 %v1177_v35  ;;  %v1169_v36 = vadd.f32 %v1161_v32, %v7686_v29 }
 0x4ac   :  { %v1180_v37 = vsel %vm1176_vm2, %v1169_v36, -inf }
 0x4ad   :  { %1181 = vmax.xlane.f32.xlu1 %v1180_v37 }
 0x51e   :  { %v786_v38 = vpop.f32.mrb[6].mxu1 }
 0x51f   :  { %v1162_v39 = vmul.f32 0.17677669, %v786_v38  ;;  %v6019_v41 = vpop.f32.mrb[7].mxu1 }
 0x521   :  { %v860_v42 = vpop.f32.mrb[8].mxu0  ;;  %v1170_v9 = vadd.f32 %v1162_v39, %v7683_v25 }
 0x522   :  { %v1163_v45 = vmul.f32 0.17677669, %v860_v42  ;;  %v934_v47 = vpop.f32.mrb[8].mxu1  ;;  %v6024_v48 = vpop.f32.mrb[9].mxu0 }
 0x523   :  { %v1164_v49 = vmul.f32 0.17677669, %v934_v47  ;;  %v6029_v50 = vpop.f32.mrb[9].mxu1  ;;  %v1183_v51 = vsel %vm1176_vm2, %v1170_v9, -inf }
 0x524   :  { %1184 = vmax.xlane.f32.xlu0 %v1183_v51  ;;  %v1171_v52 = vadd.f32 %v1163_v45, %v7686_v29 }
 0x525   :  { %v1008_v53 = vpop.f32.mrb[10].mxu0  ;;  %v1172_v54 = vadd.f32 %v1164_v49, %v7683_v25 }
 0x526   :  { %v1165_v55 = vmul.f32 0.17677669, %v1008_v53  ;;  %v6034_v56 = vpop.f32.mrb[11].mxu0  ;;  %v1186_v57 = vsel %vm1176_vm2, %v1171_v52, -inf }
 0x527   :  { %v1082_v58 = vpop.f32.mrb[10].mxu1  ;;  %v1189_v59 = vsel %vm1176_vm2, %v1172_v54, -inf }
 0x528   :  { %v1166_v60 = vmul.f32 0.17677669, %v1082_v58  ;;  %v6039_v61 = vpop.f32.mrb[11].mxu1  ;;  %1187 = vmax.xlane.f32.xlu0 %v1186_v57  ;;  %1190 = vmax.xlane.f32.xlu1 %v1189_v59  ;;  %v1173_v62 = vadd.f32 %v1165_v55, %v7686_v29 }
 0x52a   :  { %v1156_v63 = vpop.f32.mrb[12].mxu0  ;;  %v1192_v0 = vsel %vm1176_vm2, %v1173_v62, -inf  ;;  %v1174_v3 = vadd.f32 %v1166_v60, %v7683_v25 }
 0x52b   :  { %v1167_v4 = vmul.f32 0.17677669, %v1156_v63  ;;  %v6044_v5 = vpop.f32.mrb[13].mxu0 }
 0x52c   :  { %1193 = vmax.xlane.f32.xlu0 %v1192_v0  ;;  %v1195_v6 = vsel %vm1176_vm2, %v1174_v3, -inf }
 0x52d   :  { %1196 = vmax.xlane.f32.xlu1 %v1195_v6  ;;  %v1175_v7 = vadd.f32 %v1167_v4, %v7686_v29 }
 0x52f   :  { %v1198_v10 = vsel %vm1176_vm2, %v1175_v7, -inf }
 0x530   :  { %1199 = vmax.xlane.f32.xlu0 %v1198_v10 }
 0x537   :  { %v1179_v15 = vpop.xlane.xlu0 %1178 }
 0x538   :  { %v1201_v17 = vsub.f32 %v1168_v31, %v1179_v15 }
 0x53a   :  { %v1182_v13 = vpop.xlane.xlu1 %1181  ;;  %v1209_v18 = vmul.f32 1.442695, %v1201_v17 }
 0x53b   :  { %v1202_v14 = vsub.f32 %v1169_v36, %v1182_v13 }
 0x53d   :  { %v1211_v16 = vmul.f32 1.442695, %v1202_v14 }
 0x53e   :  { %549 = vrot.lane.b32.xlu1 %v7659_v8, %s7278_s1 }
 0x53f   :  { %7136 = vpow2.f32 %v1211_v16 }
 0x540   :  { %7138 = vpow2.f32 %v1209_v18 }
 0x542   :  { %555 = vrot.lane.b32.xlu1 %v7659_v8, %s7279_s22 }
 0x546   :  { %557 = vrot.lane.b32.xlu1 %v7670_v11, %s7279_s22  ;;  %551 = vrot.lane.b32.xlu0 %v7670_v11, %s7278_s1 }
 0x549   :  { %v7137_v19 = vpop.eup %7136 }
 0x54a   :  { %v1228_v20 = vsel %vm1176_vm2, %v7137_v19, 0.0  ;;  %v7139_v21 = vpop.eup %7138 }
 0x54b   :  { %v1225_v22 = vsel %vm1176_vm2, %v7139_v21, 0.0 }
 0x565   :  { %1229 = vadd.xlane.f32.xlu0 %v1228_v20 }
 0x56a   :  { %1226 = vadd.xlane.f32.xlu1 %v1225_v22 }
 0x5b1   :  { %v1185_v23 = vpop.xlane.xlu0 %1184 }
 0x5b2   :  { %v1203_v24 = vsub.f32 %v1170_v9, %v1185_v23 }
 0x5b4   :  { %v1213_v26 = vmul.f32 1.442695, %v1203_v24 }
 0x5b5   :  { %v1188_v27 = vpop.xlane.xlu0 %1187  ;;  %v1191_v28 = vpop.xlane.xlu1 %1190 }
 0x5b6   :  { %7140 = vpow2.f32 %v1213_v26  ;;  %v1204_v30 = vsub.f32 %v1171_v52, %v1188_v27  ;;  %v1205_v32 = vsub.f32 %v1172_v54, %v1191_v28 }
 0x5b8   :  { %v1215_v31 = vmul.f32 1.442695, %v1204_v30  ;;  %v1217_v34 = vmul.f32 1.442695, %v1205_v32  ;;  %v1881_v32 = vld [vmem:[%s8934_s6] sm:$0xff] }
 0x5b9   :  { %v1194_v35 = vpop.xlane.xlu0 %1193 }
 0x5ba   :  { %7142 = vpow2.f32 %v1215_v31  ;;  %v1206_v36 = vsub.f32 %v1173_v62, %v1194_v35  ;;  %v1197_v37 = vpop.xlane.xlu1 %1196  ;;  %v1882_v31 = vld [vmem:[%s8934_s6 + $0x8] sm:$0xff] }
 0x5bb   :  { %7144 = vpow2.f32 %v1217_v34  ;;  %v1207_v38 = vsub.f32 %v1174_v3, %v1197_v37  ;;  %v1883_v34 = vld [vmem:[%s8934_s6 + $0x10] sm:$0xff]  ;;  %v6681_v35 = vpack.c.bf16 %v1882_v31, %v1881_v32 }
 0x5bc   :  { %v1219_v39 = vmul.f32 1.442695, %v1206_v36  ;;  %v1884_v36 = vld [vmem:[%s8934_s6 + $0x18] sm:$0xff] }
 0x5bd   :  { %v1221_v41 = vmul.f32 1.442695, %v1207_v38  ;;  %v1200_v42 = vpop.xlane.xlu0 %1199  ;;  %v6685_v37 = vpack.c.bf16 %v1884_v36, %v1883_v34  ;;  %v1885_v38 = vld [vmem:[%s8934_s6 + $0x20] sm:$0xff] }
 0x5be   :  { %7146 = vpow2.f32 %v1219_v39  ;;  %v1208_v45 = vsub.f32 %v1175_v7, %v1200_v42  ;;  %v550_v59 = vpop.permute.xlu1 %549  ;;  %v1886_v39 = vld [vmem:[%s8934_s6 + $0x28] sm:$0xff]  ;;  %v1887_v42 = vld [vmem:[%s8934_s6 + $0x30] sm:$0xff]  ;;  %v5316_v36 = vld [vmem:[%s8935_s7] ss:$0 sm:$0xff] }
 0x5bf   :  { %7148 = vpow2.f32 %v1221_v41  ;;  %v6689_v41 = vpack.c.bf16 %v1886_v39, %v1885_v38 }
 0x5c0   :  { %v7141_v9 = vpop.eup %7140  ;;  %v1223_v47 = vmul.f32 1.442695, %v1208_v45  ;;  %v1888_v45 = vld [vmem:[%s8934_s6 + $0x38] sm:$0xff] }
 0x5c1   :  { %v1231_v48 = vsel %vm1176_vm2, %v7141_v9, 0.0  ;;  %v552_v61 = vpop.permute.xlu0 %551 }
 0x5c2   :  { %7150 = vpow2.f32 %v1223_v47  ;;  %1232 = vadd.xlane.f32.xlu1 %v1231_v48  ;;  %v556_v60 = vpop.permute.xlu1 %555  ;;  %v1889_v47 = vld [vmem:[%s8934_s6 + $0x40] sm:$0xff]  ;;  %v1890_v48 = vld [vmem:[%s8934_s6 + $0x48] sm:$0xff] }
 0x5c4   :  { %v7143_v49 = vpop.eup %7142 }
 0x5c5   :  { %v7145_v50 = vpop.eup %7144  ;;  %v1234_v51 = vsel %vm1176_vm2, %v7143_v49, 0.0 }
 0x5c6   :  { %1235 = vadd.xlane.f32.xlu0 %v1234_v51  ;;  %v1237_v52 = vsel %vm1176_vm2, %v7145_v50, 0.0  ;;  %v558_v63 = vpop.permute.xlu1 %557 }
 0x5c7   :  { %1238 = vadd.xlane.f32.xlu1 %v1237_v52 }
 0x5c8   :  { %v7147_v53 = vpop.eup %7146 }
 0x5c9   :  { %v7149_v54 = vpop.eup %7148  ;;  %v1240_v55 = vsel %vm1176_vm2, %v7147_v53, 0.0 }
 0x5ca   :  { %1241 = vadd.xlane.f32.xlu0 %v1240_v55  ;;  %v1243_v56 = vsel %vm1176_vm2, %v7149_v54, 0.0  ;;  %v1892_v55 = vld [vmem:[%s8934_s6 + $0x58] sm:$0xff] }
 0x5cb   :  { %1244 = vadd.xlane.f32.xlu1 %v1243_v56 }
 0x5cc   :  { %v7719_v57 = vpop.eup %7150 }
 0x5cd   :  { %v1246_v58 = vsel %vm1176_vm2, %v7719_v57, 0.0 }
 0x5ce   :  { %1247 = vadd.xlane.f32.xlu0 %v1246_v58  ;;  %v1894_v58 = vld [vmem:[%s8934_s6 + $0x68] sm:$0xff] }
 0x5dc   :  { %563 = vrot.lane.b32.xlu1 %v7670_v11, %s7280_s2 }
 0x5e4   :  { %561 = vrot.lane.b32.xlu0 %v7659_v8, %s7280_s2 }
 0x5f2   :  { %v1230_v62 = vpop.xlane.xlu0 %1229 }
 0x5f3   :  { %7152 = vrcp.f32 %v1230_v62  ;;  %v1895_v62 = vld [vmem:[%s8934_s6 + $0x70] sm:$0xff] }
 0x5f7   :  { %v1227_v0 = vpop.xlane.xlu1 %1226 }
 0x5f8   :  { %7154 = vrcp.f32 %v1227_v0 }
 0x5fd   :  { %v7153_v3 = vpop.eup %7152 }
 0x5fe   :  { %v1252_v4 = vmul.f32 %v7153_v3, %v7137_v19 }
 0x600   :  { %6053 = vmatmul.mubr.msk.f32.vlgmr.msra.gmra.mrb[14].mxu0 %vm1176_vm2, %v1252_v4 }
 0x601   :  { %6061 = vmatpush3.msra.mxu0 %v552_v61  ;;  %6062 = vmatprep.mubr.msk.f32.mxu0 %vm7277_vm0, %v7276_v33 }
 0x602   :  { %v7155_v11 = vpop.eup %7154  ;;  %6070 = vmatprep.subr.mxu0 %v7276_v33 }
 0x603   :  { %v1250_v8 = vmul.f32 %v7155_v11, %v7139_v21 }
 0x605   :  { %6048 = vmatmul.mubr.msk.f32.vlgmr.msra.gmra.mrb[12].mxu1 %vm1176_vm2, %v1250_v8 }
 0x606   :  { %6056 = vmatpush3.msra.mxu1 %v550_v59  ;;  %6057 = vmatprep.mubr.msk.f32.mxu1 %vm7277_vm0, %v7276_v33 }
 0x607   :  { %6065 = vmatprep.subr.mxu1 %v7276_v33 }
 0x64f   :  { %v1233_v5 = vpop.xlane.xlu1 %1232 }
 0x650   :  { %7156 = vrcp.f32 %v1233_v5 }
 0x653   :  { %v1236_v6 = vpop.xlane.xlu0 %1235 }
 0x654   :  { %7158 = vrcp.f32 %v1236_v6  ;;  %v1239_v7 = vpop.xlane.xlu1 %1238 }
 0x655   :  { %7160 = vrcp.f32 %v1239_v7 }
 0x657   :  { %v1242_v10 = vpop.xlane.xlu0 %1241 }
 0x658   :  { %7162 = vrcp.f32 %v1242_v10  ;;  %v1245_v13 = vpop.xlane.xlu1 %1244 }
 0x659   :  { %7164 = vrcp.f32 %v1245_v13 }
 0x65a   :  { %v7157_v14 = vpop.eup %7156 }
 0x65b   :  { %v1254_v15 = vmul.f32 %v7157_v14, %v7141_v9  ;;  %v1248_v16 = vpop.xlane.xlu0 %1247  ;;  %v6693_v9 = vpack.c.bf16 %v1888_v45, %v1887_v42 }
 0x65c   :  { %7166 = vrcp.f32 %v1248_v16  ;;  %v564_v27 = vpop.permute.xlu1 %563 }
 0x65d   :  { %6058 = vmatmul.mubr.msk.f32.vlgmr.msra.gmra.mrb[14].mxu1 %vm1176_vm2, %v1254_v15 }
 0x65e   :  { %v7159_v17 = vpop.eup %7158  ;;  %6066 = vmatpush3.msra.mxu1 %v556_v60  ;;  %6067 = vmatprep.mubr.msk.f32.mxu1 %vm7277_vm0, %v7276_v33 }
 0x65f   :  { %v7161_v18 = vpop.eup %7160  ;;  %v1256_v19 = vmul.f32 %v7159_v17, %v7143_v49  ;;  %6075 = vmatprep.subr.mxu1 %v7276_v33  ;;  %v562_v21 = vpop.permute.xlu0 %561  ;;  %v6697_v49 = vpack.c.bf16 %v1890_v48, %v1889_v47 }
 0x660   :  { %v1258_v20 = vmul.f32 %v7161_v18, %v7145_v50 }
 0x661   :  { %6063 = vmatmul.mubr.msk.f32.vlgmr.msra.gmra.mrb[16].mxu0 %vm1176_vm2, %v1256_v19 }
 0x662   :  { %v7163_v22 = vpop.eup %7162  ;;  %6068 = vmatmul.mubr.msk.f32.vlgmr.msra.gmra.mrb[16].mxu1 %vm1176_vm2, %v1258_v20  ;;  %6071 = vmatpush3.msra.mxu0 %v558_v63  ;;  %v1896_v63 = vld [vmem:[%s8934_s6 + $0x78] sm:$0xff] }
 0x663   :  { %v7165_v23 = vpop.eup %7164  ;;  %v1260_v24 = vmul.f32 %v7163_v22, %v7147_v53  ;;  %6076 = vmatpush3.msra.mxu1 %v562_v21  ;;  %6072 = vmatprep.mubr.msk.f32.mxu0 %vm7277_vm0, %v7276_v33  ;;  %v6709_v0 = vpack.c.bf16 %v1896_v63, %v1895_v62  ;;  %v2187_v63 = vld [vmem:[%s8938_s10 + $0x20] sm:$0xff] }
 0x664   :  { %v1262_v26 = vmul.f32 %v7165_v23, %v7149_v54  ;;  %6080 = vmatprep.subr.mxu0 %v7276_v33  ;;  %6077 = vmatprep.mubr.msk.f32.mxu1 %vm7277_vm0, %v7276_v33  ;;  %v1891_v54 = vld [vmem:[%s8934_s6 + $0x50] sm:$0xff] }
 0x665   :  { %6073 = vmatmul.mubr.msk.f32.vlgmr.msra.gmra.mrb[18].mxu0 %vm1176_vm2, %v1260_v24  ;;  %6682 = vmatprep.subr.bf16.mxu1 %v6681_v35  ;;  %v6701_v56 = vpack.c.bf16 %v1892_v55, %v1891_v54  ;;  %v2184_v54 = vld [vmem:[%s8938_s10 + $0x8] sm:$0xff]  ;;  %v2186_v55 = vld [vmem:[%s8938_s10 + $0x18] sm:$0xff] }
 0x666   :  { %v7167_v28 = vpop.eup %7166  ;;  %6081 = vmatpush3.msra.mxu0 %v564_v27  ;;  %6078 = vmatmul.mubr.msk.f32.vlgmr.msra.gmra.mrb[18].mxu1 %vm1176_vm2, %v1262_v26 }
 0x667   :  { %v1264_v30 = vmul.f32 %v7167_v28, %v7719_v57  ;;  %6082 = vmatprep.mubr.msk.f32.mxu0 %vm7277_vm0, %v7276_v33  ;;  %6713 = vmatprep.subr.bf16.mxu0 %v7274_v1  ;;  %v1893_v57 = vld [vmem:[%s8934_s6 + $0x60] sm:$0xff] }
 0x668   :  { %6684 = vmatpush3.bf16.msra.mxu1 %v6681_v35  ;;  %v6705_v59 = vpack.c.bf16 %v1894_v58, %v1893_v57  ;;  %v6745_v57 = vpack.c.bf16 %v2186_v55, %v2184_v54  ;;  %v2185_v58 = vld [vmem:[%s8938_s10 + $0x10] sm:$0xff] }
 0x669   :  { %6083 = vmatmul.mubr.msk.f32.vlgmr.msra.gmra.mrb[20].mxu0 %vm1176_vm2, %v1264_v30  ;;  %6686 = vmatprep.subr.bf16.mxu1 %v6685_v37  ;;  %v2213_v54 = vld [vmem:[%s8938_s10 + $0xf0] sm:$0xff] }
 0x66a   :  { %6714 = vmatpush3.bf16.msra.mxu0 %v7274_v1 }
 0x66b   :  { %6715 = vmatprep.subr.bf16.mxu0 %v7274_v1 }
 0x66c   :  { %6688 = vmatpush3.bf16.msra.mxu1 %v6685_v37 }
 0x66d   :  { %6690 = vmatprep.subr.bf16.mxu1 %v6689_v41 }
 0x66e   :  { %6716 = vmatpush3.bf16.msra.mxu0 %v7274_v1 }
 0x66f   :  { %6717 = vmatprep.subr.bf16.mxu0 %v7274_v1 }
 0x670   :  { %6692 = vmatpush3.bf16.msra.mxu1 %v6689_v41 }
 0x671   :  { %6694 = vmatprep.subr.bf16.mxu1 %v6693_v9 }
 0x672   :  { %6718 = vmatpush3.bf16.msra.mxu0 %v7274_v1 }
 0x673   :  { %6719 = vmatprep.subr.bf16.mxu0 %v7274_v1 }
 0x674   :  { %6696 = vmatpush3.bf16.msra.mxu1 %v6693_v9 }
 0x675   :  { %6698 = vmatprep.subr.bf16.mxu1 %v6697_v49 }
 0x676   :  { %6720 = vmatpush3.bf16.msra.mxu0 %v7274_v1 }
 0x677   :  { %6721 = vmatprep.subr.bf16.mxu0 %v7274_v1 }
 0x678   :  { %6700 = vmatpush3.bf16.msra.mxu1 %v6697_v49 }
 0x679   :  { %6702 = vmatprep.subr.bf16.mxu1 %v6701_v56 }
 0x67a   :  { %6722 = vmatpush3.bf16.msra.mxu0 %v7274_v1 }
 0x67b   :  { %6723 = vmatprep.subr.bf16.mxu0 %v7274_v1 }
 0x67c   :  { %6704 = vmatpush3.bf16.msra.mxu1 %v6701_v56  ;;  %v2183_v56 = vld [vmem:[%s8938_s10] sm:$0xff] }
 0x67d   :  { %6706 = vmatprep.subr.bf16.mxu1 %v6705_v59 }
 0x67e   :  { %6724 = vmatpush3.bf16.msra.mxu0 %v7274_v1 }
 0x67f   :  { %6725 = vmatprep.subr.bf16.mxu0 %v7274_v1 }
 0x680   :  { %6708 = vmatpush3.bf16.msra.mxu1 %v6705_v59  ;;  %v2188_v59 = vld [vmem:[%s8938_s10 + $0x28] sm:$0xff] }
 0x681   :  { %6710 = vmatprep.subr.bf16.mxu1 %v6709_v0 }
 0x682   :  { %6726 = vmatpush3.bf16.msra.mxu0 %v7274_v1 }
 0x683   :  { %6727 = vmatprep.subr.bf16.mxu0 %v7274_v1 }
 0x684   :  { %6712 = vmatpush3.bf16.msra.mxu1 %v6709_v0  ;;  %v2189_v0 = vld [vmem:[%s8938_s10 + $0x30] sm:$0xff] }
 0x685   :  { %6729 = vmatprep.subr.bf16.mxu1 %v7274_v1 }
 0x686   :  { %6728 = vmatpush3.bf16.msra.mxu0 %v7274_v1 }
 0x687   :  { %6746 = vmatprep.subr.bf16.mxu0 %v6745_v57  ;;  %v5317_v57 = vld [vmem:[%s8936_s8] ss:$0 sm:$0xff] }
 0x6d3   :  { %v1407_v50 = vpop.f32.mrb[14].mxu0 }
 0x6d4   :  { %v6054_v51 = vpop.f32.mrb[15].mxu0 }
 0x6d8   :  { %v1334_v52 = vpop.f32.mrb[12].mxu1 }
 0x6d9   :  { %v6049_v53 = vpop.f32.mrb[13].mxu1 }
 0x730   :  { %v1480_v60 = vpop.f32.mrb[14].mxu1 }
 0x731   :  { %v6059_v61 = vpop.f32.mrb[15].mxu1 }
 0x732   :  { %v6747_v61 = vpack.c.bf16 %v2185_v58, %v2183_v56 }
 0x734   :  { %v1553_v3 = vpop.f32.mrb[16].mxu0 }
 0x735   :  { %v7102_v4 = vpack.i.bf16 %v1553_v3, %v1480_v60  ;;  %v1626_v11 = vpop.f32.mrb[16].mxu1  ;;  %v6064_v8 = vpop.f32.mrb[17].mxu0  ;;  %v2190_v60 = vld [vmem:[%s8938_s10 + $0x38] sm:$0xff]  ;;  %v2192_v3 = vld [vmem:[%s8938_s10 + $0x48] sm:$0xff] }
 0x736   :  { %v6069_v5 = vpop.f32.mrb[17].mxu1  ;;  %v6749_v62 = vpack.c.bf16 %v2190_v60, %v2188_v59 }
 0x737   :  { %7103 = vrot.lane.b32.xlu0 %v7102_v4, %s7280_s2  ;;  %v2194_v4 = vld [vmem:[%s8938_s10 + $0x58] sm:$0xff]  ;;  %v2191_v5 = vld [vmem:[%s8938_s10 + $0x40] sm:$0xff] }
 0x738   :  { %v1699_v6 = vpop.f32.mrb[18].mxu0  ;;  %v6753_v8 = vpack.c.bf16 %v2194_v4, %v2192_v3 }
 0x739   :  { %v7107_v7 = vpack.i.bf16 %v1699_v6, %v1626_v11  ;;  %v6074_v10 = vpop.f32.mrb[19].mxu0  ;;  %v1772_v13 = vpop.f32.mrb[18].mxu1  ;;  %v6751_v11 = vpack.c.bf16 %v2189_v0, %v2187_v63  ;;  %v2193_v6 = vld [vmem:[%s8938_s10 + $0x50] sm:$0xff] }
 0x73a   :  { %v6079_v14 = vpop.f32.mrb[19].mxu1  ;;  %v2198_v10 = vld [vmem:[%s8938_s10 + $0x78] sm:$0xff] }
 0x73b   :  { %7108 = vrot.lane.b32.xlu1 %v7107_v7, %s7279_s22  ;;  %v2196_v7 = vld [vmem:[%s8938_s10 + $0x68] sm:$0xff] }
 0x73c   :  { %v1845_v15 = vpop.f32.mrb[20].mxu0  ;;  %v6757_v14 = vpack.c.bf16 %v2198_v10, %v2196_v7  ;;  %v2431_v7 = vld [vmem:[%s8940_s12 + $0x98] sm:$0xff] }
 0x73d   :  { %v7112_v16 = vpack.i.bf16 %v1845_v15, %v1772_v13  ;;  %v6084_v17 = vpop.f32.mrb[21].mxu0  ;;  %v6755_v13 = vpack.c.bf16 %v2193_v6, %v2191_v5  ;;  %v2195_v15 = vld [vmem:[%s8938_s10 + $0x60] sm:$0xff]  ;;  %v2430_v6 = vld [vmem:[%s8940_s12 + $0x90] sm:$0xff] }
 0x73e   :  { %v2200_v17 = vld [vmem:[%s8938_s10 + $0x88] sm:$0xff]  ;;  %v6781_v10 = vpack.c.bf16 %v2431_v7, %v2430_v6 }
 0x73f   :  { %7113 = vrot.lane.b32.xlu0 %v7112_v16, %s7278_s1  ;;  %v2197_v16 = vld [vmem:[%s8938_s10 + $0x70] sm:$0xff] }
 0x7a9   :  { %v7104_v18 = vpop.permute.xlu0 %7103 }
 0x7aa   :  { %v7106_v20 = vunpack.i.h.bf16 %v7104_v18  ;;  %v7105_v21 = vunpack.i.l.bf16 %v7104_v18  ;;  %v2202_v18 = vld [vmem:[%s8938_s10 + $0x98] sm:$0xff] }
 0x7ac   :  { %v1874_v26 = vsel %vm567_vm1, %v1407_v50, %v7106_v20  ;;  %v1873_v30 = vsel %vm567_vm1, %v1334_v52, %v7105_v21  ;;  %v6761_v20 = vpack.c.bf16 %v2202_v18, %v2200_v17  ;;  %v2199_v21 = vld [vmem:[%s8938_s10 + $0x80] sm:$0xff]  ;;  %v2433_v17 = vld [vmem:[%s8940_s12 + $0xa8] sm:$0xff] }
 0x7ad   :  { %v7109_v19 = vpop.permute.xlu1 %7108 }
 0x7ae   :  { %v7111_v22 = vunpack.i.h.bf16 %v7109_v19  ;;  %v7110_v23 = vunpack.i.l.bf16 %v7109_v19  ;;  %v6759_v19 = vpack.c.bf16 %v2197_v16, %v2195_v15  ;;  %v2432_v16 = vld [vmem:[%s8940_s12 + $0xa0] sm:$0xff] }
 0x7af   :  { %v6785_v18 = vpack.c.bf16 %v2433_v17, %v2432_v16 }
 0x7b0   :  { %v1876_v32 = vsel %vm1875_vm3, %v1873_v30, %v7110_v23  ;;  %v1877_v31 = vsel %vm1875_vm3, %v1874_v26, %v7111_v22  ;;  %v2201_v22 = vld [vmem:[%s8938_s10 + $0x90] sm:$0xff]  ;;  %v2204_v23 = vld [vmem:[%s8938_s10 + $0xa8] sm:$0xff] }
 0x7b1   :  { %v7114_v24 = vpop.permute.xlu0 %7113  ;;  %v6763_v26 = vpack.c.bf16 %v2201_v22, %v2199_v21  ;;  %v2205_v30 = vld [vmem:[%s8938_s10 + $0xb0] sm:$0xff] }
 0x7b2   :  { %v7116_v27 = vunpack.i.h.bf16 %v7114_v24  ;;  %v7115_v28 = vunpack.i.l.bf16 %v7114_v24  ;;  %v2206_v24 = vld [vmem:[%s8938_s10 + $0xb8] sm:$0xff]  ;;  %v2434_v22 = vld [vmem:[%s8940_s12 + $0xb0] sm:$0xff] }
 0x7b4   :  { %v1879_v34 = vsel %vm1878_vm4, %v1876_v32, %v7115_v28  ;;  %v1880_v35 = vsel %vm1878_vm4, %v1877_v31, %v7116_v27  ;;  %v6765_v27 = vpack.c.bf16 %v2206_v24, %v2204_v23  ;;  %v2203_v28 = vld [vmem:[%s8938_s10 + $0xa0] sm:$0xff]  ;;  %v2208_v32 = vld [vmem:[%s8938_s10 + $0xc8] sm:$0xff]  ;;  %v2210_v31 = vld [vmem:[%s8938_s10 + $0xd8] sm:$0xff] }
 0x7b5   :  { %6117 = vmatprep.mubr.f32.mxu1 %v1879_v34  ;;  %v6767_v34 = vpack.c.bf16 %v2205_v30, %v2203_v28  ;;  %v2435_v23 = vld [vmem:[%s8940_s12 + $0xb8] sm:$0xff]  ;;  %v2436_v30 = vld [vmem:[%s8940_s12 + $0xc0] sm:$0xff] }
 0x7b6   :  { %6118 = vmatmul.mubr.f32.vlgmr.msra.gmra.mrb[20].mxu1 %v1880_v35  ;;  %v6769_v35 = vpack.c.bf16 %v2210_v31, %v2208_v32  ;;  %v6789_v24 = vpack.c.bf16 %v2435_v23, %v2434_v22  ;;  %v2437_v32 = vld [vmem:[%s8940_s12 + $0xc8] sm:$0xff] }
 0x7b7   :  { %6730 = vmatpush3.bf16.msra.mxu1 %v7274_v1  ;;  %v6793_v31 = vpack.c.bf16 %v2437_v32, %v2436_v30 }
 0x7b8   :  { %6731 = vmatprep.subr.bf16.mxu1 %v7274_v1 }
 0x7bb   :  { %6732 = vmatpush3.bf16.msra.mxu1 %v7274_v1 }
 0x7bc   :  { %6733 = vmatprep.subr.bf16.mxu1 %v7274_v1 }
 0x7bf   :  { %6734 = vmatpush3.bf16.msra.mxu1 %v7274_v1 }
 0x7c0   :  { %6735 = vmatprep.subr.bf16.mxu1 %v7274_v1 }
 0x7c3   :  { %6736 = vmatpush3.bf16.msra.mxu1 %v7274_v1 }
 0x7c4   :  { %6737 = vmatprep.subr.bf16.mxu1 %v7274_v1 }
 0x7c7   :  { %6738 = vmatpush3.bf16.msra.mxu1 %v7274_v1 }
 0x7c8   :  { %6739 = vmatprep.subr.bf16.mxu1 %v7274_v1 }
 0x7cb   :  { %6740 = vmatpush3.bf16.msra.mxu1 %v7274_v1 }
 0x7cc   :  { %6741 = vmatprep.subr.bf16.mxu1 %v7274_v1 }
 0x7cf   :  { %6742 = vmatpush3.bf16.msra.mxu1 %v7274_v1 }
 0x7d0   :  { %6743 = vmatprep.subr.bf16.mxu1 %v7274_v1 }
 0x7d3   :  { %6744 = vmatpush3.bf16.msra.mxu1 %v7274_v1 }
 0x889   :  { %v6119_v37 = vpop.f32.mrb[20].mxu1 }
 0x88a   :  { %v1976_v38 = vadd.f32 %v6119_v37, %v5316_v36  ;;  %v1970_v39 = vpop.f32.mrb[21].mxu1 }
 0x88b   :  { %v1971_v41 = vadd.f32 %v5316_v36, %v1970_v39 }
 0x88c   :  { %v1980_v45 = vadd.f32 %v1976_v38, %v7591_v43 }
 0x88d   :  { %v1979_v42 = vadd.f32 %v1971_v41, %v7585_v40 }
 0x88f   :  { %6152 = vmatprep.mubr.f32.mxu0 %v1979_v42 }
 0x890   :  { %6153 = vmatmul.mubr.f32.vlgmr.msra.gmra.mrb[22].mxu0 %v1980_v45 }
 0x891   :  { %2291 = vmatprep.mubr.f32.mxu0 %v7276_v33  ;;  %6748 = vmatpush1.bf16.msra.mxu0 %v6747_v61  ;;  %v5318_v61 = vld [vmem:[%s8937_s9] ss:$0 sm:$0xff] }
 0x892   :  { %6750 = vmatprep.subr.bf16.mxu0 %v6749_v62 }
 0x895   :  { %6752 = vmatpush1.bf16.msra.mxu0 %v6751_v11  ;;  %v2412_v11 = vld [vmem:[%s8940_s12] sm:$0xff] }
 0x896   :  { %6754 = vmatprep.subr.bf16.mxu0 %v6753_v8  ;;  %v2413_v8 = vld [vmem:[%s8940_s12 + $0x8] sm:$0xff] }
 0x897   :  { %v6779_v5 = vpack.c.bf16 %v2413_v8, %v2412_v11 }
 0x899   :  { %6756 = vmatpush1.bf16.msra.mxu0 %v6755_v13  ;;  %v2414_v13 = vld [vmem:[%s8940_s12 + $0x10] sm:$0xff] }
 0x89a   :  { %6758 = vmatprep.subr.bf16.mxu0 %v6757_v14  ;;  %v2415_v14 = vld [vmem:[%s8940_s12 + $0x18] sm:$0xff] }
 0x89b   :  { %v6783_v15 = vpack.c.bf16 %v2415_v14, %v2414_v13 }
 0x89d   :  { %6760 = vmatpush1.bf16.msra.mxu0 %v6759_v19  ;;  %v2416_v19 = vld [vmem:[%s8940_s12 + $0x20] sm:$0xff] }
 0x89e   :  { %6762 = vmatprep.subr.bf16.mxu0 %v6761_v20  ;;  %v2417_v20 = vld [vmem:[%s8940_s12 + $0x28] sm:$0xff] }
 0x89f   :  { %v6787_v21 = vpack.c.bf16 %v2417_v20, %v2416_v19 }
 0x8a1   :  { %6764 = vmatpush1.bf16.msra.mxu0 %v6763_v26  ;;  %v2418_v26 = vld [vmem:[%s8940_s12 + $0x30] sm:$0xff] }
 0x8a2   :  { %6766 = vmatprep.subr.bf16.mxu0 %v6765_v27  ;;  %v2419_v27 = vld [vmem:[%s8940_s12 + $0x38] sm:$0xff] }
 0x8a3   :  { %v6791_v28 = vpack.c.bf16 %v2419_v27, %v2418_v26 }
 0x8a5   :  { %6768 = vmatpush1.bf16.msra.mxu0 %v6767_v34  ;;  %v2420_v34 = vld [vmem:[%s8940_s12 + $0x40] sm:$0xff] }
 0x8a6   :  { %6770 = vmatprep.subr.bf16.mxu0 %v6769_v35  ;;  %v2421_v35 = vld [vmem:[%s8940_s12 + $0x48] sm:$0xff] }
 0x963   :  { %v6154_v9 = vpop.f32.mrb[22].mxu0 }
 0x964   :  { %v2059_v47 = vmul.f32 0.0078125, %v6154_v9  ;;  %v2049_v48 = vpop.f32.mrb[23].mxu0 }
 0x965   :  { %v2058_v49 = vmul.f32 0.0078125, %v2049_v48  ;;  %v2209_v48 = vld [vmem:[%s8938_s10 + $0xd0] sm:$0xff] }
 0x966   :  { %2067 = vperm.xlu0 %7100, %v2059_v47   ;;  %v2207_v47 = vld [vmem:[%s8938_s10 + $0xc0] sm:$0xff] }
 0x967   :  { %2062 = vperm.xlu1 %7101, %v2058_v49   ;;  %v6771_v49 = vpack.c.bf16 %v2209_v48, %v2207_v47  ;;  %v2441_v47 = vld [vmem:[%s8940_s12 + $0xe8] sm:$0xff] }
 0x969   :  { %6772 = vmatpush1.bf16.msra.mxu0 %v6771_v49  ;;  %v2424_v49 = vld [vmem:[%s8940_s12 + $0x60] sm:$0xff] }
 0x9e5   :  { %v2068_v50 = vpop.permute.xlu0 %2067 }
 0x9e6   :  { %v7847_v51 = vsub.f32 %v1980_v45, %v2068_v50  ;;  %v2063_v52 = vpop.permute.xlu1 %2062  ;;  %v2212_v50 = vld [vmem:[%s8938_s10 + $0xe8] sm:$0xff] }
 0x9e7   :  { %v7849_v53 = vsub.f32 %v1979_v42, %v2063_v52  ;;  %v2214_v52 = vld [vmem:[%s8938_s10 + $0xf8] sm:$0xff] }
 0x9e8   :  { %v2073_v43 = vmul.f32 %v7847_v51, %v7847_v51 }
 0x9e9   :  { %v2072_v40 = vmul.f32 %v7849_v53, %v7849_v53 }
 0x9eb   :  { %6187 = vmatprep.mubr.f32.mxu1 %v2072_v40  ;;  %v6773_v40 = vpack.c.bf16 %v2214_v52, %v2212_v50  ;;  %v2425_v50 = vld [vmem:[%s8940_s12 + $0x68] sm:$0xff] }
 0x9ec   :  { %6188 = vmatmul.mubr.f32.vlgmr.msra.gmra.mrb[22].mxu1 %v2073_v43  ;;  %v2211_v43 = vld [vmem:[%s8938_s10 + $0xe0] sm:$0xff]  ;;  %v6803_v52 = vpack.c.bf16 %v2425_v50, %v2424_v49 }
 0x9ed   :  { %v6775_v55 = vpack.c.bf16 %v2213_v54, %v2211_v43  ;;  %6774 = vmatprep.subr.bf16.mxu0 %v6773_v40  ;;  %v2442_v40 = vld [vmem:[%s8940_s12 + $0xf0] sm:$0xff]  ;;  %v2443_v43 = vld [vmem:[%s8940_s12 + $0xf8] sm:$0xff] }
 0x9ee   :  { %v2426_v54 = vld [vmem:[%s8940_s12 + $0x70] sm:$0xff] }
 0x9ef   :  { %6776 = vmatpush1.bf16.msra.mxu0 %v6775_v55  ;;  %v6805_v55 = vpack.c.bf16 %v2443_v43, %v2442_v40 }
 0x9f0   :  { %6809 = vmatprep.subr.bf16.mxu0 %v7274_v1 }
 0xabf   :  { %v6189_v36 = vpop.f32.mrb[22].mxu1 }
 0xac0   :  { %v2150_v37 = vmul.f32 0.0078125, %v6189_v36  ;;  %v2140_v38 = vpop.f32.mrb[23].mxu1  ;;  %v6795_v36 = vpack.c.bf16 %v2421_v35, %v2420_v34 }
 0xac1   :  { %v2149_v39 = vmul.f32 0.0078125, %v2140_v38  ;;  %v2439_v38 = vld [vmem:[%s8940_s12 + $0xd8] sm:$0xff] }
 0xac2   :  { %v2152_v41 = vadd.f32 1e-12, %v2150_v37  ;;  %v2438_v37 = vld [vmem:[%s8940_s12 + $0xd0] sm:$0xff] }
 0xac3   :  { %v2151_v42 = vadd.f32 1e-12, %v2149_v39  ;;  %v6797_v39 = vpack.c.bf16 %v2439_v38, %v2438_v37 }
 0xac4   :  { %7168 = vrsqrt.f32 %v2152_v41  ;;  %v2422_v41 = vld [vmem:[%s8940_s12 + $0x50] sm:$0xff] }
 0xac5   :  { %7170 = vrsqrt.f32 %v2151_v42  ;;  %v2423_v42 = vld [vmem:[%s8940_s12 + $0x58] sm:$0xff] }
 0xace   :  { %v7169_v45 = vpop.eup %7168 }
 0xacf   :  { %v7171_v9 = vpop.eup %7170  ;;  %2162 = vperm.xlu0 %7100, %v7169_v45   ;;  %v6799_v45 = vpack.c.bf16 %v2423_v42, %v2422_v41 }
 0xad0   :  { %2157 = vperm.xlu1 %7101, %v7171_v9   ;;  %v2440_v9 = vld [vmem:[%s8940_s12 + $0xe0] sm:$0xff] }
 0xad1   :  { %v6801_v48 = vpack.c.bf16 %v2441_v47, %v2440_v9 }
 0xb4e   :  { %v2163_v56 = vpop.permute.xlu0 %2162 }
 0xb4f   :  { %v2158_v58 = vpop.permute.xlu1 %2157  ;;  %v2166_v59 = vmul.f32 %v2163_v56, %v7847_v51  ;;  %v2428_v51 = vld [vmem:[%s8940_s12 + $0x80] sm:$0xff]  ;;  %v2427_v56 = vld [vmem:[%s8940_s12 + $0x78] sm:$0xff] }
 0xb50   :  { %v2165_v60 = vmul.f32 %v2158_v58, %v7849_v53  ;;  %v2429_v53 = vld [vmem:[%s8940_s12 + $0x88] sm:$0xff]  ;;  %v2215_v58 = vld [vmem:[%s8939_s11] sm:$0x3] }
 0xb51   :  { %v2174_v63 = vmul.f32 %v5317_v57, %v2166_v59  ;;  %v6777_v4 = vpack.c.bf16 %v2429_v53, %v2428_v51  ;;  %v2220_v59 = vrot.slane %v2215_v58, %v7602_v44 }
 0xb52   :  { %v2173_v62 = vmul.f32 %v5317_v57, %v2165_v60  ;;  %v6807_v57 = vpack.c.bf16 %v2427_v56, %v2426_v54  ;;  %v2224_v60 = vrot.slane %v2215_v58, %v7608_v46 }
 0xb53   :  { %v7965_v3 = vadd.f32 %v5318_v61, %v2174_v63  ;;  %6778 = vmatprep.subr.bf16.mxu1 %v6777_v4 }
 0xb54   :  { %v7960_v0 = vadd.f32 %v5318_v61, %v2173_v62  ;;  %6780 = vmatpush3.bf16.msra.mxu1 %v6779_v5 }
 0xb55   :  { %6782 = vmatprep.subr.bf16.mxu1 %v6781_v10 }
 0xb56   :  { %2292 = vmatmul.mubr.f32.vlgmr.msra.gmra.mrb[24].mxu0 %v7960_v0 }
 0xb57   :  { %2297 = vmatprep.mubr.f32.mxu0 %v7276_v33  ;;  %6810 = vmatpush3.bf16.msra.mxu0 %v7274_v1 }
 0xb58   :  { %6811 = vmatprep.subr.bf16.mxu0 %v7274_v1  ;;  %6784 = vmatpush3.bf16.msra.mxu1 %v6783_v15 }
 0xb59   :  { %6786 = vmatprep.subr.bf16.mxu1 %v6785_v18 }
 0xb5a   :  { %2298 = vmatmul.mubr.f32.gmra.mrb[26].mxu0 %v7965_v3 }
 0xb5b   :  { %6812 = vmatpush3.bf16.msra.mxu0 %v7274_v1 }
 0xb5c   :  { %6813 = vmatprep.subr.bf16.mxu0 %v7274_v1  ;;  %6788 = vmatpush3.bf16.msra.mxu1 %v6787_v21 }
 0xb5d   :  { %6790 = vmatprep.subr.bf16.mxu1 %v6789_v24 }
 0xb5f   :  { %6814 = vmatpush3.bf16.msra.mxu0 %v7274_v1 }
 0xb60   :  { %6815 = vmatprep.subr.bf16.mxu0 %v7274_v1  ;;  %6792 = vmatpush3.bf16.msra.mxu1 %v6791_v28 }
 0xb61   :  { %6794 = vmatprep.subr.bf16.mxu1 %v6793_v31 }
 0xb63   :  { %6816 = vmatpush3.bf16.msra.mxu0 %v7274_v1 }
 0xb64   :  { %6817 = vmatprep.subr.bf16.mxu0 %v7274_v1  ;;  %6796 = vmatpush3.bf16.msra.mxu1 %v6795_v36 }
 0xb65   :  { %6798 = vmatprep.subr.bf16.mxu1 %v6797_v39 }
 0xb67   :  { %6818 = vmatpush3.bf16.msra.mxu0 %v7274_v1 }
 0xb68   :  { %6819 = vmatprep.subr.bf16.mxu0 %v7274_v1  ;;  %6800 = vmatpush3.bf16.msra.mxu1 %v6799_v45 }
 0xb69   :  { %6802 = vmatprep.subr.bf16.mxu1 %v6801_v48 }
 0xb6b   :  { %6820 = vmatpush3.bf16.msra.mxu0 %v7274_v1 }
 0xb6c   :  { %6821 = vmatprep.subr.bf16.mxu0 %v7274_v1  ;;  %6804 = vmatpush3.bf16.msra.mxu1 %v6803_v52 }
 0xb6d   :  { %6806 = vmatprep.subr.bf16.mxu1 %v6805_v55 }
 0xb6f   :  { %6822 = vmatpush3.bf16.msra.mxu0 %v7274_v1 }
 0xb70   :  { %6823 = vmatprep.subr.bf16.mxu0 %v7274_v1  ;;  %6808 = vmatpush3.bf16.msra.mxu1 %v6807_v57 }
 0xb71   :  { %6825 = vmatprep.subr.bf16.mxu1 %v7274_v1 }
 0xb73   :  { %6824 = vmatpush3.bf16.msra.mxu0 %v7274_v1 }
 0xc29   :  { %v2293_v61 = vpop.f32.mrb[24].mxu0 }
 0xc2a   :  { %v8084_v62 = vadd.f32 %v2293_v61, %v2220_v59  ;;  %v2295_v63 = vpop.f32.mrb[25].mxu0 }
 0xc2b   :  { %v8086_v51 = vadd.f32 %v2295_v63, %v2224_v60 }
 0xc2c   :  { %v8089_v53 = vmul.f32 0.70710677, %v8084_v62 }
 0xc2d   :  { %v8092_v4 = vmul.f32 0.70710677, %v8086_v51  ;;  %v2299_v11 = vpop.f32.mrb[26].mxu0 }
 0xc2e   :  { %v2320_v8 = vand.u32 2147483647, %v8089_v53  ;;  %v8095_v5 = vadd.f32 %v2299_v11, %v2220_v59  ;;  %v2301_v6 = vpop.f32.mrb[27].mxu0  ;;  %vm2312_vm5 = vcmp.ge.f32.partialorder %v8089_v53, 0.0 }
 0xc2f   :  { %v2321_v7 = vand.u32 2147483647, %v8092_v4  ;;  %v8098_v10 = vadd.f32 %v2301_v6, %v2224_v60  ;;  %vm2313_vm6 = vcmp.ge.f32.partialorder %v8092_v4, 0.0 }
 0xc30   :  { %v2324_v13 = vmul.f32 0.3275911, %v2320_v8  ;;  %v8101_v15 = vmul.f32 0.70710677, %v8095_v5  ;;  %v2376_v24 = vsub.f32 0.0, %v2320_v8 }
 0xc31   :  { %v2325_v14 = vmul.f32 0.3275911, %v2321_v7  ;;  %v8104_v17 = vmul.f32 0.70710677, %v8098_v10  ;;  %v2377_v27 = vsub.f32 0.0, %v2321_v7 }
 0xc32   :  { %v2328_v16 = vadd.f32 1.0, %v2324_v13  ;;  %v2322_v19 = vand.u32 2147483647, %v8101_v15  ;;  %v2380_v30 = vmul.f32 %v2376_v24, %v2320_v8  ;;  %vm2314_vm7 = vcmp.ge.f32.partialorder %v8101_v15, 0.0 }
 0xc33   :  { %v2329_v18 = vadd.f32 1.0, %v2325_v14  ;;  %v2323_v21 = vand.u32 2147483647, %v8104_v17  ;;  %v2381_v34 = vmul.f32 %v2377_v27, %v2321_v7  ;;  %vm2315_vm8 = vcmp.ge.f32.partialorder %v8104_v17, 0.0 }
 0xc34   :  { %7172 = vrcp.f32 %v2328_v16  ;;  %v2326_v20 = vmul.f32 0.3275911, %v2322_v19  ;;  %v2378_v35 = vsub.f32 0.0, %v2322_v19  ;;  %v2384_v38 = vmul.f32 1.442695, %v2380_v30 }
 0xc35   :  { %7174 = vrcp.f32 %v2329_v18  ;;  %v2327_v23 = vmul.f32 0.3275911, %v2323_v21  ;;  %v2379_v39 = vsub.f32 0.0, %v2323_v21  ;;  %v2386_v9 = vmul.f32 1.442695, %v2381_v34 }
 0xc36   :  { %v2330_v22 = vadd.f32 1.0, %v2326_v20  ;;  %v2382_v47 = vmul.f32 %v2378_v35, %v2322_v19  ;;  %v2306_v17 = vmul.f32 0.5, %v8095_v5 }
 0xc37   :  { %v2331_v26 = vadd.f32 1.0, %v2327_v23  ;;  %v2383_v40 = vmul.f32 %v2379_v39, %v2323_v21 }
 0xc38   :  { %7176 = vrcp.f32 %v2330_v22  ;;  %v2388_v56 = vmul.f32 1.442695, %v2382_v47 }
 0xc39   :  { %7178 = vrcp.f32 %v2331_v26  ;;  %v2390_v63 = vmul.f32 1.442695, %v2383_v40  ;;  %v2305_v40 = vmul.f32 0.5, %v8086_v51  ;;  %v2307_v51 = vmul.f32 0.5, %v8098_v10  ;;  %v5319_v10 = vld [vmem:[%s8941_s13] ss:$0 sm:$0xff] }
 0xc3a   :  { %7180 = vpow2.f32 %v2384_v38  ;;  %v7282_v38 = vmov -1.0  }
 0xc3b   :  { %7182 = vpow2.f32 %v2386_v9  ;;  %v2316_v39 = vsel %vm2312_vm5, 1.0, %v7282_v38 }
 0xc3c   :  { %7184 = vpow2.f32 %v2388_v56 }
 0xc3d   :  { %7186 = vpow2.f32 %v2390_v63 }
 0xc3e   :  { %v7173_v28 = vpop.eup %7172 }
 0xc3f   :  { %v7175_v32 = vpop.eup %7174  ;;  %v2340_v31 = vmul.f32 1.0614054, %v7173_v28 }
 0xc40   :  { %v2341_v36 = vmul.f32 1.0614054, %v7175_v32 }
 0xc41   :  { %v2344_v37 = vadd.f32 -1.4531521, %v2340_v31 }
 0xc42   :  { %v2345_v41 = vadd.f32 -1.4531521, %v2341_v36  ;;  %v7177_v42 = vpop.eup %7176 }
 0xc43   :  { %v2348_v45 = vmul.f32 %v7173_v28, %v2344_v37  ;;  %v2342_v49 = vmul.f32 1.0614054, %v7177_v42  ;;  %v7179_v52 = vpop.eup %7178 }
 0xc44   :  { %v2349_v48 = vmul.f32 %v7175_v32, %v2345_v41  ;;  %v2343_v57 = vmul.f32 1.0614054, %v7179_v52  ;;  %v7181_v23 = vpop.eup %7180 }
 0xc45   :  { %v2352_v50 = vadd.f32 1.4214138, %v2348_v45  ;;  %v2346_v54 = vadd.f32 -1.4531521, %v2342_v49  ;;  %v7183_v27 = vpop.eup %7182 }
 0xc46   :  { %v2353_v43 = vadd.f32 1.4214138, %v2349_v48  ;;  %v2347_v61 = vadd.f32 -1.4531521, %v2343_v57  ;;  %v7185_v45 = vpop.eup %7184 }
 0xc47   :  { %v2356_v55 = vmul.f32 %v7173_v28, %v2352_v50  ;;  %v2350_v59 = vmul.f32 %v7177_v42, %v2346_v54  ;;  %v7187_v50 = vpop.eup %7186 }
 0xc48   :  { %v2357_v58 = vmul.f32 %v7175_v32, %v2353_v43  ;;  %v2351_v7 = vmul.f32 %v7179_v52, %v2347_v61 }
 0xc49   :  { %v2360_v60 = vadd.f32 -0.28449672, %v2356_v55  ;;  %v2354_v8 = vadd.f32 1.4214138, %v2350_v59  ;;  %v2304_v55 = vmul.f32 0.5, %v8084_v62 }
 0xc4a   :  { %v2361_v11 = vadd.f32 -0.28449672, %v2357_v58  ;;  %v2355_v18 = vadd.f32 1.4214138, %v2351_v7 }
 0xc4b   :  { %v2364_v6 = vmul.f32 %v7173_v28, %v2360_v60  ;;  %v2358_v14 = vmul.f32 %v7177_v42, %v2354_v8  ;;  %v2319_v60 = vsel %vm2315_vm8, 1.0, %v7282_v38 }
 0xc4c   :  { %v2365_v13 = vmul.f32 %v7175_v32, %v2361_v11  ;;  %v2359_v22 = vmul.f32 %v7179_v52, %v2355_v18 }
 0xc4d   :  { %v2368_v16 = vadd.f32 0.2548296, %v2364_v6  ;;  %v2362_v20 = vadd.f32 -0.28449672, %v2358_v14 }
 0xc4e   :  { %v2369_v19 = vadd.f32 0.2548296, %v2365_v13  ;;  %v2363_v31 = vadd.f32 -0.28449672, %v2359_v22 }
 0xc4f   :  { %v2372_v21 = vmul.f32 %v7173_v28, %v2368_v16  ;;  %v2366_v26 = vmul.f32 %v7177_v42, %v2362_v20 }
 0xc50   :  { %v2373_v24 = vmul.f32 %v7175_v32, %v2369_v19  ;;  %v2367_v37 = vmul.f32 %v7179_v52, %v2363_v31  ;;  %v2317_v32 = vsel %vm2313_vm6, 1.0, %v7282_v38 }
 0xc51   :  { %v2392_v30 = vmul.f32 %v7181_v23, %v2372_v21  ;;  %v2370_v35 = vadd.f32 0.2548296, %v2366_v26 }
 0xc52   :  { %v2393_v34 = vmul.f32 %v7183_v27, %v2373_v24  ;;  %v2371_v47 = vadd.f32 0.2548296, %v2367_v37 }
 0xc53   :  { %v2396_v36 = vsub.f32 1.0, %v2392_v30  ;;  %v2374_v28 = vmul.f32 %v7177_v42, %v2370_v35  ;;  %v2318_v42 = vsel %vm2314_vm7, 1.0, %v7282_v38  ;;  %v5326_v35 = vld [vmem:[%s8932_s4 + $0x1a0] sm:$0xff] }
 0xc54   :  { %v2397_v41 = vsub.f32 1.0, %v2393_v34  ;;  %v2375_v4 = vmul.f32 %v7179_v52, %v2371_v47  ;;  %v5323_v34 = vld [vmem:[%s8932_s4 + $0x188] sm:$0xff]  ;;  %v5332_v47 = vld [vmem:[%s8932_s4 + $0x1d0] sm:$0xff] }
 0xc55   :  { %v2400_v9 = vmul.f32 %v2396_v36, %v2316_v39  ;;  %v2394_v48 = vmul.f32 %v7185_v45, %v2374_v28  ;;  %v5322_v36 = vld [vmem:[%s8932_s4 + $0x180] sm:$0xff]  ;;  %v6841_v37 = vpack.c.bf16 %v5326_v35, %v5323_v34  ;;  %v5325_v39 = vld [vmem:[%s8932_s4 + $0x198] sm:$0xff]  ;;  %v5327_v28 = vld [vmem:[%s8932_s4 + $0x1a8] sm:$0xff] }
 0xc56   :  { %v2401_v53 = vmul.f32 %v2397_v41, %v2317_v32  ;;  %v2395_v56 = vmul.f32 %v7187_v50, %v2375_v4  ;;  %v5324_v41 = vld [vmem:[%s8932_s4 + $0x190] sm:$0xff]  ;;  %v6843_v45 = vpack.c.bf16 %v5325_v39, %v5322_v36  ;;  %v5329_v32 = vld [vmem:[%s8932_s4 + $0x1b8] sm:$0xff]  ;;  %v5330_v4 = vld [vmem:[%s8932_s4 + $0x1c0] sm:$0xff] }
 0xc57   :  { %v2404_v49 = vadd.f32 1.0, %v2400_v9  ;;  %v2398_v54 = vsub.f32 1.0, %v2394_v48  ;;  %v6873_v9 = vpack.c.bf16 %v5327_v28, %v5324_v41  ;;  %6842 = vmatprep.subr.bf16.mxu0 %v6841_v37  ;;  %v6845_v48 = vpack.c.bf16 %v5332_v47, %v5329_v32  ;;  %v5333_v50 = vld [vmem:[%s8932_s4 + $0x1d8] sm:$0xff]  ;;  %v5359_v34 = vld [vmem:[%s8932_s4 + $0x2a8] sm:$0xff]  ;;  %v5362_v35 = vld [vmem:[%s8932_s4 + $0x2c0] sm:$0xff] }
 0xc58   :  { %v2405_v43 = vadd.f32 1.0, %v2401_v53  ;;  %v2399_v15 = vsub.f32 1.0, %v2395_v56  ;;  %v5328_v53 = vld [vmem:[%s8932_s4 + $0x1b0] sm:$0xff]  ;;  %v6865_v37 = vpack.c.bf16 %v5362_v35, %v5359_v34  ;;  %v5358_v47 = vld [vmem:[%s8932_s4 + $0x2a0] sm:$0xff] }
 0xc59   :  { %v2402_v58 = vmul.f32 %v2398_v54, %v2318_v42  ;;  %v2408_v59 = vmul.f32 %v2404_v49, %v2304_v55  ;;  %v5331_v49 = vld [vmem:[%s8932_s4 + $0x1c8] sm:$0xff]  ;;  %v5338_v55 = vld [vmem:[%s8932_s4 + $0x200] sm:$0xff] }
 0xc5a   :  { %v2409_v57 = vmul.f32 %v2405_v43, %v2305_v40  ;;  %v2403_v52 = vmul.f32 %v2399_v15, %v2319_v60  ;;  %v6847_v40 = vpack.c.bf16 %v5331_v49, %v5328_v53  ;;  %v6877_v43 = vpack.c.bf16 %v5333_v50, %v5330_v4  ;;  %v5335_v54 = vld [vmem:[%s8932_s4 + $0x1e8] sm:$0xff]  ;;  %v5334_v42 = vld [vmem:[%s8932_s4 + $0x1e0] sm:$0xff]  ;;  %v5341_v60 = vld [vmem:[%s8932_s4 + $0x218] sm:$0xff] }
 0xc5b   :  { %v2406_v61 = vadd.f32 1.0, %v2402_v58  ;;  %v6849_v56 = vpack.c.bf16 %v5338_v55, %v5335_v54  ;;  %v5336_v58 = vld [vmem:[%s8932_s4 + $0x1f0] sm:$0xff]  ;;  %v5361_v53 = vld [vmem:[%s8932_s4 + $0x2b8] sm:$0xff]  ;;  %v5363_v4 = vld [vmem:[%s8932_s4 + $0x2c8] sm:$0xff] }
 0xc5c   :  { %2515 = vmatprep.mubr.f32.mxu1 %v2409_v57  ;;  %v2407_v62 = vadd.f32 1.0, %v2403_v52  ;;  %v5337_v57 = vld [vmem:[%s8932_s4 + $0x1f8] sm:$0xff]  ;;  %v5344_v52 = vld [vmem:[%s8932_s4 + $0x230] sm:$0xff]  ;;  %v6867_v49 = vpack.c.bf16 %v5361_v53, %v5358_v47 }
 0xc5d   :  { %2516 = vmatmul.mubr.f32.vlgmr.msra.gmra.mrb[24].mxu1 %v2408_v59  ;;  %v2410_v11 = vmul.f32 %v2406_v61, %v2306_v17  ;;  %v5339_v59 = vld [vmem:[%s8932_s4 + $0x208] sm:$0xff]  ;;  %v5342_v61 = vld [vmem:[%s8932_s4 + $0x220] sm:$0xff]  ;;  %v6853_v17 = vpack.c.bf16 %v5344_v52, %v5341_v60  ;;  %v5365_v54 = vld [vmem:[%s8932_s4 + $0x2d8] sm:$0xff] }
 0xc5e   :  { %6826 = vmatpush3.bf16.msra.mxu1 %v7274_v1  ;;  %v2411_v63 = vmul.f32 %v2407_v62, %v2307_v51  ;;  %v6881_v15 = vpack.c.bf16 %v5339_v59, %v5336_v58  ;;  %v5345_v51 = vld [vmem:[%s8932_s4 + $0x238] sm:$0xff]  ;;  %v6851_v62 = vpack.c.bf16 %v5337_v57, %v5334_v42  ;;  %v5368_v55 = vld [vmem:[%s8932_s4 + $0x2f0] sm:$0xff]  ;;  %v5367_v57 = vld [vmem:[%s8932_s4 + $0x2e8] sm:$0xff] }
 0xc5f   :  { %6827 = vmatprep.subr.bf16.mxu1 %v7274_v1  ;;  %v6869_v42 = vpack.c.bf16 %v5368_v55, %v5365_v54  ;;  %v5366_v58 = vld [vmem:[%s8932_s4 + $0x2e0] sm:$0xff] }
 0xc60   :  { %2520 = vmatprep.mubr.f32.mxu1 %v2411_v63  ;;  %v5340_v63 = vld [vmem:[%s8932_s4 + $0x210] sm:$0xff]  ;;  %v5320_v52 = vld [vmem:[%s8942_s14] ss:$0 sm:$0xff] }
 0xc61   :  { %2521 = vmatmul.mubr.f32.gmra.mrb[26].mxu1 %v2410_v11  ;;  %v5343_v11 = vld [vmem:[%s8932_s4 + $0x228] sm:$0xff] }
 0xc62   :  { %6828 = vmatpush3.bf16.msra.mxu1 %v7274_v1 }
 0xc63   :  { %6829 = vmatprep.subr.bf16.mxu1 %v7274_v1 }
 0xc66   :  { %6830 = vmatpush3.bf16.msra.mxu1 %v7274_v1 }
 0xc67   :  { %6831 = vmatprep.subr.bf16.mxu1 %v7274_v1 }
 0xc6a   :  { %6832 = vmatpush3.bf16.msra.mxu1 %v7274_v1 }
 0xc6b   :  { %6833 = vmatprep.subr.bf16.mxu1 %v7274_v1 }
 0xc6e   :  { %6834 = vmatpush3.bf16.msra.mxu1 %v7274_v1 }
 0xc6f   :  { %6835 = vmatprep.subr.bf16.mxu1 %v7274_v1 }
 0xc72   :  { %6836 = vmatpush3.bf16.msra.mxu1 %v7274_v1 }
 0xc73   :  { %6837 = vmatprep.subr.bf16.mxu1 %v7274_v1 }
 0xc76   :  { %6838 = vmatpush3.bf16.msra.mxu1 %v7274_v1 }
 0xc77   :  { %6839 = vmatprep.subr.bf16.mxu1 %v7274_v1 }
 0xc7a   :  { %6840 = vmatpush3.bf16.msra.mxu1 %v7274_v1 }
 0xc7b   :  { %6874 = vmatprep.subr.bf16.mxu1 %v6873_v9 }
 0xd30   :  { %v5663_v5 = vpop.f32.mrb[24].mxu1 }
 0xd31   :  { %v5664_v8 = vpop.f32.mrb[25].mxu1 }
 0xd32   :  { %v5665_v6 = vadd.f32 %v5664_v8, %v5663_v5  ;;  %v6885_v5 = vpack.c.bf16 %v5345_v51, %v5342_v61  ;;  %v5350_v8 = vld [vmem:[%s8932_s4 + $0x260] sm:$0xff] }
 0xd34   :  { %v2518_v7 = vadd.f32 %v5665_v6, %v5319_v10  ;;  %v5666_v14 = vpop.f32.mrb[26].mxu1  ;;  %v5348_v6 = vld [vmem:[%s8932_s4 + $0x250] sm:$0xff] }
 0xd35   :  { %v5667_v16 = vpop.f32.mrb[27].mxu1 }
 0xd36   :  { %v2526_v13 = vadd.f32 %v2518_v7, %v7960_v0  ;;  %v5668_v18 = vadd.f32 %v5667_v16, %v5666_v14  ;;  %v5351_v7 = vld [vmem:[%s8932_s4 + $0x268] sm:$0xff]  ;;  %v5346_v16 = vld [vmem:[%s8932_s4 + $0x240] sm:$0xff] }
 0xd38   :  { %6222 = vmatprep.mubr.f32.mxu0 %v2526_v13  ;;  %v2523_v19 = vadd.f32 %v5668_v18, %v5319_v10  ;;  %v5347_v10 = vld [vmem:[%s8932_s4 + $0x248] sm:$0xff]  ;;  %v5349_v18 = vld [vmem:[%s8932_s4 + $0x258] sm:$0xff] }
 0xd39   :  { %v6857_v14 = vpack.c.bf16 %v5350_v8, %v5347_v10 }
 0xd3a   :  { %v2527_v20 = vadd.f32 %v2523_v19, %v7965_v3  ;;  %v6889_v19 = vpack.c.bf16 %v5351_v7, %v5348_v6 }
 0xd3c   :  { %6223 = vmatmul.mubr.f32.vlgmr.msra.gmra.mrb[28].mxu0 %v2527_v20 }
 0xd3d   :  { %2863 = vmatprep.mubr.f32.mxu0 %v7276_v33  ;;  %6844 = vmatpush1.bf16.msra.mxu0 %v6843_v45 }
 0xd3e   :  { %6846 = vmatprep.subr.bf16.mxu0 %v6845_v48  ;;  %v5360_v48 = vld [vmem:[%s8932_s4 + $0x2b0] sm:$0xff] }
 0xd41   :  { %6848 = vmatpush1.bf16.msra.mxu0 %v6847_v40  ;;  %v6897_v40 = vpack.c.bf16 %v5363_v4, %v5360_v48 }
 0xd42   :  { %6850 = vmatprep.subr.bf16.mxu0 %v6849_v56  ;;  %v5364_v56 = vld [vmem:[%s8932_s4 + $0x2d0] sm:$0xff] }
 0xd43   :  { %v6871_v59 = vpack.c.bf16 %v5367_v57, %v5364_v56 }
 0xd45   :  { %6852 = vmatpush1.bf16.msra.mxu0 %v6851_v62 }
 0xd46   :  { %6854 = vmatprep.subr.bf16.mxu0 %v6853_v17  ;;  %v5321_v17 = vld [vmem:[%s8943_s15] ss:$0 sm:$0xff] }
 0xe0f   :  { %v6224_v21 = vpop.f32.mrb[28].mxu0 }
 0xe10   :  { %v2606_v22 = vmul.f32 0.0078125, %v6224_v21  ;;  %v2596_v23 = vpop.f32.mrb[29].mxu0  ;;  %v5356_v21 = vld [vmem:[%s8932_s4 + $0x290] sm:$0xff] }
 0xe11   :  { %v2605_v24 = vmul.f32 0.0078125, %v2596_v23  ;;  %v5357_v23 = vld [vmem:[%s8932_s4 + $0x298] sm:$0xff] }
 0xe12   :  { %2614 = vperm.xlu0 %7100, %v2606_v22   ;;  %v5354_v22 = vld [vmem:[%s8932_s4 + $0x280] sm:$0xff] }
 0xe13   :  { %2609 = vperm.xlu1 %7101, %v2605_v24   ;;  %v6859_v24 = vpack.c.bf16 %v5349_v18, %v5346_v16 }
 0xe91   :  { %v2615_v26 = vpop.permute.xlu0 %2614 }
 0xe92   :  { %v8141_v27 = vsub.f32 %v2527_v20, %v2615_v26  ;;  %v2610_v0 = vpop.permute.xlu1 %2609  ;;  %v5353_v20 = vld [vmem:[%s8932_s4 + $0x278] sm:$0xff] }
 0xe93   :  { %v8143_v30 = vsub.f32 %v2526_v13, %v2610_v0  ;;  %v6855_v13 = vpack.c.bf16 %v5343_v11, %v5340_v63  ;;  %v6861_v26 = vpack.c.bf16 %v5356_v21, %v5353_v20  ;;  %v5352_v0 = vld [vmem:[%s8932_s4 + $0x270] sm:$0xff] }
 0xe94   :  { %v2620_v3 = vmul.f32 %v8141_v27, %v8141_v27 }
 0xe95   :  { %v2619_v31 = vmul.f32 %v8143_v30, %v8143_v30  ;;  %6856 = vmatpush1.bf16.msra.mxu0 %v6855_v13 }
 0xe96   :  { %6858 = vmatprep.subr.bf16.mxu0 %v6857_v14 }
 0xe97   :  { %6257 = vmatprep.mubr.f32.mxu1 %v2619_v31  ;;  %v5355_v31 = vld [vmem:[%s8932_s4 + $0x288] sm:$0xff] }
 0xe98   :  { %6258 = vmatmul.mubr.f32.vlgmr.msra.gmra.mrb[28].mxu1 %v2620_v3  ;;  %v6893_v3 = vpack.c.bf16 %v5357_v23, %v5354_v22  ;;  %v6863_v36 = vpack.c.bf16 %v5355_v31, %v5352_v0 }
 0xe99   :  { %6876 = vmatpush3.bf16.msra.mxu1 %v6873_v9  ;;  %6860 = vmatpush1.bf16.msra.mxu0 %v6859_v24 }
 0xe9a   :  { %6878 = vmatprep.subr.bf16.mxu1 %v6877_v43  ;;  %6862 = vmatprep.subr.bf16.mxu0 %v6861_v26 }
 0xe9d   :  { %6880 = vmatpush3.bf16.msra.mxu1 %v6877_v43  ;;  %6864 = vmatpush1.bf16.msra.mxu0 %v6863_v36 }
 0xe9e   :  { %6882 = vmatprep.subr.bf16.mxu1 %v6881_v15  ;;  %6866 = vmatprep.subr.bf16.mxu0 %v6865_v37 }
 0xea1   :  { %6884 = vmatpush3.bf16.msra.mxu1 %v6881_v15  ;;  %6868 = vmatpush1.bf16.msra.mxu0 %v6867_v49  ;;  %v5369_v15 = vld [vmem:[%s8932_s4 + $0x2f8] sm:$0xff] }
 0xea2   :  { %6886 = vmatprep.subr.bf16.mxu1 %v6885_v5  ;;  %6870 = vmatprep.subr.bf16.mxu0 %v6869_v42  ;;  %v6901_v60 = vpack.c.bf16 %v5369_v15, %v5366_v58 }
 0xea5   :  { %6888 = vmatpush3.bf16.msra.mxu1 %v6885_v5  ;;  %6872 = vmatpush1.bf16.msra.mxu0 %v6871_v59 }
 0xea6   :  { %6890 = vmatprep.subr.bf16.mxu1 %v6889_v19  ;;  %6295 = vmatprep.subr.mxu0 %v7276_v33 }
 0xea9   :  { %6892 = vmatpush3.bf16.msra.mxu1 %v6889_v19 }
 0xeaa   :  { %6894 = vmatprep.subr.bf16.mxu1 %v6893_v3 }
 0xead   :  { %6896 = vmatpush3.bf16.msra.mxu1 %v6893_v3 }
 0xeae   :  { %6898 = vmatprep.subr.bf16.mxu1 %v6897_v40 }
 0xeb1   :  { %6900 = vmatpush3.bf16.msra.mxu1 %v6897_v40 }
 0xeb2   :  { %6902 = vmatprep.subr.bf16.mxu1 %v6901_v60 }
 0xeb5   :  { %6904 = vmatpush3.bf16.msra.mxu1 %v6901_v60 }
 0xeb6   :  { %6330 = vmatprep.subr.mxu1 %v7276_v33 }
 0xf6b   :  { %v6259_v39 = vpop.f32.mrb[28].mxu1 }
 0xf6c   :  { %v2697_v41 = vmul.f32 0.0078125, %v6259_v39  ;;  %v2687_v28 = vpop.f32.mrb[29].mxu1 }
 0xf6d   :  { %v2696_v45 = vmul.f32 0.0078125, %v2687_v28 }
 0xf6e   :  { %v2699_v9 = vadd.f32 1e-12, %v2697_v41 }
 0xf6f   :  { %v2698_v32 = vadd.f32 1e-12, %v2696_v45 }
 0xf70   :  { %7188 = vrsqrt.f32 %v2699_v9 }
 0xf71   :  { %7190 = vrsqrt.f32 %v2698_v32 }
 0xf7a   :  { %v7189_v50 = vpop.eup %7188 }
 0xf7b   :  { %v7191_v43 = vpop.eup %7190  ;;  %2709 = vperm.xlu0 %7100, %v7189_v50  }
 0xf7c   :  { %2704 = vperm.xlu1 %7101, %v7191_v43  }
 0xffa   :  { %v2710_v61 = vpop.permute.xlu0 %2709 }
 0xffb   :  { %v2713_v51 = vmul.f32 %v2710_v61, %v8141_v27  ;;  %v2705_v62 = vpop.permute.xlu1 %2704  ;;  %v5370_v27 = vld [vmem:[%s8933_s5 + $0x3] sm:$0x7] }
 0xffc   :  { %v2712_v63 = vmul.f32 %v2705_v62, %v8143_v30  ;;  %v2787_v30 = vrot.slane %v5370_v27, %v7602_v44  ;;  %v2791_v6 = vrot.slane %v5370_v27, %v7608_v46  ;;  %v2795_v37 = vrot.slane %v5370_v27, %v362_v2 }
 0xffd   :  { %v2721_v11 = vmul.f32 %v5320_v52, %v2713_v51 }
 0xffe   :  { %v2720_v5 = vmul.f32 %v5320_v52, %v2712_v63 }
 0xfff   :  { %v8303_v10 = vadd.f32 %v5321_v17, %v2721_v11 }
0x1000   :  { %v8305_v8 = vadd.f32 %v5321_v17, %v2720_v5 }
0x1001   :  { %2731 = vst [vmem:[%s8946_s18 + $0x8] sm:$0xff] %v8303_v10 }
0x1002   :  { %2730 = vst [vmem:[%s8946_s18] sm:$0xff] %v8305_v8  ;;  %2864 = vmatmul.mubr.f32.vlgmr.msra.gmra.mrb[30].mxu0 %v8305_v8  ;;  %6292 = vmatprep.mubr.f32.mxu1 %v8305_v8 }
0x1003   :  { %6293 = vmatmul.mubr.f32.vlgmr.msra.gmra.mrb[30].mxu1 %v8303_v10  ;;  %2869 = vmatprep.mubr.f32.mxu0 %v7276_v33 }
0x1004   :  { %6332 = vmatprep.mubr.msk.f32.mxu1 %vm7277_vm0, %v7276_v33 }
0x1006   :  { %2870 = vmatmul.mubr.f32.gmra.mrb[32].mxu0 %v8303_v10 }
0x1007   :  { %6297 = vmatprep.mubr.msk.f32.mxu0 %vm7277_vm0, %v7276_v33 }
0x10d5   :  { %v2865_v7 = vpop.f32.mrb[30].mxu0 }
0x10d6   :  { %v2866_v13 = vadd.f32 %v2865_v7, %v2787_v30  ;;  %v2867_v14 = vpop.f32.mrb[31].mxu0  ;;  %v6294_v16 = vpop.f32.mrb[30].mxu1 }
0x10d7   :  { %v2868_v18 = vadd.f32 %v2867_v14, %v2791_v6  ;;  %v2942_v19 = vpop.f32.mrb[31].mxu1  ;;  %v8377_v28 = vadd.f32 %v6294_v16, %v2795_v37 }
0x10d8   :  { %2953 = vrot.lane.b32.xlu0 %v2866_v13, %s7278_s1  ;;  %v8379_v12 = vadd.f32 %v2942_v19, %v2795_v37 }
0x10d9   :  { %v2871_v20 = vpop.f32.mrb[32].mxu0  ;;  %2967 = vrot.lane.b32.xlu1 %v2868_v18, %s7278_s1  ;;  %6296 = vmatpush3.xpose.msk.msra.mxu0 %vm567_vm1, %v2868_v18 }
0x10da   :  { %v2872_v21 = vadd.f32 %v2871_v20, %v2787_v30  ;;  %v2873_v22 = vpop.f32.mrb[33].mxu0  ;;  %6300 = vmatprep.subr.mxu0 %v7276_v33 }
0x10db   :  { %v2874_v23 = vadd.f32 %v2873_v22, %v2791_v6 }
0x10dc   :  { %2955 = vrot.lane.b32.xlu0 %v2872_v21, %s7278_s1  ;;  %6298 = vmatmul.mubr.msk.f32.vlgmr.msra.gmra.mrb[34].mxu0 %vm567_vm1, %v2866_v13 }
0x10dd   :  { %2969 = vrot.lane.b32.xlu1 %v2874_v23, %s7278_s1  ;;  %6301 = vmatpush3.xpose.msk.msra.mxu0 %vm567_vm1, %v2874_v23 }
0x10de   :  { %6302 = vmatprep.mubr.msk.f32.mxu0 %vm7277_vm0, %v7276_v33  ;;  %6305 = vmatprep.subr.mxu0 %v7276_v33 }
0x10e0   :  { %2957 = vrot.lane.b32.xlu0 %v2866_v13, %s7279_s22  ;;  %6303 = vmatmul.mubr.msk.f32.vlgmr.msra.gmra.mrb[36].mxu0 %vm567_vm1, %v2872_v21 }
0x10e1   :  { %2971 = vrot.lane.b32.xlu1 %v2868_v18, %s7279_s22  ;;  %6307 = vmatprep.mubr.msk.f32.mxu0 %vm7277_vm0, %v7276_v33 }
0x10e4   :  { %2959 = vrot.lane.b32.xlu0 %v2872_v21, %s7279_s22 }
0x10e5   :  { %2973 = vrot.lane.b32.xlu1 %v2874_v23, %s7279_s22 }
0x10e8   :  { %2977 = vrot.lane.b32.xlu0 %v2874_v23, %s7280_s2 }
0x10e9   :  { %2975 = vrot.lane.b32.xlu1 %v2868_v18, %s7280_s2 }
0x10ec   :  { %2963 = vrot.lane.b32.xlu0 %v2872_v21, %s7280_s2 }
0x10ed   :  { %2961 = vrot.lane.b32.xlu1 %v2866_v13, %s7280_s2 }
0x114a   :  { %v2954_v24 = vpop.permute.xlu0 %2953 }
0x114b   :  { %v2968_v26 = vpop.permute.xlu1 %2967 }
0x114c   :  { %6306 = vmatpush3.xpose.msk.msra.mxu0 %vm567_vm1, %v2968_v26 }
0x114d   :  { %6310 = vmatprep.subr.mxu0 %v7276_v33 }
0x114e   :  { %v2956_v0 = vpop.permute.xlu0 %2955 }
0x114f   :  { %v2970_v31 = vpop.permute.xlu1 %2969  ;;  %6308 = vmatmul.mubr.msk.f32.vlgmr.msra.gmra.mrb[38].mxu0 %vm567_vm1, %v2954_v24 }
0x1150   :  { %6311 = vmatpush3.xpose.msk.msra.mxu0 %vm567_vm1, %v2970_v31  ;;  %6312 = vmatprep.mubr.msk.f32.mxu0 %vm7277_vm0, %v7276_v33 }
0x1151   :  { %6315 = vmatprep.subr.mxu0 %v7276_v33 }
0x1152   :  { %v2958_v3 = vpop.permute.xlu0 %2957 }
0x1153   :  { %v2972_v34 = vpop.permute.xlu1 %2971  ;;  %6313 = vmatmul.mubr.msk.f32.vlgmr.msra.gmra.mrb[40].mxu0 %vm567_vm1, %v2956_v0 }
0x1154   :  { %6316 = vmatpush3.xpose.msk.msra.mxu0 %vm567_vm1, %v2972_v34  ;;  %6317 = vmatprep.mubr.msk.f32.mxu0 %vm7277_vm0, %v7276_v33 }
0x1155   :  { %6320 = vmatprep.subr.mxu0 %v7276_v33 }
0x1156   :  { %v2960_v35 = vpop.permute.xlu0 %2959 }
0x1157   :  { %v2974_v36 = vpop.permute.xlu1 %2973  ;;  %6318 = vmatmul.mubr.msk.f32.vlgmr.msra.gmra.mrb[42].mxu0 %vm567_vm1, %v2958_v3 }
0x1158   :  { %6321 = vmatpush3.xpose.msk.msra.mxu0 %vm567_vm1, %v2974_v36  ;;  %6322 = vmatprep.mubr.msk.f32.mxu0 %vm7277_vm0, %v7276_v33 }
0x1159   :  { %6325 = vmatprep.subr.mxu0 %v7276_v33 }
0x115a   :  { %v2978_v39 = vpop.permute.xlu0 %2977 }
0x115b   :  { %v2976_v41 = vpop.permute.xlu1 %2975  ;;  %6323 = vmatmul.mubr.msk.f32.vlgmr.msra.gmra.mrb[44].mxu0 %vm567_vm1, %v2960_v35  ;;  %6331 = vmatpush3.xpose.msk.msra.mxu1 %vm567_vm1, %v2978_v39 }
0x115c   :  { %6326 = vmatpush3.xpose.msk.msra.mxu0 %vm567_vm1, %v2976_v41  ;;  %6340 = vmatprep.subr.mxu1 %v7276_v33 }
0x115d   :  { %6327 = vmatprep.mubr.msk.f32.mxu0 %vm7277_vm0, %v7276_v33  ;;  %6335 = vmatprep.subr.mxu0 %v7276_v33 }
0x115e   :  { %v2964_v45 = vpop.permute.xlu0 %2963 }
0x115f   :  { %v2962_v2 = vpop.permute.xlu1 %2961  ;;  %6333 = vmatmul.mubr.msk.f32.vlgmr.msra.gmra.mrb[32].mxu1 %vm567_vm1, %v2964_v45 }
0x1160   :  { %6341 = vmatpush3.msra.mxu1 %v8377_v28  ;;  %6328 = vmatmul.mubr.msk.f32.vlgmr.msra.gmra.mrb[46].mxu0 %vm567_vm1, %v2962_v2 }
0x1161   :  { %6336 = vmatpush3.msra.mxu0 %v8379_v12  ;;  %6342 = vmatprep.mubr.msk.f32.mxu1 %vm7277_vm0, %v7276_v33 }
0x1162   :  { %6350 = vmatprep.subr.mxu1 %v7276_v33  ;;  %6337 = vmatprep.mubr.msk.f32.mxu0 %vm7277_vm0, %v7276_v33 }
0x1163   :  { %6345 = vmatprep.subr.mxu0 %v7276_v33 }
0x11af   :  { %v3069_v9 = vpop.f32.mrb[34].mxu0 }
0x11b0   :  { %v3591_v32 = vmul.f32 0.17677669, %v3069_v9  ;;  %v6299_v47 = vpop.f32.mrb[35].mxu0 }
0x11b2   :  { %v3599_v53 = vadd.f32 %v3591_v32, %v7683_v25 }
0x11b3   :  { %v3143_v48 = vpop.f32.mrb[36].mxu0 }
0x11b4   :  { %v3592_v49 = vmul.f32 0.17677669, %v3143_v48  ;;  %v6304_v4 = vpop.f32.mrb[37].mxu0  ;;  %v3607_v50 = vsel %vm1176_vm2, %v3599_v53, -inf }
0x11b5   :  { %3608 = vmax.xlane.f32.xlu1 %v3607_v50 }
0x11b6   :  { %v3600_v40 = vadd.f32 %v3592_v49, %v7686_v29 }
0x11b8   :  { %v3610_v43 = vsel %vm1176_vm2, %v3600_v40, -inf }
0x11b9   :  { %3611 = vmax.xlane.f32.xlu0 %v3610_v43 }
0x1222   :  { %v3217_v54 = vpop.f32.mrb[38].mxu0 }
0x1223   :  { %v3593_v55 = vmul.f32 0.17677669, %v3217_v54  ;;  %v6309_v42 = vpop.f32.mrb[39].mxu0 }
0x1225   :  { %v3601_v56 = vadd.f32 %v3593_v55, %v7683_v25 }
0x1226   :  { %v3291_v57 = vpop.f32.mrb[40].mxu0 }
0x1227   :  { %v3594_v58 = vmul.f32 0.17677669, %v3291_v57  ;;  %v6314_v59 = vpop.f32.mrb[41].mxu0  ;;  %v3613_v15 = vsel %vm1176_vm2, %v3601_v56, -inf }
0x1228   :  { %3614 = vmax.xlane.f32.xlu0 %v3613_v15 }
0x1229   :  { %v3602_v60 = vadd.f32 %v3594_v58, %v7686_v29 }
0x122a   :  { %v3365_v52 = vpop.f32.mrb[42].mxu0 }
0x122b   :  { %v3595_v61 = vmul.f32 0.17677669, %v3365_v52  ;;  %v6319_v51 = vpop.f32.mrb[43].mxu0  ;;  %v3616_v62 = vsel %vm1176_vm2, %v3602_v60, -inf }
0x122c   :  { %3617 = vmax.xlane.f32.xlu1 %v3616_v62 }
0x122d   :  { %v3603_v17 = vadd.f32 %v3595_v61, %v7683_v25 }
0x122e   :  { %v3439_v63 = vpop.f32.mrb[44].mxu0 }
0x122f   :  { %v3596_v11 = vmul.f32 0.17677669, %v3439_v63  ;;  %v6324_v5 = vpop.f32.mrb[45].mxu0  ;;  %v3619_v27 = vsel %vm1176_vm2, %v3603_v17, -inf }
0x1230   :  { %3620 = vmax.xlane.f32.xlu0 %v3619_v27 }
0x1231   :  { %v3604_v30 = vadd.f32 %v3596_v11, %v7686_v29 }
0x1232   :  { %v3587_v6 = vpop.f32.mrb[32].mxu1 }
0x1233   :  { %v3598_v7 = vmul.f32 0.17677669, %v3587_v6  ;;  %v3513_v13 = vpop.f32.mrb[46].mxu0  ;;  %v6334_v14 = vpop.f32.mrb[33].mxu1  ;;  %v3622_v16 = vsel %vm1176_vm2, %v3604_v30, -inf }
0x1234   :  { %v3597_v18 = vmul.f32 0.17677669, %v3513_v13  ;;  %3623 = vmax.xlane.f32.xlu1 %v3622_v16  ;;  %v6329_v19 = vpop.f32.mrb[47].mxu0 }
0x1235   :  { %v3606_v20 = vadd.f32 %v3598_v7, %v7686_v29 }
0x1236   :  { %v3605_v21 = vadd.f32 %v3597_v18, %v7683_v25 }
0x1237   :  { %v3628_v22 = vsel %vm1176_vm2, %v3606_v20, -inf }
0x1238   :  { %3629 = vmax.xlane.f32.xlu1 %v3628_v22  ;;  %v3625_v23 = vsel %vm1176_vm2, %v3605_v21, -inf }
0x1239   :  { %3626 = vmax.xlane.f32.xlu0 %v3625_v23 }
0x1242   :  { %v3609_v25 = vpop.xlane.xlu1 %3608 }
0x1243   :  { %v3631_v26 = vsub.f32 %v3599_v53, %v3609_v25 }
0x1245   :  { %v3639_v31 = vmul.f32 1.442695, %v3631_v26 }
0x1246   :  { %v3612_v29 = vpop.xlane.xlu0 %3611 }
0x1247   :  { %v3632_v24 = vsub.f32 %v3600_v40, %v3612_v29 }
0x1249   :  { %2983 = vrot.lane.b32.xlu1 %v8377_v28, %s7278_s1  ;;  %v3641_v0 = vmul.f32 1.442695, %v3632_v24 }
0x124b   :  { %7192 = vpow2.f32 %v3641_v0 }
0x124c   :  { %7194 = vpow2.f32 %v3639_v31 }
0x124d   :  { %2987 = vrot.lane.b32.xlu1 %v8379_v12, %s7279_s22 }
0x124f   :  { %2981 = vrot.lane.b32.xlu0 %v8379_v12, %s7278_s1 }
0x1253   :  { %2989 = vrot.lane.b32.xlu0 %v8377_v28, %s7279_s22 }
0x1255   :  { %v7193_v3 = vpop.eup %7192 }
0x1256   :  { %v7195_v34 = vpop.eup %7194  ;;  %v3658_v35 = vsel %vm1176_vm2, %v7193_v3, 0.0 }
0x1257   :  { %v3655_v36 = vsel %vm1176_vm2, %v7195_v34, 0.0 }
0x1271   :  { %3659 = vadd.xlane.f32.xlu1 %v3658_v35 }
0x1272   :  { %3656 = vadd.xlane.f32.xlu0 %v3655_v36 }
0x12b5   :  { %v3615_v37 = vpop.xlane.xlu0 %3614 }
0x12b6   :  { %v3633_v39 = vsub.f32 %v3601_v56, %v3615_v37 }
0x12b8   :  { %v3643_v41 = vmul.f32 1.442695, %v3633_v39 }
0x12b9   :  { %v3618_v45 = vpop.xlane.xlu1 %3617 }
0x12ba   :  { %7196 = vpow2.f32 %v3643_v41  ;;  %v3634_v2 = vsub.f32 %v3602_v60, %v3618_v45  ;;  %v5395_v45 = vld [vmem:[%s8934_s6 + $0x80] sm:$0xff] }
0x12bc   :  { %v3645_v9 = vmul.f32 1.442695, %v3634_v2  ;;  %v5396_v2 = vld [vmem:[%s8934_s6 + $0x88] sm:$0xff] }
0x12bd   :  { %v3621_v32 = vpop.xlane.xlu0 %3620 }
0x12be   :  { %7198 = vpow2.f32 %v3645_v9  ;;  %v3635_v47 = vsub.f32 %v3603_v17, %v3621_v32  ;;  %v5397_v9 = vld [vmem:[%s8934_s6 + $0x90] sm:$0xff]  ;;  %v6905_v32 = vpack.c.bf16 %v5396_v2, %v5395_v45  ;;  %v5412_v2 = vld [vmem:[%s8935_s7 + $0x1] ss:$0 sm:$0xff] }
0x12c0   :  { %v3647_v53 = vmul.f32 1.442695, %v3635_v47  ;;  %v5398_v47 = vld [vmem:[%s8934_s6 + $0x98] sm:$0xff] }
0x12c1   :  { %v3624_v48 = vpop.xlane.xlu1 %3623 }
0x12c2   :  { %7200 = vpow2.f32 %v3647_v53  ;;  %v3636_v4 = vsub.f32 %v3604_v30, %v3624_v48  ;;  %v6909_v53 = vpack.c.bf16 %v5398_v47, %v5397_v9 }
0x12c4   :  { %v7197_v49 = vpop.eup %7196  ;;  %v3649_v56 = vmul.f32 1.442695, %v3636_v4 }
0x12c5   :  { %v3630_v50 = vpop.xlane.xlu1 %3629  ;;  %v3661_v40 = vsel %vm1176_vm2, %v7197_v49, 0.0 }
0x12c6   :  { %v3638_v43 = vsub.f32 %v3606_v20, %v3630_v50  ;;  %3662 = vadd.xlane.f32.xlu0 %v3661_v40  ;;  %v3627_v54 = vpop.xlane.xlu0 %3626  ;;  %v5399_v40 = vld [vmem:[%s8934_s6 + $0xa0] sm:$0xff] }
0x12c7   :  { %v3637_v55 = vsub.f32 %v3605_v21, %v3627_v54 }
0x12c8   :  { %v7199_v42 = vpop.eup %7198  ;;  %v3653_v57 = vmul.f32 1.442695, %v3638_v43  ;;  %v5400_v43 = vld [vmem:[%s8934_s6 + $0xa8] sm:$0xff] }
0x12c9   :  { %v3651_v58 = vmul.f32 1.442695, %v3637_v55  ;;  %v3664_v59 = vsel %vm1176_vm2, %v7199_v42, 0.0  ;;  %v2984_v11 = vpop.permute.xlu1 %2983  ;;  %v6913_v54 = vpack.c.bf16 %v5400_v43, %v5399_v40  ;;  %v5401_v55 = vld [vmem:[%s8934_s6 + $0xb0] sm:$0xff] }
0x12ca   :  { %7202 = vpow2.f32 %v3653_v57  ;;  %3665 = vadd.xlane.f32.xlu1 %v3664_v59  ;;  %v2982_v5 = vpop.permute.xlu0 %2981 }
0x12cb   :  { %7204 = vpow2.f32 %v3651_v58  ;;  %v5404_v58 = vld [vmem:[%s8934_s6 + $0xc8] sm:$0xff] }
0x12cc   :  { %v7201_v15 = vpop.eup %7200  ;;  %7206 = vpow2.f32 %v3649_v56  ;;  %v5403_v56 = vld [vmem:[%s8934_s6 + $0xc0] sm:$0xff] }
0x12cd   :  { %v3667_v60 = vsel %vm1176_vm2, %v7201_v15, 0.0  ;;  %v2988_v27 = vpop.permute.xlu1 %2987  ;;  %v6921_v59 = vpack.c.bf16 %v5404_v58, %v5403_v56  ;;  %v5420_v58 = vld [vmem:[%s8938_s10 + $0x118] sm:$0xff] }
0x12ce   :  { %3668 = vadd.xlane.f32.xlu0 %v3667_v60  ;;  %v2990_v30 = vpop.permute.xlu0 %2989  ;;  %v5406_v60 = vld [vmem:[%s8934_s6 + $0xd8] sm:$0xff] }
0x12d4   :  { %v8420_v52 = vpop.eup %7202 }
0x12d5   :  { %v7205_v61 = vpop.eup %7204  ;;  %v3676_v51 = vsel %vm1176_vm2, %v8420_v52, 0.0 }
0x12d6   :  { %v7207_v62 = vpop.eup %7206  ;;  %3677 = vadd.xlane.f32.xlu1 %v3676_v51  ;;  %v3673_v17 = vsel %vm1176_vm2, %v7205_v61, 0.0 }
0x12d7   :  { %3674 = vadd.xlane.f32.xlu0 %v3673_v17  ;;  %v3670_v63 = vsel %vm1176_vm2, %v7207_v62, 0.0 }
0x12da   :  { %3671 = vadd.xlane.f32.xlu1 %v3670_v63 }
0x12eb   :  { %2993 = vrot.lane.b32.xlu1 %v8379_v12, %s7280_s2 }
0x12ed   :  { %2995 = vrot.lane.b32.xlu0 %v8377_v28, %s7280_s2 }
0x12fe   :  { %v3660_v6 = vpop.xlane.xlu1 %3659 }
0x12ff   :  { %7208 = vrcp.f32 %v3660_v6  ;;  %v3657_v7 = vpop.xlane.xlu0 %3656 }
0x1300   :  { %7210 = vrcp.f32 %v3657_v7  ;;  %v5409_v7 = vld [vmem:[%s8934_s6 + $0xf0] sm:$0xff] }
0x1309   :  { %v7209_v13 = vpop.eup %7208 }
0x130a   :  { %v7211_v14 = vpop.eup %7210  ;;  %v3682_v16 = vmul.f32 %v7209_v13, %v7193_v3  ;;  %v5410_v13 = vld [vmem:[%s8934_s6 + $0xf8] sm:$0xff] }
0x130b   :  { %v3680_v18 = vmul.f32 %v7211_v14, %v7195_v34  ;;  %v6933_v14 = vpack.c.bf16 %v5410_v13, %v5409_v7  ;;  %v5427_v7 = vld [vmem:[%s8938_s10 + $0x150] sm:$0xff]  ;;  %v5430_v13 = vld [vmem:[%s8938_s10 + $0x168] sm:$0xff] }
0x130c   :  { %6343 = vmatmul.mubr.msk.f32.vlgmr.msra.gmra.mrb[34].mxu1 %vm1176_vm2, %v3682_v16 }
0x130d   :  { %6351 = vmatpush3.msra.mxu1 %v2984_v11  ;;  %6338 = vmatmul.mubr.msk.f32.vlgmr.msra.gmra.mrb[48].mxu0 %vm1176_vm2, %v3680_v18 }
0x130e   :  { %6346 = vmatpush3.msra.mxu0 %v2982_v5  ;;  %6347 = vmatprep.mubr.msk.f32.mxu0 %vm7277_vm0, %v7276_v33  ;;  %v5407_v5 = vld [vmem:[%s8934_s6 + $0xe0] sm:$0xff] }
0x130f   :  { %6355 = vmatprep.subr.mxu0 %v7276_v33  ;;  %6352 = vmatprep.mubr.msk.f32.mxu1 %vm7277_vm0, %v7276_v33 }
0x1310   :  { %6360 = vmatprep.subr.mxu1 %v7276_v33 }
0x1353   :  { %v3663_v28 = vpop.xlane.xlu0 %3662 }
0x1354   :  { %7212 = vrcp.f32 %v3663_v28 }
0x1357   :  { %v3666_v12 = vpop.xlane.xlu1 %3665 }
0x1358   :  { %7214 = vrcp.f32 %v3666_v12 }
0x135b   :  { %v3669_v19 = vpop.xlane.xlu0 %3668 }
0x135c   :  { %7216 = vrcp.f32 %v3669_v19 }
0x135e   :  { %v7213_v20 = vpop.eup %7212 }
0x135f   :  { %v3684_v21 = vmul.f32 %v7213_v20, %v7197_v49 }
0x1361   :  { %6348 = vmatmul.mubr.msk.f32.vlgmr.msra.gmra.mrb[50].mxu0 %vm1176_vm2, %v3684_v21 }
0x1362   :  { %v7215_v22 = vpop.eup %7214  ;;  %6356 = vmatpush3.msra.mxu0 %v2988_v27  ;;  %6357 = vmatprep.mubr.msk.f32.mxu0 %vm7277_vm0, %v7276_v33  ;;  %v5408_v27 = vld [vmem:[%s8934_s6 + $0xe8] sm:$0xff] }
0x1363   :  { %v3686_v23 = vmul.f32 %v7215_v22, %v7199_v42  ;;  %v3678_v29 = vpop.xlane.xlu1 %3677  ;;  %6365 = vmatprep.subr.mxu0 %v7276_v33  ;;  %v5402_v42 = vld [vmem:[%s8934_s6 + $0xb8] sm:$0xff]  ;;  %v6929_v6 = vpack.c.bf16 %v5408_v27, %v5407_v5 }
0x1364   :  { %v3675_v25 = vpop.xlane.xlu0 %3674  ;;  %v6917_v57 = vpack.c.bf16 %v5402_v42, %v5401_v55  ;;  %v5428_v5 = vld [vmem:[%s8938_s10 + $0x158] sm:$0xff] }
0x1365   :  { %7218 = vrcp.f32 %v3675_v25  ;;  %6353 = vmatmul.mubr.msk.f32.vlgmr.msra.gmra.mrb[36].mxu1 %vm1176_vm2, %v3686_v23 }
0x1366   :  { %v7217_v24 = vpop.eup %7216  ;;  %6361 = vmatpush3.msra.mxu1 %v2990_v30  ;;  %6362 = vmatprep.mubr.msk.f32.mxu1 %vm7277_vm0, %v7276_v33 }
0x1367   :  { %v3688_v26 = vmul.f32 %v7217_v24, %v7201_v15  ;;  %v3672_v0 = vpop.xlane.xlu1 %3671  ;;  %6370 = vmatprep.subr.mxu1 %v7276_v33  ;;  %v5405_v15 = vld [vmem:[%s8934_s6 + $0xd0] sm:$0xff] }
0x1368   :  { %7220 = vrcp.f32 %v3672_v0  ;;  %v2996_v39 = vpop.permute.xlu0 %2995  ;;  %v6925_v51 = vpack.c.bf16 %v5406_v60, %v5405_v15  ;;  %v5419_v60 = vld [vmem:[%s8938_s10 + $0x110] sm:$0xff] }
0x1369   :  { %6358 = vmatmul.mubr.msk.f32.vlgmr.msra.gmra.mrb[52].mxu0 %vm1176_vm2, %v3688_v26  ;;  %7222 = vrcp.f32 %v3678_v29 }
0x136a   :  { %6367 = vmatprep.mubr.msk.f32.mxu0 %vm7277_vm0, %v7276_v33 }
0x136b   :  { %v2994_v31 = vpop.permute.xlu1 %2993 }
0x136c   :  { %6366 = vmatpush3.msra.mxu0 %v2994_v31 }
0x136d   :  { %6906 = vmatprep.subr.bf16.mxu0 %v6905_v32 }
0x136f   :  { %v7219_v3 = vpop.eup %7218 }
0x1370   :  { %v3692_v34 = vmul.f32 %v7219_v3, %v7205_v61 }
0x1372   :  { %v7221_v35 = vpop.eup %7220  ;;  %6368 = vmatmul.mubr.msk.f32.vlgmr.msra.gmra.mrb[54].mxu0 %vm1176_vm2, %v3692_v34 }
0x1373   :  { %v3690_v36 = vmul.f32 %v7221_v35, %v7207_v62  ;;  %v7223_v37 = vpop.eup %7222  ;;  %6908 = vmatpush3.bf16.msra.mxu0 %v6905_v32 }
0x1374   :  { %v3694_v41 = vmul.f32 %v7223_v37, %v8420_v52  ;;  %6910 = vmatprep.subr.bf16.mxu0 %v6909_v53 }
0x1375   :  { %6363 = vmatmul.mubr.msk.f32.vlgmr.msra.gmra.mrb[38].mxu1 %vm1176_vm2, %v3690_v36 }
0x1376   :  { %6371 = vmatpush3.msra.mxu1 %v2996_v39  ;;  %6372 = vmatprep.mubr.msk.f32.mxu1 %vm7277_vm0, %v7276_v33 }
0x1377   :  { %6937 = vmatprep.subr.bf16.mxu1 %v7274_v1  ;;  %6912 = vmatpush3.bf16.msra.mxu0 %v6909_v53 }
0x1378   :  { %6914 = vmatprep.subr.bf16.mxu0 %v6913_v54 }
0x1379   :  { %6373 = vmatmul.mubr.msk.f32.vlgmr.msra.gmra.mrb[40].mxu1 %vm1176_vm2, %v3694_v41 }
0x137a   :  { %6938 = vmatpush3.bf16.msra.mxu1 %v7274_v1 }
0x137b   :  { %6939 = vmatprep.subr.bf16.mxu1 %v7274_v1  ;;  %6916 = vmatpush3.bf16.msra.mxu0 %v6913_v54 }
0x137c   :  { %6918 = vmatprep.subr.bf16.mxu0 %v6917_v57 }
0x137e   :  { %6940 = vmatpush3.bf16.msra.mxu1 %v7274_v1 }
0x137f   :  { %6941 = vmatprep.subr.bf16.mxu1 %v7274_v1  ;;  %6920 = vmatpush3.bf16.msra.mxu0 %v6917_v57  ;;  %v5418_v57 = vld [vmem:[%s8938_s10 + $0x108] sm:$0xff] }
0x1380   :  { %6922 = vmatprep.subr.bf16.mxu0 %v6921_v59  ;;  %v6969_v15 = vpack.c.bf16 %v5420_v58, %v5418_v57  ;;  %v5415_v57 = vld [vmem:[%s8936_s8 + $0x1] ss:$0 sm:$0xff] }
0x1382   :  { %6942 = vmatpush3.bf16.msra.mxu1 %v7274_v1 }
0x1383   :  { %6943 = vmatprep.subr.bf16.mxu1 %v7274_v1  ;;  %6924 = vmatpush3.bf16.msra.mxu0 %v6921_v59  ;;  %v5417_v59 = vld [vmem:[%s8938_s10 + $0x100] sm:$0xff] }
0x1384   :  { %6926 = vmatprep.subr.bf16.mxu0 %v6925_v51 }
0x1386   :  { %6944 = vmatpush3.bf16.msra.mxu1 %v7274_v1 }
0x1387   :  { %6945 = vmatprep.subr.bf16.mxu1 %v7274_v1  ;;  %6928 = vmatpush3.bf16.msra.mxu0 %v6925_v51  ;;  %v6971_v51 = vpack.c.bf16 %v5419_v60, %v5417_v59  ;;  %v5416_v60 = vld [vmem:[%s8937_s9 + $0x1] ss:$0 sm:$0xff] }
0x1388   :  { %6930 = vmatprep.subr.bf16.mxu0 %v6929_v6 }
0x138a   :  { %6946 = vmatpush3.bf16.msra.mxu1 %v7274_v1 }
0x138b   :  { %6947 = vmatprep.subr.bf16.mxu1 %v7274_v1  ;;  %6932 = vmatpush3.bf16.msra.mxu0 %v6929_v6  ;;  %v5425_v6 = vld [vmem:[%s8938_s10 + $0x140] sm:$0xff] }
0x138c   :  { %6934 = vmatprep.subr.bf16.mxu0 %v6933_v14 }
0x138e   :  { %6948 = vmatpush3.bf16.msra.mxu1 %v7274_v1 }
0x138f   :  { %6949 = vmatprep.subr.bf16.mxu1 %v7274_v1  ;;  %6936 = vmatpush3.bf16.msra.mxu0 %v6933_v14  ;;  %v5432_v14 = vld [vmem:[%s8938_s10 + $0x178] sm:$0xff] }
0x1390   :  { %6953 = vmatprep.subr.bf16.mxu0 %v7274_v1 }
0x1392   :  { %6950 = vmatpush3.bf16.msra.mxu1 %v7274_v1 }
0x1393   :  { %6951 = vmatprep.subr.bf16.mxu1 %v7274_v1 }
0x1396   :  { %6952 = vmatpush3.bf16.msra.mxu1 %v7274_v1 }
0x1397   :  { %6970 = vmatprep.subr.bf16.mxu1 %v6969_v15 }
0x13df   :  { %v3837_v48 = vpop.f32.mrb[34].mxu1 }
0x13e0   :  { %v8483_v49 = vpop.f32.mrb[48].mxu0  ;;  %v6344_v4 = vpop.f32.mrb[35].mxu1 }
0x13e1   :  { %v6339_v50 = vpop.f32.mrb[49].mxu0 }
0x1434   :  { %v3910_v52 = vpop.f32.mrb[50].mxu0 }
0x1435   :  { %v6349_v61 = vpop.f32.mrb[51].mxu0 }
0x1436   :  { %v5424_v61 = vld [vmem:[%s8938_s10 + $0x138] sm:$0xff] }
0x1438   :  { %v3983_v62 = vpop.f32.mrb[36].mxu1 }
0x1439   :  { %v7117_v17 = vpack.i.bf16 %v3983_v62, %v3910_v52  ;;  %v6354_v63 = vpop.f32.mrb[37].mxu1  ;;  %v5422_v52 = vld [vmem:[%s8938_s10 + $0x128] sm:$0xff] }
0x143a   :  { %v6973_v62 = vpack.c.bf16 %v5424_v61, %v5422_v52  ;;  %v5423_v63 = vld [vmem:[%s8938_s10 + $0x130] sm:$0xff] }
0x143b   :  { %7118 = vrot.lane.b32.xlu1 %v7117_v17, %s7280_s2  ;;  %v5421_v17 = vld [vmem:[%s8938_s10 + $0x120] sm:$0xff] }
0x143c   :  { %v4056_v11 = vpop.f32.mrb[52].mxu0  ;;  %v6975_v27 = vpack.c.bf16 %v5423_v63, %v5421_v17  ;;  %v5450_v63 = vld [vmem:[%s8940_s12 + $0x100] sm:$0xff] }
0x143d   :  { %v6359_v30 = vpop.f32.mrb[53].mxu0 }
0x1445   :  { %v4202_v16 = vpop.f32.mrb[54].mxu0 }
0x1446   :  { %v6369_v18 = vpop.f32.mrb[55].mxu0 }
0x1447   :  { %v6981_v18 = vpack.c.bf16 %v5432_v14, %v5430_v13  ;;  %v5453_v13 = vld [vmem:[%s8940_s12 + $0x118] sm:$0xff] }
0x1448   :  { %v4129_v28 = vpop.f32.mrb[38].mxu1 }
0x1449   :  { %v7122_v12 = vpack.i.bf16 %v4129_v28, %v4056_v11  ;;  %v6364_v19 = vpop.f32.mrb[39].mxu1  ;;  %v5426_v11 = vld [vmem:[%s8938_s10 + $0x148] sm:$0xff]  ;;  %v5429_v28 = vld [vmem:[%s8938_s10 + $0x160] sm:$0xff] }
0x144a   :  { %v6977_v30 = vpack.c.bf16 %v5428_v5, %v5426_v11  ;;  %v5434_v19 = vld [vmem:[%s8938_s10 + $0x188] sm:$0xff] }
0x144b   :  { %7123 = vrot.lane.b32.xlu0 %v7122_v12, %s7279_s22  ;;  %v5431_v12 = vld [vmem:[%s8938_s10 + $0x170] sm:$0xff]  ;;  %v5451_v11 = vld [vmem:[%s8940_s12 + $0x108] sm:$0xff] }
0x144c   :  { %v4275_v20 = vpop.f32.mrb[40].mxu1  ;;  %v7003_v5 = vpack.c.bf16 %v5451_v11, %v5450_v63 }
0x144d   :  { %v7127_v21 = vpack.i.bf16 %v4275_v20, %v4202_v16  ;;  %v6374_v22 = vpop.f32.mrb[41].mxu1  ;;  %v6979_v16 = vpack.c.bf16 %v5427_v7, %v5425_v6  ;;  %v5436_v20 = vld [vmem:[%s8938_s10 + $0x198] sm:$0xff]  ;;  %v5452_v7 = vld [vmem:[%s8940_s12 + $0x110] sm:$0xff] }
0x144e   :  { %v6985_v22 = vpack.c.bf16 %v5436_v20, %v5434_v19  ;;  %v7007_v14 = vpack.c.bf16 %v5453_v13, %v5452_v7  ;;  %v5455_v19 = vld [vmem:[%s8940_s12 + $0x128] sm:$0xff] }
0x144f   :  { %7128 = vrot.lane.b32.xlu1 %v7127_v21, %s7278_s1  ;;  %v6983_v21 = vpack.c.bf16 %v5431_v12, %v5429_v28  ;;  %v5454_v12 = vld [vmem:[%s8940_s12 + $0x120] sm:$0xff] }
0x1450   :  { %v7011_v20 = vpack.c.bf16 %v5455_v19, %v5454_v12 }
0x14ad   :  { %v7119_v23 = vpop.permute.xlu1 %7118 }
0x14ae   :  { %v7121_v25 = vunpack.i.h.bf16 %v7119_v23  ;;  %v7120_v24 = vunpack.i.l.bf16 %v7119_v23  ;;  %v5433_v23 = vld [vmem:[%s8938_s10 + $0x180] sm:$0xff] }
0x14b0   :  { %v4304_v3 = vsel %vm567_vm1, %v3837_v48, %v7121_v25  ;;  %v4303_v36 = vsel %vm567_vm1, %v8483_v49, %v7120_v24  ;;  %v5438_v25 = vld [vmem:[%s8938_s10 + $0x1a8] sm:$0xff]  ;;  %v5440_v24 = vld [vmem:[%s8938_s10 + $0x1b8] sm:$0xff] }
0x14bd   :  { %v7124_v29 = vpop.permute.xlu0 %7123 }
0x14be   :  { %v7126_v26 = vunpack.i.h.bf16 %v7124_v29  ;;  %v7125_v0 = vunpack.i.l.bf16 %v7124_v29  ;;  %v5435_v29 = vld [vmem:[%s8938_s10 + $0x190] sm:$0xff] }
0x14c0   :  { %v4305_v37 = vsel %vm1875_vm3, %v4303_v36, %v7125_v0  ;;  %v4306_v39 = vsel %vm1875_vm3, %v4304_v3, %v7126_v26  ;;  %v6987_v26 = vpack.c.bf16 %v5435_v29, %v5433_v23  ;;  %v6989_v0 = vpack.c.bf16 %v5440_v24, %v5438_v25  ;;  %v5439_v3 = vld [vmem:[%s8938_s10 + $0x1b0] sm:$0xff]  ;;  %v5457_v25 = vld [vmem:[%s8940_s12 + $0x138] sm:$0xff] }
0x14c1   :  { %v7129_v31 = vpop.permute.xlu1 %7128  ;;  %v5456_v29 = vld [vmem:[%s8940_s12 + $0x130] sm:$0xff] }
0x14c2   :  { %v7131_v34 = vunpack.i.h.bf16 %v7129_v31  ;;  %v7130_v35 = vunpack.i.l.bf16 %v7129_v31  ;;  %v5437_v31 = vld [vmem:[%s8938_s10 + $0x1a0] sm:$0xff]  ;;  %v7015_v24 = vpack.c.bf16 %v5457_v25, %v5456_v29 }
0x14c3   :  { %v6991_v36 = vpack.c.bf16 %v5439_v3, %v5437_v31  ;;  %v5458_v3 = vld [vmem:[%s8940_s12 + $0x140] sm:$0xff] }
0x14c4   :  { %v4307_v41 = vsel %vm1878_vm4, %v4305_v37, %v7130_v35  ;;  %v4308_v45 = vsel %vm1878_vm4, %v4306_v39, %v7131_v34  ;;  %v5442_v34 = vld [vmem:[%s8938_s10 + $0x1c8] sm:$0xff]  ;;  %v5444_v35 = vld [vmem:[%s8938_s10 + $0x1d8] sm:$0xff] }
0x14c5   :  { %6407 = vmatprep.mubr.f32.mxu0 %v4307_v41  ;;  %v6993_v37 = vpack.c.bf16 %v5444_v35, %v5442_v34  ;;  %v5459_v34 = vld [vmem:[%s8940_s12 + $0x148] sm:$0xff] }
0x14c6   :  { %6408 = vmatmul.mubr.f32.vlgmr.msra.gmra.mrb[56].mxu0 %v4308_v45  ;;  %v7019_v35 = vpack.c.bf16 %v5459_v34, %v5458_v3 }
0x14c7   :  { %6954 = vmatpush3.bf16.msra.mxu0 %v7274_v1 }
0x14c8   :  { %6955 = vmatprep.subr.bf16.mxu0 %v7274_v1 }
0x14cb   :  { %6956 = vmatpush3.bf16.msra.mxu0 %v7274_v1 }
0x14cc   :  { %6957 = vmatprep.subr.bf16.mxu0 %v7274_v1 }
0x14cf   :  { %6958 = vmatpush3.bf16.msra.mxu0 %v7274_v1 }
0x14d0   :  { %6959 = vmatprep.subr.bf16.mxu0 %v7274_v1 }
0x14d3   :  { %6960 = vmatpush3.bf16.msra.mxu0 %v7274_v1 }
0x14d4   :  { %6961 = vmatprep.subr.bf16.mxu0 %v7274_v1 }
0x14d7   :  { %6962 = vmatpush3.bf16.msra.mxu0 %v7274_v1 }
0x14d8   :  { %6963 = vmatprep.subr.bf16.mxu0 %v7274_v1 }
0x14db   :  { %6964 = vmatpush3.bf16.msra.mxu0 %v7274_v1 }
0x14dc   :  { %6965 = vmatprep.subr.bf16.mxu0 %v7274_v1 }
0x14df   :  { %6966 = vmatpush3.bf16.msra.mxu0 %v7274_v1 }
0x14e0   :  { %6967 = vmatprep.subr.bf16.mxu0 %v7274_v1 }
0x14e3   :  { %6968 = vmatpush3.bf16.msra.mxu0 %v7274_v1 }
0x1599   :  { %v6409_v9 = vpop.f32.mrb[56].mxu0 }
0x159a   :  { %v4406_v32 = vadd.f32 %v6409_v9, %v5412_v2  ;;  %v4400_v47 = vpop.f32.mrb[57].mxu0 }
0x159b   :  { %v4401_v53 = vadd.f32 %v5412_v2, %v4400_v47  ;;  %v5441_v47 = vld [vmem:[%s8938_s10 + $0x1c0] sm:$0xff] }
0x159c   :  { %v4410_v49 = vadd.f32 %v4406_v32, %v8303_v10 }
0x159d   :  { %v4409_v48 = vadd.f32 %v4401_v53, %v8305_v8  ;;  %v5443_v53 = vld [vmem:[%s8938_s10 + $0x1d0] sm:$0xff] }
0x159f   :  { %6442 = vmatprep.mubr.f32.mxu1 %v4409_v48 }
0x15a0   :  { %6443 = vmatmul.mubr.f32.vlgmr.msra.gmra.mrb[42].mxu1 %v4410_v49 }
0x15a1   :  { %4725 = vmatprep.mubr.f32.mxu1 %v7276_v33  ;;  %6972 = vmatpush1.bf16.msra.mxu1 %v6971_v51 }
0x15a2   :  { %6974 = vmatprep.subr.bf16.mxu1 %v6973_v62 }
0x15a5   :  { %6976 = vmatpush1.bf16.msra.mxu1 %v6975_v27  ;;  %v5468_v27 = vld [vmem:[%s8940_s12 + $0x190] sm:$0xff] }
0x15a6   :  { %6978 = vmatprep.subr.bf16.mxu1 %v6977_v30  ;;  %v5469_v30 = vld [vmem:[%s8940_s12 + $0x198] sm:$0xff] }
0x15a7   :  { %v7005_v6 = vpack.c.bf16 %v5469_v30, %v5468_v27 }
0x15a9   :  { %6980 = vmatpush1.bf16.msra.mxu1 %v6979_v16  ;;  %v5470_v16 = vld [vmem:[%s8940_s12 + $0x1a0] sm:$0xff] }
0x15aa   :  { %6982 = vmatprep.subr.bf16.mxu1 %v6981_v18  ;;  %v5471_v18 = vld [vmem:[%s8940_s12 + $0x1a8] sm:$0xff] }
0x15ab   :  { %v7009_v28 = vpack.c.bf16 %v5471_v18, %v5470_v16 }
0x15ad   :  { %6984 = vmatpush1.bf16.msra.mxu1 %v6983_v21  ;;  %v5472_v21 = vld [vmem:[%s8940_s12 + $0x1b0] sm:$0xff] }
0x15ae   :  { %6986 = vmatprep.subr.bf16.mxu1 %v6985_v22  ;;  %v5473_v22 = vld [vmem:[%s8940_s12 + $0x1b8] sm:$0xff] }
0x15af   :  { %v7013_v23 = vpack.c.bf16 %v5473_v22, %v5472_v21 }
0x15b1   :  { %6988 = vmatpush1.bf16.msra.mxu1 %v6987_v26  ;;  %v5474_v26 = vld [vmem:[%s8940_s12 + $0x1c0] sm:$0xff] }
0x15b2   :  { %6990 = vmatprep.subr.bf16.mxu1 %v6989_v0  ;;  %v5475_v0 = vld [vmem:[%s8940_s12 + $0x1c8] sm:$0xff] }
0x15b3   :  { %v7017_v31 = vpack.c.bf16 %v5475_v0, %v5474_v26 }
0x15b5   :  { %6992 = vmatpush1.bf16.msra.mxu1 %v6991_v36  ;;  %v5476_v36 = vld [vmem:[%s8940_s12 + $0x1d0] sm:$0xff] }
0x15b6   :  { %6994 = vmatprep.subr.bf16.mxu1 %v6993_v37  ;;  %v5477_v37 = vld [vmem:[%s8940_s12 + $0x1d8] sm:$0xff] }
0x1673   :  { %v6444_v4 = vpop.f32.mrb[42].mxu1 }
0x1674   :  { %v4491_v50 = vmul.f32 0.0078125, %v6444_v4  ;;  %v4481_v40 = vpop.f32.mrb[43].mxu1 }
0x1675   :  { %v4490_v43 = vmul.f32 0.0078125, %v4481_v40  ;;  %v5448_v40 = vld [vmem:[%s8938_s10 + $0x1f8] sm:$0xff] }
0x1676   :  { %4499 = vperm.xlu1 %7101, %v4491_v50   ;;  %v5446_v50 = vld [vmem:[%s8938_s10 + $0x1e8] sm:$0xff] }
0x1677   :  { %4494 = vperm.xlu0 %7100, %v4490_v43   ;;  %v6997_v43 = vpack.c.bf16 %v5448_v40, %v5446_v50  ;;  %v5481_v50 = vld [vmem:[%s8940_s12 + $0x1f8] sm:$0xff]  ;;  %v5464_v40 = vld [vmem:[%s8940_s12 + $0x170] sm:$0xff] }
0x16f5   :  { %v4500_v54 = vpop.permute.xlu1 %4499 }
0x16f6   :  { %v8553_v55 = vsub.f32 %v4410_v49, %v4500_v54  ;;  %v4495_v42 = vpop.permute.xlu0 %4494  ;;  %v6995_v49 = vpack.c.bf16 %v5443_v53, %v5441_v47  ;;  %v5445_v54 = vld [vmem:[%s8938_s10 + $0x1e0] sm:$0xff] }
0x16f7   :  { %v8555_v56 = vsub.f32 %v4409_v48, %v4495_v42  ;;  %v5447_v42 = vld [vmem:[%s8938_s10 + $0x1f0] sm:$0xff]  ;;  %v5462_v53 = vld [vmem:[%s8940_s12 + $0x160] sm:$0xff] }
0x16f8   :  { %v4505_v10 = vmul.f32 %v8553_v55, %v8553_v55  ;;  %6996 = vmatpush1.bf16.msra.mxu1 %v6995_v49 }
0x16f9   :  { %v4504_v8 = vmul.f32 %v8555_v56, %v8555_v56  ;;  %6998 = vmatprep.subr.bf16.mxu1 %v6997_v43 }
0x16fb   :  { %6477 = vmatprep.mubr.f32.mxu0 %v4504_v8  ;;  %v6999_v8 = vpack.c.bf16 %v5447_v42, %v5445_v54  ;;  %v5465_v54 = vld [vmem:[%s8940_s12 + $0x178] sm:$0xff] }
0x16fc   :  { %6478 = vmatmul.mubr.f32.vlgmr.msra.gmra.mrb[58].mxu0 %v4505_v10  ;;  %v7031_v42 = vpack.c.bf16 %v5465_v54, %v5464_v40 }
0x16fd   :  { %7000 = vmatpush1.bf16.msra.mxu1 %v6999_v8  ;;  %v5449_v8 = vld [vmem:[%s8939_s11 + $0x2] sm:$0x3] }
0x16fe   :  { %7033 = vmatprep.subr.bf16.mxu1 %v7274_v1 }
0x17cf   :  { %v6479_v39 = vpop.f32.mrb[58].mxu0 }
0x17d0   :  { %v4582_v41 = vmul.f32 0.0078125, %v6479_v39  ;;  %v4572_v45 = vpop.f32.mrb[59].mxu0  ;;  %v7021_v39 = vpack.c.bf16 %v5477_v37, %v5476_v36 }
0x17d1   :  { %v4581_v2 = vmul.f32 0.0078125, %v4572_v45  ;;  %v5461_v45 = vld [vmem:[%s8940_s12 + $0x158] sm:$0xff] }
0x17d2   :  { %v4584_v9 = vadd.f32 1e-12, %v4582_v41  ;;  %v5460_v41 = vld [vmem:[%s8940_s12 + $0x150] sm:$0xff] }
0x17d3   :  { %v4583_v32 = vadd.f32 1e-12, %v4581_v2  ;;  %v7023_v2 = vpack.c.bf16 %v5461_v45, %v5460_v41 }
0x17d4   :  { %7224 = vrsqrt.f32 %v4584_v9  ;;  %v5478_v9 = vld [vmem:[%s8940_s12 + $0x1e0] sm:$0xff] }
0x17d5   :  { %7226 = vrsqrt.f32 %v4583_v32  ;;  %v5479_v32 = vld [vmem:[%s8940_s12 + $0x1e8] sm:$0xff] }
0x17d6   :  { %v7025_v47 = vpack.c.bf16 %v5479_v32, %v5478_v9 }
0x17de   :  { %v7225_v48 = vpop.eup %7224 }
0x17df   :  { %v7227_v4 = vpop.eup %7226  ;;  %4594 = vperm.xlu1 %7101, %v7225_v48   ;;  %v5463_v48 = vld [vmem:[%s8940_s12 + $0x168] sm:$0xff] }
0x17e0   :  { %4589 = vperm.xlu0 %7100, %v7227_v4   ;;  %v7027_v49 = vpack.c.bf16 %v5463_v48, %v5462_v53  ;;  %v5480_v4 = vld [vmem:[%s8940_s12 + $0x1f0] sm:$0xff] }
0x17e1   :  { %v7029_v43 = vpack.c.bf16 %v5481_v50, %v5480_v4 }
0x185e   :  { %v4595_v10 = vpop.permute.xlu1 %4594 }
0x185f   :  { %v4590_v58 = vpop.permute.xlu0 %4589  ;;  %v4598_v59 = vmul.f32 %v4595_v10, %v8553_v55  ;;  %v5466_v55 = vld [vmem:[%s8940_s12 + $0x180] sm:$0xff]  ;;  %v4654_v10 = vrot.slane %v5449_v8, %v7602_v44 }
0x1860   :  { %v4597_v15 = vmul.f32 %v4590_v58, %v8555_v56  ;;  %v5467_v56 = vld [vmem:[%s8940_s12 + $0x188] sm:$0xff] }
0x1861   :  { %v4606_v61 = vmul.f32 %v5415_v57, %v4598_v59  ;;  %v7001_v17 = vpack.c.bf16 %v5467_v56, %v5466_v55 }
0x1862   :  { %v4605_v52 = vmul.f32 %v5415_v57, %v4597_v15  ;;  %v4658_v57 = vrot.slane %v5449_v8, %v7608_v46 }
0x1863   :  { %v8671_v62 = vadd.f32 %v5416_v60, %v4606_v61  ;;  %7002 = vmatprep.subr.bf16.mxu0 %v7001_v17 }
0x1864   :  { %v8666_v51 = vadd.f32 %v5416_v60, %v4605_v52  ;;  %7004 = vmatpush3.bf16.msra.mxu0 %v7003_v5 }
0x1865   :  { %7006 = vmatprep.subr.bf16.mxu0 %v7005_v6 }
0x1866   :  { %4726 = vmatmul.mubr.f32.vlgmr.msra.gmra.mrb[44].mxu1 %v8666_v51 }
0x1867   :  { %4731 = vmatprep.mubr.f32.mxu1 %v7276_v33  ;;  %7034 = vmatpush3.bf16.msra.mxu1 %v7274_v1 }
0x1868   :  { %7035 = vmatprep.subr.bf16.mxu1 %v7274_v1  ;;  %7008 = vmatpush3.bf16.msra.mxu0 %v7007_v14 }
0x1869   :  { %7010 = vmatprep.subr.bf16.mxu0 %v7009_v28 }
0x186a   :  { %4732 = vmatmul.mubr.f32.gmra.mrb[46].mxu1 %v8671_v62 }
0x186b   :  { %7036 = vmatpush3.bf16.msra.mxu1 %v7274_v1 }
0x186c   :  { %7037 = vmatprep.subr.bf16.mxu1 %v7274_v1  ;;  %7012 = vmatpush3.bf16.msra.mxu0 %v7011_v20 }
0x186d   :  { %7014 = vmatprep.subr.bf16.mxu0 %v7013_v23 }
0x186f   :  { %7038 = vmatpush3.bf16.msra.mxu1 %v7274_v1 }
0x1870   :  { %7039 = vmatprep.subr.bf16.mxu1 %v7274_v1  ;;  %7016 = vmatpush3.bf16.msra.mxu0 %v7015_v24 }
0x1871   :  { %7018 = vmatprep.subr.bf16.mxu0 %v7017_v31 }
0x1873   :  { %7040 = vmatpush3.bf16.msra.mxu1 %v7274_v1 }
0x1874   :  { %7041 = vmatprep.subr.bf16.mxu1 %v7274_v1  ;;  %7020 = vmatpush3.bf16.msra.mxu0 %v7019_v35 }
0x1875   :  { %7022 = vmatprep.subr.bf16.mxu0 %v7021_v39 }
0x1877   :  { %7042 = vmatpush3.bf16.msra.mxu1 %v7274_v1 }
0x1878   :  { %7043 = vmatprep.subr.bf16.mxu1 %v7274_v1  ;;  %7024 = vmatpush3.bf16.msra.mxu0 %v7023_v2 }
0x1879   :  { %7026 = vmatprep.subr.bf16.mxu0 %v7025_v47 }
0x187b   :  { %7044 = vmatpush3.bf16.msra.mxu1 %v7274_v1 }
0x187c   :  { %7045 = vmatprep.subr.bf16.mxu1 %v7274_v1  ;;  %7028 = vmatpush3.bf16.msra.mxu0 %v7027_v49 }
0x187d   :  { %7030 = vmatprep.subr.bf16.mxu0 %v7029_v43 }
0x187f   :  { %7046 = vmatpush3.bf16.msra.mxu1 %v7274_v1 }
0x1880   :  { %7047 = vmatprep.subr.bf16.mxu1 %v7274_v1  ;;  %7032 = vmatpush3.bf16.msra.mxu0 %v7031_v42 }
0x1881   :  { %7049 = vmatprep.subr.bf16.mxu0 %v7274_v1 }
0x1883   :  { %7048 = vmatpush3.bf16.msra.mxu1 %v7274_v1 }
0x1939   :  { %v4727_v58 = vpop.f32.mrb[44].mxu1 }
0x193a   :  { %v8790_v59 = vadd.f32 %v4727_v58, %v4654_v10  ;;  %v4729_v15 = vpop.f32.mrb[45].mxu1 }
0x193b   :  { %v8792_v60 = vadd.f32 %v4729_v15, %v4658_v57 }
0x193c   :  { %v8795_v52 = vmul.f32 0.70710677, %v8790_v59 }
0x193d   :  { %v8798_v61 = vmul.f32 0.70710677, %v8792_v60  ;;  %v4733_v55 = vpop.f32.mrb[46].mxu1 }
0x193e   :  { %v4754_v56 = vand.u32 2147483647, %v8795_v52  ;;  %v8801_v17 = vadd.f32 %v4733_v55, %v4654_v10  ;;  %v4735_v44 = vpop.f32.mrb[47].mxu1  ;;  %vm4746_vm9 = vcmp.ge.f32.partialorder %v8795_v52, 0.0 }
0x193f   :  { %v4755_v46 = vand.u32 2147483647, %v8798_v61  ;;  %v8804_v63 = vadd.f32 %v4735_v44, %v4658_v57  ;;  %vm4747_vm10 = vcmp.ge.f32.partialorder %v8798_v61, 0.0 }
0x1940   :  { %v4758_v11 = vmul.f32 0.3275911, %v4754_v56  ;;  %v8807_v27 = vmul.f32 0.70710677, %v8801_v17  ;;  %v4810_v12 = vsub.f32 0.0, %v4754_v56 }
0x1941   :  { %v4759_v5 = vmul.f32 0.3275911, %v4755_v46  ;;  %v8810_v6 = vmul.f32 0.70710677, %v8804_v63  ;;  %v4811_v20 = vsub.f32 0.0, %v4755_v46 }
0x1942   :  { %v4762_v30 = vadd.f32 1.0, %v4758_v11  ;;  %v4756_v13 = vand.u32 2147483647, %v8807_v27  ;;  %v4814_v22 = vmul.f32 %v4810_v12, %v4754_v56  ;;  %vm4748_vm11 = vcmp.ge.f32.partialorder %v8807_v27, 0.0 }
0x1943   :  { %v4763_v7 = vadd.f32 1.0, %v4759_v5  ;;  %v4757_v16 = vand.u32 2147483647, %v8810_v6  ;;  %v4815_v25 = vmul.f32 %v4811_v20, %v4755_v46  ;;  %vm4749_vm12 = vcmp.ge.f32.partialorder %v8810_v6, 0.0 }
0x1944   :  { %7228 = vrcp.f32 %v4762_v30  ;;  %v4760_v14 = vmul.f32 0.3275911, %v4756_v13  ;;  %v4812_v24 = vsub.f32 0.0, %v4756_v13  ;;  %v4818_v31 = vmul.f32 1.442695, %v4814_v22 }
0x1945   :  { %7230 = vrcp.f32 %v4763_v7  ;;  %v4761_v28 = vmul.f32 0.3275911, %v4757_v16  ;;  %v4813_v3 = vsub.f32 0.0, %v4757_v16  ;;  %v4820_v37 = vmul.f32 1.442695, %v4815_v25 }
0x1946   :  { %v4764_v18 = vadd.f32 1.0, %v4760_v14  ;;  %v4816_v39 = vmul.f32 %v4812_v24, %v4756_v13  ;;  %v4740_v6 = vmul.f32 0.5, %v8801_v17  ;;  %v5483_v17 = vld [vmem:[%s8941_s13 + $0x1] ss:$0 sm:$0xff] }
0x1947   :  { %v4765_v19 = vadd.f32 1.0, %v4761_v28  ;;  %v4817_v32 = vmul.f32 %v4813_v3, %v4757_v16 }
0x1948   :  { %7232 = vrcp.f32 %v4764_v18  ;;  %v4822_v49 = vmul.f32 1.442695, %v4816_v39 }
0x1949   :  { %7234 = vrcp.f32 %v4765_v19  ;;  %v4824_v42 = vmul.f32 1.442695, %v4817_v32 }
0x194a   :  { %7236 = vpow2.f32 %v4818_v31 }
0x194b   :  { %7238 = vpow2.f32 %v4820_v37 }
0x194c   :  { %7240 = vpow2.f32 %v4822_v49 }
0x194d   :  { %7242 = vpow2.f32 %v4824_v42 }
0x194e   :  { %v7229_v21 = vpop.eup %7228 }
0x194f   :  { %v7231_v23 = vpop.eup %7230  ;;  %v4774_v29 = vmul.f32 1.0614054, %v7229_v21 }
0x1950   :  { %v4775_v26 = vmul.f32 1.0614054, %v7231_v23 }
0x1951   :  { %v4778_v0 = vadd.f32 -1.4531521, %v4774_v29  ;;  %v4750_v29 = vsel %vm4746_vm9, 1.0, %v7282_v38 }
0x1952   :  { %v4779_v34 = vadd.f32 -1.4531521, %v4775_v26  ;;  %v7233_v35 = vpop.eup %7232 }
0x1953   :  { %v4782_v36 = vmul.f32 %v7229_v21, %v4778_v0  ;;  %v4776_v45 = vmul.f32 1.0614054, %v7233_v35  ;;  %v7235_v9 = vpop.eup %7234 }
0x1954   :  { %v4783_v41 = vmul.f32 %v7231_v23, %v4779_v34  ;;  %v4777_v4 = vmul.f32 1.0614054, %v7235_v9  ;;  %v7237_v7 = vpop.eup %7236 }
0x1955   :  { %v4786_v2 = vadd.f32 1.4214138, %v4782_v36  ;;  %v4780_v53 = vadd.f32 -1.4531521, %v4776_v45  ;;  %v7239_v16 = vpop.eup %7238  ;;  %v4739_v36 = vmul.f32 0.5, %v8792_v60  ;;  %v4741_v60 = vmul.f32 0.5, %v8804_v63 }
0x1956   :  { %v4787_v47 = vadd.f32 1.4214138, %v4783_v41  ;;  %v4781_v54 = vadd.f32 -1.4531521, %v4777_v4  ;;  %v4738_v41 = vmul.f32 0.5, %v8790_v59 }
0x1957   :  { %v4790_v48 = vmul.f32 %v7229_v21, %v4786_v2  ;;  %v4784_v40 = vmul.f32 %v7233_v35, %v4780_v53  ;;  %v4753_v53 = vsel %vm4749_vm12, 1.0, %v7282_v38 }
0x1958   :  { %v4791_v50 = vmul.f32 %v7231_v23, %v4787_v47  ;;  %v4785_v58 = vmul.f32 %v7235_v9, %v4781_v54 }
0x1959   :  { %v4794_v43 = vadd.f32 -0.28449672, %v4790_v48  ;;  %v4788_v10 = vadd.f32 1.4214138, %v4784_v40 }
0x195a   :  { %v4795_v8 = vadd.f32 -0.28449672, %v4791_v50  ;;  %v4789_v44 = vadd.f32 1.4214138, %v4785_v58 }
0x195b   :  { %v4798_v57 = vmul.f32 %v7229_v21, %v4794_v43  ;;  %v4792_v55 = vmul.f32 %v7233_v35, %v4788_v10 }
0x195c   :  { %v4799_v15 = vmul.f32 %v7231_v23, %v4795_v8  ;;  %v4793_v30 = vmul.f32 %v7235_v9, %v4789_v44 }
0x195d   :  { %v4802_v56 = vadd.f32 0.2548296, %v4798_v57  ;;  %v4796_v11 = vadd.f32 -0.28449672, %v4792_v55 }
0x195e   :  { %v4803_v46 = vadd.f32 0.2548296, %v4799_v15  ;;  %v4797_v28 = vadd.f32 -0.28449672, %v4793_v30  ;;  %v5173_v30 = vld [vmem:[%s8944_s16 + $0x10] sm:$0xff] }
0x195f   :  { %v4806_v5 = vmul.f32 %v7229_v21, %v4802_v56  ;;  %v4800_v14 = vmul.f32 %v7233_v35, %v4796_v11  ;;  %v7241_v21 = vpop.eup %7240 }
0x1960   :  { %v4807_v13 = vmul.f32 %v7231_v23, %v4803_v46  ;;  %v4801_v22 = vmul.f32 %v7235_v9, %v4797_v28  ;;  %v4751_v23 = vsel %vm4747_vm10, 1.0, %v7282_v38  ;;  %v7243_v61 = vpop.eup %7242  ;;  %v5176_v28 = vld [vmem:[%s8944_s16 + $0x28] sm:$0xff] }
0x1961   :  { %v4826_v18 = vmul.f32 %v7237_v7, %v4806_v5  ;;  %v4804_v19 = vadd.f32 0.2548296, %v4800_v14  ;;  %v7283_v7 = vmov 0.0|0.0   ;;  %v5174_v14 = vld [vmem:[%s8944_s16 + $0x18] sm:$0xff] }
0x1962   :  { %v4827_v12 = vmul.f32 %v7239_v16, %v4807_v13  ;;  %v4805_v0 = vadd.f32 0.2548296, %v4801_v22  ;;  %7065 = vmatprep.subr.bf16.mxu1 %v7283_v7  ;;  %v7069_v16 = vpack.c.bf16 %v5174_v14, %v5173_v30 }
0x1963   :  { %v4830_v20 = vsub.f32 1.0, %v4826_v18  ;;  %v4808_v24 = vmul.f32 %v7233_v35, %v4804_v19  ;;  %v4752_v35 = vsel %vm4748_vm11, 1.0, %v7282_v38  ;;  %v5175_v18 = vld [vmem:[%s8944_s16 + $0x20] sm:$0xff]  ;;  %v5177_v19 = vld [vmem:[%s8944_s16 + $0x30] sm:$0xff] }
0x1964   :  { %v4831_v25 = vsub.f32 1.0, %v4827_v12  ;;  %v4809_v34 = vmul.f32 %v7235_v9, %v4805_v0  ;;  %v7072_v12 = vpack.c.bf16 %v5176_v28, %v5175_v18 }
0x1965   :  { %v4834_v26 = vmul.f32 %v4830_v20, %v4750_v29  ;;  %v4828_v31 = vmul.f32 %v7241_v21, %v4808_v24  ;;  %v5178_v20 = vld [vmem:[%s8944_s16 + $0x38] sm:$0xff]  ;;  %v5179_v29 = vld [vmem:[%s8944_s16 + $0x40] sm:$0xff]  ;;  %v5181_v21 = vld [vmem:[%s8944_s16 + $0x50] sm:$0xff] }
0x1966   :  { %v4835_v52 = vmul.f32 %v4831_v25, %v4751_v23  ;;  %v4829_v45 = vmul.f32 %v7243_v61, %v4809_v34  ;;  %v7075_v22 = vpack.c.bf16 %v5178_v20, %v5177_v19  ;;  %v5180_v25 = vld [vmem:[%s8944_s16 + $0x48] sm:$0xff] }
0x1967   :  { %v4838_v3 = vadd.f32 1.0, %v4834_v26  ;;  %v4832_v39 = vsub.f32 1.0, %v4828_v31  ;;  %v7078_v24 = vpack.c.bf16 %v5180_v25, %v5179_v29  ;;  %v5182_v26 = vld [vmem:[%s8944_s16 + $0x58] sm:$0xff] }
0x1968   :  { %v4839_v37 = vadd.f32 1.0, %v4835_v52  ;;  %v4833_v27 = vsub.f32 1.0, %v4829_v45  ;;  %v7081_v23 = vpack.c.bf16 %v5182_v26, %v5181_v21  ;;  %v5185_v45 = vld [vmem:[%s8944_s16 + $0x70] sm:$0xff] }
0x1969   :  { %v4836_v32 = vmul.f32 %v4832_v39, %v4752_v35  ;;  %v4842_v47 = vmul.f32 %v4838_v3, %v4738_v41  ;;  %v5184_v39 = vld [vmem:[%s8944_s16 + $0x68] sm:$0xff] }
0x196a   :  { %v4843_v2 = vmul.f32 %v4839_v37, %v4739_v36  ;;  %v4837_v9 = vmul.f32 %v4833_v27, %v4753_v53  ;;  %v5183_v37 = vld [vmem:[%s8944_s16 + $0x60] sm:$0xff] }
0x196b   :  { %v4840_v48 = vadd.f32 1.0, %v4836_v32  ;;  %v7084_v35 = vpack.c.bf16 %v5184_v39, %v5183_v37 }
0x196c   :  { %4951 = vmatprep.mubr.f32.mxu0 %v4843_v2  ;;  %v4841_v59 = vadd.f32 1.0, %v4837_v9  ;;  %v5186_v2 = vld [vmem:[%s8944_s16 + $0x78] sm:$0xff] }
0x196d   :  { %4952 = vmatmul.mubr.f32.vlgmr.msra.gmra.mrb[60].mxu0 %v4842_v47  ;;  %v4844_v4 = vmul.f32 %v4840_v48, %v4740_v6  ;;  %v7087_v32 = vpack.c.bf16 %v5186_v2, %v5185_v45  ;;  %v5486_v47 = vld [vmem:[%s8942_s14 + $0x1] ss:$0 sm:$0xff] }
0x196e   :  { %7050 = vmatpush3.bf16.msra.mxu0 %v7274_v1  ;;  %v4845_v49 = vmul.f32 %v4841_v59, %v4741_v60  ;;  %v5487_v48 = vld [vmem:[%s8943_s15 + $0x1] ss:$0 sm:$0xff] }
0x196f   :  { %7051 = vmatprep.subr.bf16.mxu0 %v7274_v1 }
0x1970   :  { %4956 = vmatprep.mubr.f32.mxu0 %v4845_v49 }
0x1971   :  { %4957 = vmatmul.mubr.f32.gmra.mrb[62].mxu0 %v4844_v4 }
0x1972   :  { %7052 = vmatpush3.bf16.msra.mxu0 %v7274_v1 }
0x1973   :  { %7053 = vmatprep.subr.bf16.mxu0 %v7274_v1 }
0x1976   :  { %7054 = vmatpush3.bf16.msra.mxu0 %v7274_v1 }
0x1977   :  { %7055 = vmatprep.subr.bf16.mxu0 %v7274_v1 }
0x197a   :  { %7056 = vmatpush3.bf16.msra.mxu0 %v7274_v1 }
0x197b   :  { %7057 = vmatprep.subr.bf16.mxu0 %v7274_v1 }
0x197e   :  { %7058 = vmatpush3.bf16.msra.mxu0 %v7274_v1 }
0x197f   :  { %7059 = vmatprep.subr.bf16.mxu0 %v7274_v1 }
0x1982   :  { %7060 = vmatpush3.bf16.msra.mxu0 %v7274_v1 }
0x1983   :  { %7061 = vmatprep.subr.bf16.mxu0 %v7274_v1 }
0x1986   :  { %7062 = vmatpush3.bf16.msra.mxu0 %v7274_v1 }
0x1987   :  { %7063 = vmatprep.subr.bf16.mxu0 %v7274_v1 }
0x198a   :  { %7064 = vmatpush3.bf16.msra.mxu0 %v7274_v1 }
0x1a40   :  { %v5841_v38 = vpop.f32.mrb[60].mxu0 }
0x1a41   :  { %v5842_v63 = vpop.f32.mrb[61].mxu0 }
0x1a42   :  { %v5843_v50 = vadd.f32 %v5842_v63, %v5841_v38  ;;  %v5490_v63 = vld [vmem:[%s8945_s17] ss:$0 sm:$0xff] }
0x1a44   :  { %v4954_v40 = vadd.f32 %v5843_v50, %v5483_v17  ;;  %v5844_v54 = vpop.f32.mrb[62].mxu0 }
0x1a45   :  { %v5845_v42 = vpop.f32.mrb[63].mxu0 }
0x1a46   :  { %v4962_v43 = vadd.f32 %v4954_v40, %v8666_v51  ;;  %v5846_v8 = vadd.f32 %v5845_v42, %v5844_v54 }
0x1a48   :  { %6512 = vmatprep.mubr.f32.mxu1 %v4962_v43  ;;  %v4959_v10 = vadd.f32 %v5846_v8, %v5483_v17 }
0x1a4a   :  { %v4963_v57 = vadd.f32 %v4959_v10, %v8671_v62  ;;  %v5172_v62 = vld [vmem:[%s8944_s16 + $0x8] sm:$0xff] }
0x1a4c   :  { %6513 = vmatmul.mubr.f32.vlgmr.msra.gmra.mrb[48].mxu1 %v4963_v57 }
0x1a4d   :  { %6582 = vmatprep.mubr.msk.f32.mxu1 %vm7277_vm0, %v7276_v33  ;;  %v5171_v33 = vld [vmem:[%s8944_s16] sm:$0xff] }
0x1a4e   :  { %v7066_v13 = vpack.c.bf16 %v5172_v62, %v5171_v33 }
0x1a50   :  { %7067 = vmatpush3.bf16.msra.mxu1 %v7066_v13 }
0x1a51   :  { %7068 = vmatprep.subr.bf16.mxu1 %v7283_v7 }
0x1a54   :  { %7070 = vmatpush3.bf16.msra.mxu1 %v7069_v16 }
0x1a55   :  { %7071 = vmatprep.subr.bf16.mxu1 %v7283_v7 }
0x1a58   :  { %7073 = vmatpush3.bf16.msra.mxu1 %v7072_v12 }
0x1a59   :  { %7074 = vmatprep.subr.bf16.mxu1 %v7283_v7 }
0x1a5c   :  { %7076 = vmatpush3.bf16.msra.mxu1 %v7075_v22 }
0x1a5d   :  { %7077 = vmatprep.subr.bf16.mxu1 %v7283_v7 }
0x1a60   :  { %7079 = vmatpush3.bf16.msra.mxu1 %v7078_v24 }
0x1a61   :  { %7080 = vmatprep.subr.bf16.mxu1 %v7283_v7 }
0x1a64   :  { %7082 = vmatpush3.bf16.msra.mxu1 %v7081_v23 }
0x1a65   :  { %7083 = vmatprep.subr.bf16.mxu1 %v7283_v7 }
0x1a68   :  { %7085 = vmatpush3.bf16.msra.mxu1 %v7084_v35 }
0x1a69   :  { %7086 = vmatprep.subr.bf16.mxu1 %v7283_v7 }
0x1a6c   :  { %7088 = vmatpush3.bf16.msra.mxu1 %v7087_v32 }
0x1b1f   :  { %v6514_v1 = vpop.f32.mrb[48].mxu1 }
0x1b20   :  { %v5044_v58 = vmul.f32 0.0078125, %v6514_v1  ;;  %v5034_v15 = vpop.f32.mrb[49].mxu1 }
0x1b21   :  { %v5043_v55 = vmul.f32 0.0078125, %v5034_v15 }
0x1b22   :  { %5052 = vperm.xlu1 %7101, %v5044_v58  }
0x1b23   :  { %5047 = vperm.xlu0 %7100, %v5043_v55  }
0x1ba1   :  { %v5053_v56 = vpop.permute.xlu1 %5052 }
0x1ba2   :  { %v5056_v44 = vsub.f32 %v4963_v57, %v5053_v56  ;;  %v5048_v51 = vpop.permute.xlu0 %5047 }
0x1ba3   :  { %v8848_v46 = vsub.f32 %v4962_v43, %v5048_v51 }
0x1ba4   :  { %v5058_v5 = vmul.f32 %v5056_v44, %v5056_v44 }
0x1ba5   :  { %v5057_v11 = vmul.f32 %v8848_v46, %v8848_v46 }
0x1ba7   :  { %6547 = vmatprep.mubr.f32.mxu0 %v5057_v11 }
0x1ba8   :  { %6548 = vmatmul.mubr.f32.vlgmr.msra.gmra.mrb[64].mxu0 %v5058_v5 }
0x1c7b   :  { %v6549_v0 = vpop.f32.mrb[64].mxu0 }
0x1c7c   :  { %v5135_v52 = vmul.f32 0.0078125, %v6549_v0  ;;  %v5125_v31 = vpop.f32.mrb[65].mxu0 }
0x1c7d   :  { %v5134_v3 = vmul.f32 0.0078125, %v5125_v31 }
0x1c7e   :  { %v5137_v34 = vadd.f32 1e-12, %v5135_v52 }
0x1c7f   :  { %v5136_v61 = vadd.f32 1e-12, %v5134_v3 }
0x1c80   :  { %7244 = vrsqrt.f32 %v5137_v34 }
0x1c81   :  { %7246 = vrsqrt.f32 %v5136_v61 }
0x1c8a   :  { %v7245_v36 = vpop.eup %7244 }
0x1c8b   :  { %v7247_v41 = vpop.eup %7246  ;;  %5147 = vperm.xlu0 %7100, %v7245_v36  }
0x1c8c   :  { %5142 = vperm.xlu1 %7101, %v7247_v41  }
0x1d0a   :  { %v5148_v27 = vpop.permute.xlu0 %5147 }
0x1d0b   :  { %v5151_v53 = vmul.f32 %v5148_v27, %v5056_v44  ;;  %v5143_v9 = vpop.permute.xlu1 %5142 }
0x1d0c   :  { %v5150_v60 = vmul.f32 %v5143_v9, %v8848_v46 }
0x1d0d   :  { %v5159_v59 = vmul.f32 %v5486_v47, %v5151_v53 }
0x1d0e   :  { %v5158_v6 = vmul.f32 %v5486_v47, %v5150_v60 }
0x1d0f   :  { %v5167_v49 = vadd.f32 %v5487_v48, %v5159_v59 }
0x1d10   :  { %v5166_v4 = vadd.f32 %v5487_v48, %v5158_v6 }
0x1d11   :  { %5489 = vst [vmem:[%s8946_s18 + $0x18] sm:$0xff] %v5167_v49  ;;  %v5196_v38 = vrot.slane %v5167_v49, 7 }
0x1d12   :  { %5488 = vst [vmem:[%s8946_s18 + $0x10] sm:$0xff] %v5166_v4 }
0x1d13   :  { %v5198_v17 = vsel %vm5197_vm13, %v5196_v38, %v5166_v4 }
0x1d14   :  { %6583 = vmatmul.mubr.f32.vlgmr.msra.gmra.mrb[50].mxu1 %v5198_v17 }
0x1de7   :  { %v5266_v50 = vpop.f32.mrb[50].mxu1 }
0x1de8   :  { %v5267_v40 = vadd.f32 %v5490_v63, %v5266_v50  ;;  %v6584_v43 = vpop.f32.mrb[51].mxu1 }
0x1dea   :  { %7248 = vtanh.f32 %v5267_v40 }
0x1df4   :  { %v7249_v54 = vpop.eup %7248 }
0x1df5   :  { %5271 = vst [vmem:[#allocation2] sm:$0x3] %v7249_v54 }
0x1df6   :  { %7261 = shalt.err (!%p7258_p4)
}
0x1df7   :  { %s7262_s17 = scalar_lea.hbm %s8947_s19, 32 }
0x1df8   :  { %p7263_p5 = scmp.ne.s32.totalorder %s8947_s19, %s7262_s17  ;;  %p7266_p6 = scmp.lt.u32.totalorder %s7262_s17, %s8947_s19 }
0x1dfa   :  { %p7268_p7 = pnand %p7266_p6, %p7263_p5 }
0x1dfc   :  { %7271 = shalt.err (!%p7268_p7)
}
0x1dfd   :  { %5283 = dma.vmem_to_hbm [thread:$0]  %s5281_s27, 32, %s8947_s19, [#allocation3]  }
0x1dfe   :  { %7272 = dma.done.wait [#allocation3], 32  }
0x1dff   :  { %7273 = vsyncadd [#allocation3], 4294967264 }
0x1e00   :  { %5289 = vsyncpa [#allocation3], 1 }

</bundles_post_ra>
